<compile_context>
chip_gen: v5e
topology: v5e:2x2
jax: 0.10.0
libtpu: 0.0.40
codegen_flags: <defaults>
</compile_context>

<pallas_src>
import math
import jax
import jax.numpy as jnp
from jax.experimental import pallas as pl
from jax.experimental.pallas import tpu as pltpu

# ----- module hyper-params (synthetic netconfig, consistent with EncoderNN) -----
B = 2            # batch
M_DIM = 16       # obs_dims['misc']
N_STACKS = 20
S_FEAT = 8       # obs_dims['stacks'] // 20
N_HEXES = 165
H_FEAT = 4       # obs_dims['hexes'] // 165
STACKS_DIM = N_STACKS * S_FEAT               # 160
HEXES_DIM = N_HEXES * H_FEAT                 # 660
OBS_DIM = M_DIM + STACKS_DIM + HEXES_DIM     # 836

DM = 16          # misc hidden
DS = 8           # per-stack hidden
DH = 8           # per-hex hidden
FEATS1_DIM = DM + N_STACKS * DS + N_HEXES * DH   # 1496
FEATS1_PAD = 1536                                 # padded stage-2 K (multiple of 128 and 256)
OUT_DIM = 32

NEG_SLOPE = 0.01  # torch.nn.LeakyReLU default


def _leaky(v):
    return jnp.where(v > 0.0, v, NEG_SLOPE * v)


# --------------------------- fused Pallas kernel ---------------------------
def _encoder_kernel(x_ref, w1_ref, b1_ref, w2_ref, b2_ref, o_ref):
    # Stage 1: misc/stacks/hexes split-linears as one block-diagonal MXU matmul.
    h = jnp.dot(x_ref[...], w1_ref[...], preferred_element_type=jnp.float32)
    h = _leaky(h + b1_ref[...])                       # [B, 1536]; pad lanes stay exactly 0
    # Stage 2: features_extractor2 Linear + LeakyReLU (K padded to 1536, pad rows of W2 are 0).
    y = jnp.dot(h, w2_ref[...], preferred_element_type=jnp.float32)
    o_ref[...] = _leaky(y + b2_ref[...]).astype(o_ref.dtype)


def encoder_forward(fused, x):
    """Fused EncoderNN forward.  x: [B, OBS_DIM] f32 -> [B, OUT_DIM] f32."""
    bsz = x.shape[0]
    vmem = pl.BlockSpec(memory_space=pltpu.MemorySpace.VMEM)
    return pl.pallas_call(
        _encoder_kernel,
        out_shape=jax.ShapeDtypeStruct((bsz, OUT_DIM), jnp.float32),
        in_specs=[vmem, vmem, vmem, vmem, vmem],
        out_specs=vmem,
    )(x, fused["w1"], fused["b1"], fused["w2"], fused["b2"])


# --------------------------- parameter init ---------------------------
def _orthogonal(key, in_f, out_f, gain):
    """Deterministic orthogonal init (mimics torch.nn.init.orthogonal_); weight
    stored as [in_f, out_f] so forward is x @ W."""
    a = jax.random.normal(key, (max(in_f, out_f), min(in_f, out_f)), dtype=jnp.float32)
    q, r = jnp.linalg.qr(a)
    q = q * jnp.sign(jnp.diagonal(r))      # make decomposition unique
    if in_f < out_f:
        q = q.T                            # -> [in_f, out_f]
    return gain * q[:in_f, :out_f]


def init_params(key):
    gain = math.sqrt(2.0)
    ks = jax.random.split(key, 4)
    return {
        "w_misc":   _orthogonal(ks[0], M_DIM, DM, gain),
        "b_misc":   jnp.zeros((DM,), jnp.float32),
        "w_stacks": _orthogonal(ks[1], S_FEAT, DS, gain),
        "b_stacks": jnp.zeros((DS,), jnp.float32),
        "w_hexes":  _orthogonal(ks[2], H_FEAT, DH, gain),
        "b_hexes":  jnp.zeros((DH,), jnp.float32),
        "w_feat2":  _orthogonal(ks[3], FEATS1_DIM, OUT_DIM, gain),
        "b_feat2":  jnp.zeros((OUT_DIM,), jnp.float32),
    }


def _block_diag_repeat(w, n):
    """[k, d] -> [n*k, n*d] block-diagonal with n copies of w (single einsum, no loops)."""
    k, d = w.shape
    eye = jnp.eye(n, dtype=w.dtype)
    return jnp.einsum("ij,kd->ikjd", eye, w).reshape(n * k, n * d)


def fuse_params(params):
    """One-time precompute (wrapper-side): fold the three split linears into one
    lane-dense block-diagonal stage-1 weight and zero-pad stage-2 K 1496 -> 1536."""
    w1 = jnp.zeros((OBS_DIM, FEATS1_PAD), jnp.float32)
    w1 = w1.at[:M_DIM, :DM].set(params["w_misc"])
    w1 = w1.at[M_DIM:M_DIM + STACKS_DIM, DM:DM + N_STACKS * DS].set(
        _block_diag_repeat(params["w_stacks"], N_STACKS))
    w1 = w1.at[M_DIM + STACKS_DIM:OBS_DIM, DM + N_STACKS * DS:FEATS1_DIM].set(
        _block_diag_repeat(params["w_hexes"], N_HEXES))

    b1 = jnp.concatenate([
        params["b_misc"],
        jnp.tile(params["b_stacks"], N_STACKS),
        jnp.tile(params["b_hexes"], N_HEXES),
        jnp.zeros((FEATS1_PAD - FEATS1_DIM,), jnp.float32),
    ])

    w2 = jnp.pad(params["w_feat2"], ((0, FEATS1_PAD - FEATS1_DIM), (0, 0)))

    return {
        "w1": w1,                                   # [836, 1536]
        "b1": b1.reshape(1, FEATS1_PAD),            # [1, 1536]
        "w2": w2,                                   # [1536, 32]
        "b2": params["b_feat2"].reshape(1, OUT_DIM) # [1, 32]
    }


# --------------------------- pure-JAX reference (unfused, matches PyTorch) ---------------------------
def encoder_ref(params, x):
    bsz = x.shape[0]
    misc = x[:, :M_DIM]
    stacks = x[:, M_DIM:M_DIM + STACKS_DIM]
    hexes = x[:, M_DIM + STACKS_DIM:]
    fmisc = _leaky(misc @ params["w_misc"] + params["b_misc"])
    fstacks = _leaky(stacks.reshape(bsz * N_STACKS, S_FEAT) @ params["w_stacks"]
                     + params["b_stacks"]).reshape(bsz, N_STACKS * DS)
    fhexes = _leaky(hexes.reshape(bsz * N_HEXES, H_FEAT) @ params["w_hexes"]
                    + params["b_hexes"]).reshape(bsz, N_HEXES * DH)
    feats1 = jnp.concatenate([fmisc, fstacks, fhexes], axis=1)
    return _leaky(feats1 @ params["w_feat2"] + params["b_feat2"])


if __name__ == "__main__":
    key = jax.random.PRNGKey(0)
    k_param, k_x = jax.random.split(key)
    params = init_params(k_param)
    fused = fuse_params(params)
    x = jax.random.normal(k_x, (B, OBS_DIM), dtype=jnp.float32)

    out = jax.block_until_ready(encoder_forward(fused, x))
    ref = jax.block_until_ready(encoder_ref(params, x))

    assert out.shape == (B, OUT_DIM), out.shape
    assert bool(jnp.all(jnp.isfinite(out)))
    rel_err = float(jnp.max(jnp.abs(out - ref)) / (jnp.max(jnp.abs(ref)) + 1e-6))
    assert rel_err < 2e-2, f"mismatch vs reference: rel_err={rel_err}"
    print("KERNEL_OK")
</pallas_src>

<mosaic_0001>
module attributes {stable_mosaic.version = 11 : i64} {
  func.func @_encoder_kernel(%arg0: memref<2x836xf32, #tpu.memory_space<vmem>>, %arg1: memref<836x1536xf32, #tpu.memory_space<vmem>>, %arg2: memref<1x1536xf32, #tpu.memory_space<vmem>>, %arg3: memref<1536x32xf32, #tpu.memory_space<vmem>>, %arg4: memref<1x32xf32, #tpu.memory_space<vmem>>, %arg5: memref<2x32xf32, #tpu.memory_space<vmem>>) attributes {dimension_semantics = [], scalar_prefetch = 0 : i64, scratch_operands = 0 : i64, tpu.core_type = #tpu.core_type<tc>} {
    %c0 = arith.constant 0 : index
    %c0_0 = arith.constant 0 : index
    %0 = vector.load %arg0[%c0, %c0_0] : memref<2x836xf32, #tpu.memory_space<vmem>>, vector<2x836xf32>
    %c0_1 = arith.constant 0 : index
    %c0_2 = arith.constant 0 : index
    %1 = vector.load %arg1[%c0_1, %c0_2] : memref<836x1536xf32, #tpu.memory_space<vmem>>, vector<836x1536xf32>
    %cst = arith.constant dense<0.000000e+00> : vector<2x1536xf32>
    %2 = tpu.matmul %0, %1, %cst {dimension_numbers = #tpu.dot_dimension_numbers<[1], [0], [0], [1], [0, 0, 1, 1], [], []>} : vector<2x836xf32>, vector<836x1536xf32>, vector<2x1536xf32> -> vector<2x1536xf32>
    %c0_3 = arith.constant 0 : index
    %c0_4 = arith.constant 0 : index
    %3 = vector.load %arg2[%c0_3, %c0_4] : memref<1x1536xf32, #tpu.memory_space<vmem>>, vector<1x1536xf32>
    %4 = vector.broadcast %3 : vector<1x1536xf32> to vector<2x1536xf32>
    %5 = arith.addf %2, %4 : vector<2x1536xf32>
    %cst_5 = arith.constant 0.000000e+00 : f32
    %6 = vector.broadcast %cst_5 : f32 to vector<2x1536xf32>
    %7 = arith.cmpf ogt, %5, %6 : vector<2x1536xf32>
    %cst_6 = arith.constant 0.00999999977 : f32
    %8 = vector.broadcast %cst_6 : f32 to vector<2x1536xf32>
    %9 = arith.mulf %8, %5 : vector<2x1536xf32>
    %10 = arith.select %7, %5, %9 : vector<2x1536xi1>, vector<2x1536xf32>
    %c0_7 = arith.constant 0 : index
    %c0_8 = arith.constant 0 : index
    %11 = vector.load %arg3[%c0_7, %c0_8] : memref<1536x32xf32, #tpu.memory_space<vmem>>, vector<1536x32xf32>
    %cst_9 = arith.constant dense<0.000000e+00> : vector<2x32xf32>
    %12 = tpu.matmul %10, %11, %cst_9 {dimension_numbers = #tpu.dot_dimension_numbers<[1], [0], [0], [1], [0, 0, 1, 1], [], []>} : vector<2x1536xf32>, vector<1536x32xf32>, vector<2x32xf32> -> vector<2x32xf32>
    %c0_10 = arith.constant 0 : index
    %c0_11 = arith.constant 0 : index
    %13 = vector.load %arg4[%c0_10, %c0_11] : memref<1x32xf32, #tpu.memory_space<vmem>>, vector<1x32xf32>
    %14 = vector.broadcast %13 : vector<1x32xf32> to vector<2x32xf32>
    %15 = arith.addf %12, %14 : vector<2x32xf32>
    %cst_12 = arith.constant 0.000000e+00 : f32
    %16 = vector.broadcast %cst_12 : f32 to vector<2x32xf32>
    %17 = arith.cmpf ogt, %15, %16 : vector<2x32xf32>
    %cst_13 = arith.constant 0.00999999977 : f32
    %18 = vector.broadcast %cst_13 : f32 to vector<2x32xf32>
    %19 = arith.mulf %18, %15 : vector<2x32xf32>
    %20 = arith.select %17, %15, %19 : vector<2x32xi1>, vector<2x32xf32>
    %c0_14 = arith.constant 0 : index
    %c0_15 = arith.constant 0 : index
    %21 = vector.load %arg5[%c0_14, %c0_15] : memref<2x32xf32, #tpu.memory_space<vmem>>, vector<2x32xf32>
    tpu.vector_store %arg5[%c0_14, %c0_15], %20 {strides = array<i32>} : memref<2x32xf32, #tpu.memory_space<vmem>>, vector<2x32xf32>,
    return
  }
}

</mosaic_0001>

<bundles_post_ra>
// kernel: tpu_custom_call.1
= control target key start
LH: loop header
LB: loop body
LE: loop exit
PB: predicated region body
PF: predicated region fallthrough
CT: control target
= control target key end

     0   :  { %10 = vsyncpa [#allocation3], 0  ;;  %s4746_s0 = inlined_call_operand.hbm [shape: f32[2,836], index: 0, kind: input, shape index: {}]   ;;  %s4747_s1 = inlined_call_operand.hbm [shape: f32[836,1536], index: 1, kind: input, shape index: {}]   ;;  %s4748_s2 = inlined_call_operand.hbm [shape: f32[1,1536], index: 2, kind: input, shape index: {}]   ;;  %s4749_s3 = inlined_call_operand.vmem [shape: f32[1536,32], index: 3, kind: input, shape index: {}]   ;;  %s4750_s4 = inlined_call_operand.hbm [shape: f32[1,32], index: 4, kind: input, shape index: {}]   ;;  %s4751_s5 = inlined_call_operand.hbm [shape: f32[2,32], index: 5, kind: output, shape index: {}]  }
   0x1   :  { %11 = vsyncpa [#allocation6], 0 }
   0x2   :  { %12 = vsyncpa [#allocation9], 0  ;;  %s29_s20 = sshll.u32 %s4747_s1, 4  ;;  %s30_s20 = int_to_ptr.hbm [resolvable:$true] %s29_s20 }
   0x3   :  { %13 = vsyncpa [#allocation4], 0  ;;  %s3784_s21 = smov [#allocation5]   ;;  %s19_s25 = sshll.u32 %s4746_s0, 4  ;;  %s20_s25 = int_to_ptr.hbm [resolvable:$true] %s19_s25 }
   0x4   :  { %s31_s22 = sshll.u32 %s3784_s21, 4  ;;  %s3785_s26 = smov 1536   ;;  %s32_s22 = int_to_ptr.vmem [resolvable:$true] %s31_s22 }
   0x5   :  { %s3786_s27 = smov 96   ;;  %s3787_s28 = smov [#allocation2]  }
   0x6   :  { %37 = dma.hbm_to_vmem [thread:$0]  %s30_s20, 161280, %s32_s22, [#allocation6], %s3785_s26, %s3785_s26, %s3786_s27  }
   0x7   :  { %s21_s29 = sshll.u32 %s3787_s28, 4  ;;  %s43_s7 = sshll.u32 %s4748_s2, 4  ;;  %s22_s29 = int_to_ptr.vmem [resolvable:$true] %s21_s29  ;;  %s44_s7 = int_to_ptr.hbm [resolvable:$true] %s43_s7 }
   0x8   :  { %24 = dma.hbm_to_vmem [thread:$0]  %s20_s25, 224, %s22_s29, [#allocation3]  }
   0x9   :  { %s56_s9 = sshll.u32 %s4750_s4, 4  ;;  %s3788_s10 = smov [#allocation7]   ;;  %s57_s9 = int_to_ptr.hbm [resolvable:$true] %s56_s9 }
   0xa   :  { %s45_s11 = sshll.u32 %s3788_s10, 4  ;;  %s3789_s0 = smov [#allocation8]   ;;  %s46_s11 = int_to_ptr.vmem [resolvable:$true] %s45_s11 }
   0xb   :  { %48 = dma.hbm_to_vmem [thread:$0]  %s44_s7, 192, %s46_s11, [#allocation6]  }
   0xc   :  { %s58_s12 = sshll.u32 %s3789_s0, 4  ;;  %s59_s12 = int_to_ptr.vmem [resolvable:$true] %s58_s12 }
   0xd   :  { %61 = dma.hbm_to_vmem [thread:$0]  %s57_s9, 16, %s59_s12, [#allocation9]  }
   0xe   :  { %3776 = dma.done.wait [#allocation3], 224  }
   0xf   :  { %3777 = vsyncadd [#allocation3], 4294967072 }
  0x10   :  { %3778 = dma.done.wait [#allocation6], 161472  }
  0x11   :  { %3779 = vsyncadd [#allocation6], 4294805824 }
  0x12   :  { %3780 = dma.done.wait [#allocation9], 16  }
  0x13   :  { %3781 = vsyncadd [#allocation9], 4294967280  ;;  %v260_v0 = vld [vmem:[#allocation5 + $0x5a0] sm:$0xff]  ;;  %vm1389_vm0 = vcmask 1043456   ;;  %vm1386_vm1 = vcmask 556032   ;;  %s3590_s21 = sshll.u32 %s4751_s5, 4  ;;  %s3591_s21 = int_to_ptr.hbm [resolvable:$true] %s3590_s21 }
  0x14   :  { %v452_v1 = vld [vmem:[#allocation5 + $0xba0] sm:$0xff]  ;;  %1426 = vmatpush.msra.mxu0 %v260_v0  ;;  %vm3581_vm15 = vcmask 254976  }
  0x15   :  { %v644_v2 = vld [vmem:[#allocation5 + $0x11a0] sm:$0xff]  ;;  %1446 = vmatpush.msra.mxu1 %v452_v1 }
  0x16   :  { %v836_v3 = vld [vmem:[#allocation5 + $0x17a0] sm:$0xff]  ;;  %1466 = vmatpush.msra.mxu2 %v644_v2 }
  0x17   :  { %v248_v4 = vld [vmem:[#allocation5 + $0x540] sm:$0xff]  ;;  %1486 = vmatpush.msra.mxu3 %v836_v3  ;;  %v261_v3 = vld [vmem:[#allocation5 + $0x5a8] sm:$0xff] }
  0x18   :  { %v440_v5 = vld [vmem:[#allocation5 + $0xb40] sm:$0xff]  ;;  %1427 = vmatpush.msra.mxu0 %v248_v4 }
  0x19   :  { %v632_v6 = vld [vmem:[#allocation5 + $0x1140] sm:$0xff]  ;;  %1447 = vmatpush.msra.mxu1 %v440_v5 }
  0x1a   :  { %v824_v7 = vld [vmem:[#allocation5 + $0x1740] sm:$0xff]  ;;  %1467 = vmatpush.msra.mxu2 %v632_v6 }
  0x1b   :  { %v236_v8 = vld [vmem:[#allocation5 + $0x4e0] sm:$0xff]  ;;  %1487 = vmatpush.msra.mxu3 %v824_v7  ;;  %v249_v7 = vld [vmem:[#allocation5 + $0x548] sm:$0xff] }
  0x1c   :  { %v428_v9 = vld [vmem:[#allocation5 + $0xae0] sm:$0xff]  ;;  %1428 = vmatpush.msra.mxu0 %v236_v8  ;;  %v78_v8 = vld [vmem:[#allocation2] sm:$0xff] }
  0x1d   :  { %v620_v10 = vld [vmem:[#allocation5 + $0x10e0] sm:$0xff]  ;;  %1448 = vmatpush.msra.mxu1 %v428_v9  ;;  %1370 = vst [vmem:[#allocation1] ss:$4 sm:$0xff] %v78_v8  ;;  %v369_v8 = vld [vmem:[#allocation5 + $0x908] sm:$0xff] }
  0x1e   :  { %v812_v11 = vld [vmem:[#allocation5 + $0x16e0] sm:$0xff]  ;;  %1468 = vmatpush.msra.mxu2 %v620_v10 }
  0x1f   :  { %v224_v12 = vld [vmem:[#allocation5 + $0x480] sm:$0xff]  ;;  %1488 = vmatpush.msra.mxu3 %v812_v11 }
  0x20   :  { %v416_v13 = vld [vmem:[#allocation5 + $0xa80] sm:$0xff]  ;;  %1429 = vmatpush.msra.mxu0 %v224_v12  ;;  %v237_v12 = vld [vmem:[#allocation5 + $0x4e8] sm:$0xff] }
  0x21   :  { %v608_v14 = vld [vmem:[#allocation5 + $0x1080] sm:$0xff]  ;;  %1449 = vmatpush.msra.mxu1 %v416_v13 }
  0x22   :  { %v800_v15 = vld [vmem:[#allocation5 + $0x1680] sm:$0xff]  ;;  %1469 = vmatpush.msra.mxu2 %v608_v14 }
  0x23   :  { %v212_v16 = vld [vmem:[#allocation5 + $0x420] sm:$0xff]  ;;  %1489 = vmatpush.msra.mxu3 %v800_v15 }
  0x24   :  { %v404_v17 = vld [vmem:[#allocation5 + $0xa20] sm:$0xff]  ;;  %1430 = vmatpush.msra.mxu0 %v212_v16  ;;  %v225_v16 = vld [vmem:[#allocation5 + $0x488] sm:$0xff] }
  0x25   :  { %v596_v18 = vld [vmem:[#allocation5 + $0x1020] sm:$0xff]  ;;  %1450 = vmatpush.msra.mxu1 %v404_v17 }
  0x26   :  { %v788_v19 = vld [vmem:[#allocation5 + $0x1620] sm:$0xff]  ;;  %1470 = vmatpush.msra.mxu2 %v596_v18 }
  0x27   :  { %v200_v20 = vld [vmem:[#allocation5 + $0x3c0] sm:$0xff]  ;;  %1490 = vmatpush.msra.mxu3 %v788_v19 }
  0x28   :  { %v392_v21 = vld [vmem:[#allocation5 + $0x9c0] sm:$0xff]  ;;  %1431 = vmatpush.msra.mxu0 %v200_v20  ;;  %v213_v20 = vld [vmem:[#allocation5 + $0x428] sm:$0xff] }
  0x29   :  { %v584_v22 = vld [vmem:[#allocation5 + $0xfc0] sm:$0xff]  ;;  %1451 = vmatpush.msra.mxu1 %v392_v21 }
  0x2a   :  { %v776_v23 = vld [vmem:[#allocation5 + $0x15c0] sm:$0xff]  ;;  %1471 = vmatpush.msra.mxu2 %v584_v22 }
  0x2b   :  { %v188_v24 = vld [vmem:[#allocation5 + $0x360] sm:$0xff]  ;;  %1491 = vmatpush.msra.mxu3 %v776_v23 }
  0x2c   :  { %v380_v25 = vld [vmem:[#allocation5 + $0x960] sm:$0xff]  ;;  %1432 = vmatpush.msra.mxu0 %v188_v24  ;;  %v201_v24 = vld [vmem:[#allocation5 + $0x3c8] sm:$0xff] }
  0x2d   :  { %v572_v26 = vld [vmem:[#allocation5 + $0xf60] sm:$0xff]  ;;  %1452 = vmatpush.msra.mxu1 %v380_v25 }
  0x2e   :  { %v764_v27 = vld [vmem:[#allocation5 + $0x1560] sm:$0xff]  ;;  %1472 = vmatpush.msra.mxu2 %v572_v26 }
  0x2f   :  { %v176_v28 = vld [vmem:[#allocation5 + $0x300] sm:$0xff]  ;;  %1492 = vmatpush.msra.mxu3 %v764_v27 }
  0x30   :  { %v368_v29 = vld [vmem:[#allocation5 + $0x900] sm:$0xff]  ;;  %1433 = vmatpush.msra.mxu0 %v176_v28  ;;  %v189_v28 = vld [vmem:[#allocation5 + $0x368] sm:$0xff] }
  0x31   :  { %v560_v30 = vld [vmem:[#allocation5 + $0xf00] sm:$0xff]  ;;  %1453 = vmatpush.msra.mxu1 %v368_v29  ;;  %v79_v29 = vld [vmem:[#allocation2 + $0x8] sm:$0x3f] }
  0x32   :  { %v752_v31 = vld [vmem:[#allocation5 + $0x1500] sm:$0xff]  ;;  %1473 = vmatpush.msra.mxu2 %v560_v30  ;;  %1372 = vst [vmem:[#allocation1 + $0x20] ss:$4 sm:$0xff] %v79_v29  ;;  %v309_v29 = vld [vmem:[#allocation5 + $0x728] sm:$0xff] }
  0x33   :  { %v164_v32 = vld [vmem:[#allocation5 + $0x2a0] sm:$0xff]  ;;  %1493 = vmatpush.msra.mxu3 %v752_v31 }
  0x34   :  { %v356_v33 = vld [vmem:[#allocation5 + $0x8a0] sm:$0xff]  ;;  %1434 = vmatpush.msra.mxu0 %v164_v32 }
  0x35   :  { %v548_v34 = vld [vmem:[#allocation5 + $0xea0] sm:$0xff]  ;;  %1454 = vmatpush.msra.mxu1 %v356_v33  ;;  %v177_v33 = vld [vmem:[#allocation5 + $0x308] sm:$0xff] }
  0x36   :  { %v740_v35 = vld [vmem:[#allocation5 + $0x14a0] sm:$0xff]  ;;  %1474 = vmatpush.msra.mxu2 %v548_v34 }
  0x37   :  { %v152_v36 = vld [vmem:[#allocation5 + $0x240] sm:$0xff]  ;;  %1494 = vmatpush.msra.mxu3 %v740_v35 }
  0x38   :  { %v344_v37 = vld [vmem:[#allocation5 + $0x840] sm:$0xff]  ;;  %1435 = vmatpush.msra.mxu0 %v152_v36 }
  0x39   :  { %v536_v38 = vld [vmem:[#allocation5 + $0xe40] sm:$0xff]  ;;  %1455 = vmatpush.msra.mxu1 %v344_v37  ;;  %v165_v37 = vld [vmem:[#allocation5 + $0x2a8] sm:$0xff] }
  0x3a   :  { %v728_v39 = vld [vmem:[#allocation5 + $0x1440] sm:$0xff]  ;;  %1475 = vmatpush.msra.mxu2 %v536_v38 }
  0x3b   :  { %v140_v40 = vld [vmem:[#allocation5 + $0x1e0] sm:$0xff]  ;;  %1495 = vmatpush.msra.mxu3 %v728_v39 }
  0x3c   :  { %v332_v41 = vld [vmem:[#allocation5 + $0x7e0] sm:$0xff]  ;;  %1436 = vmatpush.msra.mxu0 %v140_v40  ;;  %v453_v40 = vld [vmem:[#allocation5 + $0xba8] sm:$0xff] }
  0x3d   :  { %v524_v42 = vld [vmem:[#allocation5 + $0xde0] sm:$0xff]  ;;  %1456 = vmatpush.msra.mxu1 %v332_v41 }
  0x3e   :  { %v716_v43 = vld [vmem:[#allocation5 + $0x13e0] sm:$0xff]  ;;  %1476 = vmatpush.msra.mxu2 %v524_v42  ;;  %v153_v42 = vld [vmem:[#allocation5 + $0x248] sm:$0xff] }
  0x3f   :  { %v128_v44 = vld [vmem:[#allocation5 + $0x180] sm:$0xff]  ;;  %1496 = vmatpush.msra.mxu3 %v716_v43 }
  0x40   :  { %v320_v45 = vld [vmem:[#allocation5 + $0x780] sm:$0xff]  ;;  %1437 = vmatpush.msra.mxu0 %v128_v44  ;;  %v441_v44 = vld [vmem:[#allocation5 + $0xb48] sm:$0xff] }
  0x41   :  { %v512_v46 = vld [vmem:[#allocation5 + $0xd80] sm:$0xff]  ;;  %1457 = vmatpush.msra.mxu1 %v320_v45 }
  0x42   :  { %v704_v47 = vld [vmem:[#allocation5 + $0x1380] sm:$0xff]  ;;  %1477 = vmatpush.msra.mxu2 %v512_v46  ;;  %v141_v46 = vld [vmem:[#allocation5 + $0x1e8] sm:$0xff] }
  0x43   :  { %v116_v48 = vld [vmem:[#allocation5 + $0x120] sm:$0xff]  ;;  %1497 = vmatpush.msra.mxu3 %v704_v47 }
  0x44   :  { %v308_v49 = vld [vmem:[#allocation5 + $0x720] sm:$0xff]  ;;  %1438 = vmatpush.msra.mxu0 %v116_v48  ;;  %v429_v48 = vld [vmem:[#allocation5 + $0xae8] sm:$0xff] }
  0x45   :  { %v500_v50 = vld [vmem:[#allocation5 + $0xd20] sm:$0xff]  ;;  %1458 = vmatpush.msra.mxu1 %v308_v49 }
  0x46   :  { %v692_v51 = vld [vmem:[#allocation5 + $0x1320] sm:$0xff]  ;;  %1478 = vmatpush.msra.mxu2 %v500_v50  ;;  %v129_v50 = vld [vmem:[#allocation5 + $0x188] sm:$0xff] }
  0x47   :  { %v104_v52 = vld [vmem:[#allocation5 + $0xc0] sm:$0xff]  ;;  %1498 = vmatpush.msra.mxu3 %v692_v51  ;;  %v3837_v51 = vld.sshfl [vmem:[#allocation1] sm:$0xff pattern:$0x73625140] }
  0x48   :  { %v296_v53 = vld [vmem:[#allocation5 + $0x6c0] sm:$0xff]  ;;  %1439 = vmatpush.msra.mxu0 %v104_v52 }
  0x49   :  { %v488_v54 = vld [vmem:[#allocation5 + $0xcc0] sm:$0xff]  ;;  %1459 = vmatpush.msra.mxu1 %v296_v53  ;;  %v417_v53 = vld [vmem:[#allocation5 + $0xa88] sm:$0xff] }
  0x4a   :  { %v680_v55 = vld [vmem:[#allocation5 + $0x12c0] sm:$0xff]  ;;  %1479 = vmatpush.msra.mxu2 %v488_v54 }
  0x4b   :  { %v92_v56 = vld [vmem:[#allocation5 + $0x60] sm:$0xff]  ;;  %1499 = vmatpush.msra.mxu3 %v680_v55 }
  0x4c   :  { %v284_v57 = vld [vmem:[#allocation5 + $0x660] sm:$0xff]  ;;  %1440 = vmatpush.msra.mxu0 %v92_v56  ;;  %v117_v56 = vld [vmem:[#allocation5 + $0x128] sm:$0xff] }
  0x4d   :  { %v476_v58 = vld [vmem:[#allocation5 + $0xc60] sm:$0xff]  ;;  %1460 = vmatpush.msra.mxu1 %v284_v57  ;;  %v3842_v57 = vld.sshfl [vmem:[#allocation1 + $0x8] sm:$0xff pattern:$0x73625140] }
  0x4e   :  { %v668_v59 = vld [vmem:[#allocation5 + $0x1260] sm:$0xff]  ;;  %1480 = vmatpush.msra.mxu2 %v476_v58  ;;  %v405_v58 = vld [vmem:[#allocation5 + $0xa28] sm:$0xff] }
  0x4f   :  { %v80_v60 = vld [vmem:[#allocation5] sm:$0xff]  ;;  %1500 = vmatpush.msra.mxu3 %v668_v59 }
  0x50   :  { %v272_v61 = vld [vmem:[#allocation5 + $0x600] sm:$0xff]  ;;  %1441 = vmatpush.msra.mxu0 %v80_v60 }
  0x51   :  { %v464_v62 = vld [vmem:[#allocation5 + $0xc00] sm:$0xff]  ;;  %1461 = vmatpush.msra.mxu1 %v272_v61  ;;  %1442 = vmatmul.f32.vlgmr.msra.gmra.mxu0 %v3837_v51  ;;  %v105_v61 = vld [vmem:[#allocation5 + $0xc8] sm:$0xff] }
  0x52   :  { %v656_v63 = vld [vmem:[#allocation5 + $0x1200] sm:$0xff]  ;;  %1481 = vmatpush.msra.mxu2 %v464_v62  ;;  %1462 = vmatmul.f32.vlgmr.msra.gmra.mxu1 %v3842_v57  ;;  %v393_v62 = vld [vmem:[#allocation5 + $0x9c8] sm:$0xff] }
  0x53   :  { %v1028_v0 = vld [vmem:[#allocation5 + $0x1da0] sm:$0xff]  ;;  %1501 = vmatpush.msra.mxu3 %v656_v63 }
  0x54   :  { %v1220_v1 = vld [vmem:[#allocation5 + $0x23a0] sm:$0xff]  ;;  %1506 = vmatpush.msrb.mxu0 %v1028_v0 }
  0x55   :  { %v1328_v2 = vld [vmem:[#allocation5 + $0x2700] sm:$0xf]  ;;  %1526 = vmatpush.msrb.mxu1 %v1220_v1  ;;  %1566 = vmatpush.msrb.mxu3 %v261_v3  ;;  %v93_v1 = vld [vmem:[#allocation5 + $0x68] sm:$0xff] }
  0x56   :  { %v1016_v4 = vld [vmem:[#allocation5 + $0x1d40] sm:$0xff]  ;;  %3602 = vmatpush.msk.msrb.mxu2 %vm1389_vm0, %v1328_v2 }
  0x57   :  { %v1208_v5 = vld [vmem:[#allocation5 + $0x2340] sm:$0xff]  ;;  %1507 = vmatpush.msrb.mxu0 %v1016_v4  ;;  %1567 = vmatpush.msrb.mxu3 %v249_v7  ;;  %v381_v4 = vld [vmem:[#allocation5 + $0x968] sm:$0xff] }
  0x58   :  { %v1316_v6 = vld [vmem:[#allocation5 + $0x26a0] sm:$0xff]  ;;  %1527 = vmatpush.msrb.mxu1 %v1208_v5  ;;  %v3848_v7 = vld.sshfl [vmem:[#allocation1 + $0x20] sm:$0xff pattern:$0x73625140] }
  0x59   :  { %v1004_v9 = vld [vmem:[#allocation5 + $0x1ce0] sm:$0xff]  ;;  %1554 = vmatpush.msrb.mxu2 %v1316_v6  ;;  %1568 = vmatpush.msrb.mxu3 %v237_v12  ;;  %v81_v6 = vld [vmem:[#allocation5 + $0x8] sm:$0xff]  ;;  %v3853_v12 = vld.sshfl [vmem:[#allocation1 + $0x28] sm:$0xff pattern:$0x73625140] }
  0x5a   :  { %v1196_v10 = vld [vmem:[#allocation5 + $0x22e0] sm:$0xff]  ;;  %1508 = vmatpush.msrb.mxu0 %v1004_v9  ;;  %v645_v9 = vld [vmem:[#allocation5 + $0x11a8] sm:$0xff] }
  0x5b   :  { %v1304_v11 = vld [vmem:[#allocation5 + $0x2640] sm:$0xff]  ;;  %1528 = vmatpush.msrb.mxu1 %v1196_v10  ;;  %1569 = vmatpush.msrb.mxu3 %v225_v16  ;;  %v837_v10 = vld [vmem:[#allocation5 + $0x17a8] sm:$0xff] }
  0x5c   :  { %v992_v13 = vld [vmem:[#allocation5 + $0x1c80] sm:$0xff]  ;;  %1555 = vmatpush.msrb.mxu2 %v1304_v11  ;;  %v1029_v11 = vld [vmem:[#allocation5 + $0x1da8] sm:$0xff] }
  0x5d   :  { %v1184_v14 = vld [vmem:[#allocation5 + $0x2280] sm:$0xff]  ;;  %1509 = vmatpush.msrb.mxu0 %v992_v13  ;;  %1570 = vmatpush.msrb.mxu3 %v213_v20  ;;  %v357_v13 = vld [vmem:[#allocation5 + $0x8a8] sm:$0xff] }
  0x5e   :  { %v1292_v15 = vld [vmem:[#allocation5 + $0x25e0] sm:$0xff]  ;;  %1529 = vmatpush.msrb.mxu1 %v1184_v14  ;;  %v633_v14 = vld [vmem:[#allocation5 + $0x1148] sm:$0xff] }
  0x5f   :  { %v980_v17 = vld [vmem:[#allocation5 + $0x1c20] sm:$0xff]  ;;  %1556 = vmatpush.msrb.mxu2 %v1292_v15  ;;  %1571 = vmatpush.msrb.mxu3 %v201_v24  ;;  %v825_v15 = vld [vmem:[#allocation5 + $0x1748] sm:$0xff] }
  0x60   :  { %v1172_v18 = vld [vmem:[#allocation5 + $0x2220] sm:$0xff]  ;;  %1510 = vmatpush.msrb.mxu0 %v980_v17  ;;  %v1017_v16 = vld [vmem:[#allocation5 + $0x1d48] sm:$0xff] }
  0x61   :  { %v1280_v19 = vld [vmem:[#allocation5 + $0x2580] sm:$0xff]  ;;  %1530 = vmatpush.msrb.mxu1 %v1172_v18  ;;  %1572 = vmatpush.msrb.mxu3 %v189_v28  ;;  %v345_v17 = vld [vmem:[#allocation5 + $0x848] sm:$0xff] }
  0x62   :  { %v968_v21 = vld [vmem:[#allocation5 + $0x1bc0] sm:$0xff]  ;;  %1557 = vmatpush.msrb.mxu2 %v1280_v19  ;;  %v621_v18 = vld [vmem:[#allocation5 + $0x10e8] sm:$0xff] }
  0x63   :  { %v1160_v22 = vld [vmem:[#allocation5 + $0x21c0] sm:$0xff]  ;;  %1511 = vmatpush.msrb.mxu0 %v968_v21  ;;  %1573 = vmatpush.msrb.mxu3 %v177_v33  ;;  %v813_v19 = vld [vmem:[#allocation5 + $0x16e8] sm:$0xff] }
  0x64   :  { %v1268_v23 = vld [vmem:[#allocation5 + $0x2520] sm:$0xff]  ;;  %1531 = vmatpush.msrb.mxu1 %v1160_v22  ;;  %v1005_v20 = vld [vmem:[#allocation5 + $0x1ce8] sm:$0xff] }
  0x65   :  { %v956_v25 = vld [vmem:[#allocation5 + $0x1b60] sm:$0xff]  ;;  %1558 = vmatpush.msrb.mxu2 %v1268_v23  ;;  %1574 = vmatpush.msrb.mxu3 %v165_v37  ;;  %v333_v21 = vld [vmem:[#allocation5 + $0x7e8] sm:$0xff] }
  0x66   :  { %v1148_v26 = vld [vmem:[#allocation5 + $0x2160] sm:$0xff]  ;;  %1512 = vmatpush.msrb.mxu0 %v956_v25  ;;  %v609_v22 = vld [vmem:[#allocation5 + $0x1088] sm:$0xff] }
  0x67   :  { %v1256_v27 = vld [vmem:[#allocation5 + $0x24c0] sm:$0xff]  ;;  %1532 = vmatpush.msrb.mxu1 %v1148_v26  ;;  %1575 = vmatpush.msrb.mxu3 %v153_v42  ;;  %v801_v23 = vld [vmem:[#allocation5 + $0x1688] sm:$0xff] }
  0x68   :  { %v944_v30 = vld [vmem:[#allocation5 + $0x1b00] sm:$0xff]  ;;  %1559 = vmatpush.msrb.mxu2 %v1256_v27  ;;  %v993_v24 = vld [vmem:[#allocation5 + $0x1c88] sm:$0xff] }
  0x69   :  { %v1136_v31 = vld [vmem:[#allocation5 + $0x2100] sm:$0xff]  ;;  %1513 = vmatpush.msrb.mxu0 %v944_v30  ;;  %1576 = vmatpush.msrb.mxu3 %v141_v46  ;;  %v321_v25 = vld [vmem:[#allocation5 + $0x788] sm:$0xff] }
  0x6a   :  { %v1244_v32 = vld [vmem:[#allocation5 + $0x2460] sm:$0xff]  ;;  %1533 = vmatpush.msrb.mxu1 %v1136_v31  ;;  %v597_v26 = vld [vmem:[#allocation5 + $0x1028] sm:$0xff] }
  0x6b   :  { %v932_v34 = vld [vmem:[#allocation5 + $0x1aa0] sm:$0xff]  ;;  %1560 = vmatpush.msrb.mxu2 %v1244_v32  ;;  %1577 = vmatpush.msrb.mxu3 %v129_v50  ;;  %v789_v27 = vld [vmem:[#allocation5 + $0x1628] sm:$0xff] }
  0x6c   :  { %v1124_v35 = vld [vmem:[#allocation5 + $0x20a0] sm:$0xff]  ;;  %1514 = vmatpush.msrb.mxu0 %v932_v34  ;;  %v981_v28 = vld [vmem:[#allocation5 + $0x1c28] sm:$0xff] }
  0x6d   :  { %v1232_v36 = vld [vmem:[#allocation5 + $0x2400] sm:$0xff]  ;;  %1534 = vmatpush.msrb.mxu1 %v1124_v35  ;;  %1578 = vmatpush.msrb.mxu3 %v117_v56  ;;  %v585_v30 = vld [vmem:[#allocation5 + $0xfc8] sm:$0xff] }
  0x6e   :  { %v3834_v38 = vld.sshfl [vmem:[#allocation1 + $0x10] sm:$0xff pattern:$0x73625140]  ;;  %1561 = vmatpush.msrb.mxu2 %v1232_v36  ;;  %v3839_v52 = vld.sshfl [vmem:[#allocation1 + $0x18] sm:$0xff pattern:$0x73625140] }
  0x6f   :  { %v920_v39 = vld [vmem:[#allocation5 + $0x1a40] sm:$0xff]  ;;  %1482 = vmatmul.f32.vlgmr.msra.gmra.mxu2 %v3834_v38  ;;  %1502 = vmatmul.f32.vlgmr.msra.gmra.mxu3 %v3839_v52  ;;  %v777_v31 = vld [vmem:[#allocation5 + $0x15c8] sm:$0xff] }
  0x70   :  { %v1112_v41 = vld [vmem:[#allocation5 + $0x2040] sm:$0xff]  ;;  %1515 = vmatpush.msrb.mxu0 %v920_v39  ;;  %1586 = vmatpush.msra.mxu2 %v453_v40  ;;  %v969_v32 = vld [vmem:[#allocation5 + $0x1bc8] sm:$0xff] }
  0x71   :  { %v908_v43 = vld [vmem:[#allocation5 + $0x19e0] sm:$0xff]  ;;  %1535 = vmatpush.msrb.mxu1 %v1112_v41  ;;  %1579 = vmatpush.msrb.mxu3 %v105_v61  ;;  %v297_v33 = vld [vmem:[#allocation5 + $0x6c8] sm:$0xff] }
  0x72   :  { %v1100_v45 = vld [vmem:[#allocation5 + $0x1fe0] sm:$0xff]  ;;  %1516 = vmatpush.msrb.mxu0 %v908_v43  ;;  %1587 = vmatpush.msra.mxu2 %v441_v44  ;;  %v573_v34 = vld [vmem:[#allocation5 + $0xf68] sm:$0xff] }
  0x73   :  { %v896_v47 = vld [vmem:[#allocation5 + $0x1980] sm:$0xff]  ;;  %1536 = vmatpush.msrb.mxu1 %v1100_v45  ;;  %1580 = vmatpush.msrb.mxu3 %v93_v1  ;;  %v765_v35 = vld [vmem:[#allocation5 + $0x1568] sm:$0xff] }
  0x74   :  { %v1088_v49 = vld [vmem:[#allocation5 + $0x1f80] sm:$0xff]  ;;  %1517 = vmatpush.msrb.mxu0 %v896_v47  ;;  %1588 = vmatpush.msra.mxu2 %v429_v48  ;;  %v957_v36 = vld [vmem:[#allocation5 + $0x1b68] sm:$0xff] }
  0x75   :  { %1537 = vmatpush.msrb.mxu1 %v1088_v49  ;;  %v884_v54 = vld [vmem:[#allocation5 + $0x1920] sm:$0xff]  ;;  %1581 = vmatpush.msrb.mxu3 %v81_v6  ;;  %v285_v37 = vld [vmem:[#allocation5 + $0x668] sm:$0xff] }
  0x76   :  { %v1076_v55 = vld [vmem:[#allocation5 + $0x1f20] sm:$0xff]  ;;  %1589 = vmatpush.msra.mxu2 %v417_v53  ;;  %1518 = vmatpush.msrb.mxu0 %v884_v54  ;;  %v561_v39 = vld [vmem:[#allocation5 + $0xf08] sm:$0xff] }
  0x77   :  { %v872_v59 = vld [vmem:[#allocation5 + $0x18c0] sm:$0xff]  ;;  %1538 = vmatpush.msrb.mxu1 %v1076_v55  ;;  %1646 = vmatpush.msra.mxu3 %v1029_v11  ;;  %v753_v40 = vld [vmem:[#allocation5 + $0x1508] sm:$0xff] }
  0x78   :  { %v1064_v60 = vld [vmem:[#allocation5 + $0x1ec0] sm:$0xff]  ;;  %1590 = vmatpush.msra.mxu2 %v405_v58  ;;  %1519 = vmatpush.msrb.mxu0 %v872_v59  ;;  %v945_v41 = vld [vmem:[#allocation5 + $0x1b08] sm:$0xff] }
  0x79   :  { %v860_v63 = vld [vmem:[#allocation5 + $0x1860] sm:$0xff]  ;;  %1539 = vmatpush.msrb.mxu1 %v1064_v60  ;;  %1647 = vmatpush.msra.mxu3 %v1017_v16  ;;  %v273_v42 = vld [vmem:[#allocation5 + $0x608] sm:$0xff] }
  0x7a   :  { %v1052_v0 = vld [vmem:[#allocation5 + $0x1e60] sm:$0xff]  ;;  %1591 = vmatpush.msra.mxu2 %v393_v62  ;;  %1520 = vmatpush.msrb.mxu0 %v860_v63  ;;  %v549_v43 = vld [vmem:[#allocation5 + $0xea8] sm:$0xff] }
  0x7b   :  { %v3846_v2 = vld.sshfl [vmem:[#allocation1 + $0x30] sm:$0xff pattern:$0x73625140]  ;;  %1540 = vmatpush.msrb.mxu1 %v1052_v0  ;;  %1648 = vmatpush.msra.mxu3 %v1005_v20  ;;  %v741_v44 = vld [vmem:[#allocation5 + $0x14a8] sm:$0xff]  ;;  %v250_v20 = vld [vmem:[#allocation5 + $0x550] sm:$0xff] }
  0x7c   :  { %v848_v3 = vld [vmem:[#allocation5 + $0x1800] sm:$0xff]  ;;  %3603 = vmatmul.msk.f32.vlgmr.msrb.gmra.mxu2 %vm1386_vm1, %v3846_v2  ;;  %v933_v45 = vld [vmem:[#allocation5 + $0x1aa8] sm:$0xff]  ;;  %1582 = vmatmul.f32.vlgmr.msrb.gmra.mxu3 %v3837_v51 }
  0x7d   :  { %v1040_v5 = vld [vmem:[#allocation5 + $0x1e00] sm:$0xff]  ;;  %1521 = vmatpush.msrb.mxu0 %v848_v3  ;;  %1592 = vmatpush.msra.mxu2 %v381_v4  ;;  %v1221_v46 = vld [vmem:[#allocation5 + $0x23a8] sm:$0xff] }
  0x7e   :  { %1541 = vmatpush.msrb.mxu1 %v1040_v5  ;;  %1522 = vmatmul.f32.vlgmr.msrb.gmra.mxu0 %v3848_v7  ;;  %v537_v47 = vld [vmem:[#allocation5 + $0xe48] sm:$0xff] }
  0x7f   :  { %1593 = vmatpush.msra.mxu2 %v369_v8  ;;  %1606 = vmatpush.msra.mxu0 %v645_v9  ;;  %v729_v48 = vld [vmem:[#allocation5 + $0x1448] sm:$0xff] }
  0x80   :  { %1626 = vmatpush.msra.mxu1 %v837_v10  ;;  %1649 = vmatpush.msra.mxu3 %v993_v24  ;;  %v921_v49 = vld [vmem:[#allocation5 + $0x1a48] sm:$0xff]  ;;  %v238_v24 = vld [vmem:[#allocation5 + $0x4f0] sm:$0xff] }
  0x81   :  { %1542 = vmatmul.f32.vlgmr.msrb.gmra.mxu1 %v3853_v12  ;;  %1594 = vmatpush.msra.mxu2 %v357_v13  ;;  %v1209_v50 = vld [vmem:[#allocation5 + $0x2348] sm:$0xff] }
  0x82   :  { %1607 = vmatpush.msra.mxu0 %v633_v14  ;;  %1627 = vmatpush.msra.mxu1 %v825_v15  ;;  %v525_v53 = vld [vmem:[#allocation5 + $0xde8] sm:$0xff] }
  0x83   :  { %1595 = vmatpush.msra.mxu2 %v345_v17  ;;  %1650 = vmatpush.msra.mxu3 %v981_v28  ;;  %v717_v54 = vld [vmem:[#allocation5 + $0x13e8] sm:$0xff]  ;;  %v262_v17 = vld [vmem:[#allocation5 + $0x5b0] sm:$0xff] }
  0x84   :  { %1608 = vmatpush.msra.mxu0 %v621_v18  ;;  %1628 = vmatpush.msra.mxu1 %v813_v19  ;;  %v909_v55 = vld [vmem:[#allocation5 + $0x19e8] sm:$0xff]  ;;  %v646_v19 = vld [vmem:[#allocation5 + $0x11b0] sm:$0xff] }
  0x85   :  { %1596 = vmatpush.msra.mxu2 %v333_v21  ;;  %1651 = vmatpush.msra.mxu3 %v969_v32  ;;  %v1197_v56 = vld [vmem:[#allocation5 + $0x22e8] sm:$0xff]  ;;  %v226_v28 = vld [vmem:[#allocation5 + $0x490] sm:$0xff] }
  0x86   :  { %1609 = vmatpush.msra.mxu0 %v609_v22  ;;  %1629 = vmatpush.msra.mxu1 %v801_v23  ;;  %v513_v58 = vld [vmem:[#allocation5 + $0xd88] sm:$0xff]  ;;  %v634_v23 = vld [vmem:[#allocation5 + $0x1150] sm:$0xff] }
  0x87   :  { %1597 = vmatpush.msra.mxu2 %v321_v25  ;;  %1652 = vmatpush.msra.mxu3 %v957_v36  ;;  %v705_v59 = vld [vmem:[#allocation5 + $0x1388] sm:$0xff] }
  0x88   :  { %1610 = vmatpush.msra.mxu0 %v597_v26  ;;  %1630 = vmatpush.msra.mxu1 %v789_v27  ;;  %v897_v60 = vld [vmem:[#allocation5 + $0x1988] sm:$0xff]  ;;  %v622_v27 = vld [vmem:[#allocation5 + $0x10f0] sm:$0xff] }
  0x89   :  { %1598 = vmatpush.msra.mxu2 %v309_v29  ;;  %1653 = vmatpush.msra.mxu3 %v945_v41  ;;  %v1185_v61 = vld [vmem:[#allocation5 + $0x2288] sm:$0xff] }
  0x8a   :  { %1611 = vmatpush.msra.mxu0 %v585_v30  ;;  %1631 = vmatpush.msra.mxu1 %v777_v31  ;;  %v501_v62 = vld [vmem:[#allocation5 + $0xd28] sm:$0xff]  ;;  %v610_v31 = vld [vmem:[#allocation5 + $0x1090] sm:$0xff] }
  0x8b   :  { %1599 = vmatpush.msra.mxu2 %v297_v33  ;;  %1654 = vmatpush.msra.mxu3 %v933_v45  ;;  %v693_v63 = vld [vmem:[#allocation5 + $0x1328] sm:$0xff] }
  0x8c   :  { %1612 = vmatpush.msra.mxu0 %v573_v34  ;;  %1632 = vmatpush.msra.mxu1 %v765_v35  ;;  %v885_v0 = vld [vmem:[#allocation5 + $0x1928] sm:$0xff]  ;;  %v214_v34 = vld [vmem:[#allocation5 + $0x430] sm:$0xff] }
  0x8d   :  { %1600 = vmatpush.msra.mxu2 %v285_v37  ;;  %1655 = vmatpush.msra.mxu3 %v921_v49  ;;  %v1173_v1 = vld [vmem:[#allocation5 + $0x2228] sm:$0xff]  ;;  %v598_v35 = vld [vmem:[#allocation5 + $0x1030] sm:$0xff] }
  0x8e   :  { %1613 = vmatpush.msra.mxu0 %v561_v39  ;;  %1633 = vmatpush.msra.mxu1 %v753_v40  ;;  %v489_v3 = vld [vmem:[#allocation5 + $0xcc8] sm:$0xff]  ;;  %v202_v39 = vld [vmem:[#allocation5 + $0x3d0] sm:$0xff] }
  0x8f   :  { %1601 = vmatpush.msra.mxu2 %v273_v42  ;;  %1656 = vmatpush.msra.mxu3 %v909_v55  ;;  %v681_v4 = vld [vmem:[#allocation5 + $0x12c8] sm:$0xff]  ;;  %v586_v40 = vld [vmem:[#allocation5 + $0xfd0] sm:$0xff] }
  0x90   :  { %1614 = vmatpush.msra.mxu0 %v549_v43  ;;  %1634 = vmatpush.msra.mxu1 %v741_v44  ;;  %v873_v5 = vld [vmem:[#allocation5 + $0x18c8] sm:$0xff]  ;;  %v190_v43 = vld [vmem:[#allocation5 + $0x370] sm:$0xff] }
  0x91   :  { %1666 = vmatpush.msrb.mxu2 %v1221_v46  ;;  %1657 = vmatpush.msra.mxu3 %v897_v60  ;;  %v1161_v6 = vld [vmem:[#allocation5 + $0x21c8] sm:$0xff]  ;;  %v574_v44 = vld [vmem:[#allocation5 + $0xf70] sm:$0xff] }
  0x92   :  { %1615 = vmatpush.msra.mxu0 %v537_v47  ;;  %1635 = vmatpush.msra.mxu1 %v729_v48  ;;  %v477_v8 = vld [vmem:[#allocation5 + $0xc68] sm:$0xff]  ;;  %v178_v47 = vld [vmem:[#allocation5 + $0x310] sm:$0xff] }
  0x93   :  { %1667 = vmatpush.msrb.mxu2 %v1209_v50  ;;  %1658 = vmatpush.msra.mxu3 %v885_v0  ;;  %v669_v9 = vld [vmem:[#allocation5 + $0x1268] sm:$0xff]  ;;  %v562_v48 = vld [vmem:[#allocation5 + $0xf10] sm:$0xff] }
  0x94   :  { %1616 = vmatpush.msra.mxu0 %v525_v53  ;;  %1636 = vmatpush.msra.mxu1 %v717_v54  ;;  %v861_v10 = vld [vmem:[#allocation5 + $0x1868] sm:$0xff]  ;;  %v166_v53 = vld [vmem:[#allocation5 + $0x2b0] sm:$0xff] }
  0x95   :  { %1668 = vmatpush.msrb.mxu2 %v1197_v56  ;;  %v1149_v11 = vld [vmem:[#allocation5 + $0x2168] sm:$0xff]  ;;  %1659 = vmatpush.msra.mxu3 %v873_v5  ;;  %v550_v54 = vld [vmem:[#allocation5 + $0xeb0] sm:$0xff] }
  0x96   :  { %1617 = vmatpush.msra.mxu0 %v513_v58  ;;  %1637 = vmatpush.msra.mxu1 %v705_v59  ;;  %v465_v13 = vld [vmem:[#allocation5 + $0xc08] sm:$0xff]  ;;  %v454_v55 = vld [vmem:[#allocation5 + $0xbb0] sm:$0xff] }
  0x97   :  { %1669 = vmatpush.msrb.mxu2 %v1185_v61  ;;  %v657_v14 = vld [vmem:[#allocation5 + $0x1208] sm:$0xff]  ;;  %1660 = vmatpush.msra.mxu3 %v861_v10  ;;  %v838_v56 = vld [vmem:[#allocation5 + $0x17b0] sm:$0xff] }
  0x98   :  { %1618 = vmatpush.msra.mxu0 %v501_v62  ;;  %1638 = vmatpush.msra.mxu1 %v693_v63  ;;  %v849_v15 = vld [vmem:[#allocation5 + $0x1808] sm:$0xff]  ;;  %v154_v58 = vld [vmem:[#allocation5 + $0x250] sm:$0xff] }
  0x99   :  { %1670 = vmatpush.msrb.mxu2 %v1173_v1  ;;  %v1137_v16 = vld [vmem:[#allocation5 + $0x2108] sm:$0xff]  ;;  %1661 = vmatpush.msra.mxu3 %v849_v15  ;;  %v538_v59 = vld [vmem:[#allocation5 + $0xe50] sm:$0xff] }
  0x9a   :  { %1619 = vmatpush.msra.mxu0 %v489_v3  ;;  %1639 = vmatpush.msra.mxu1 %v681_v4  ;;  %v1329_v18 = vld [vmem:[#allocation5 + $0x2708] sm:$0xf]  ;;  %v442_v60 = vld [vmem:[#allocation5 + $0xb50] sm:$0xff] }
  0x9b   :  { %1671 = vmatpush.msrb.mxu2 %v1161_v6  ;;  %v1125_v21 = vld [vmem:[#allocation5 + $0x20a8] sm:$0xff]  ;;  %3604 = vmatpush.msk.msrb.mxu3 %vm1389_vm0, %v1329_v18  ;;  %v826_v61 = vld [vmem:[#allocation5 + $0x1750] sm:$0xff] }
  0x9c   :  { %1620 = vmatpush.msra.mxu0 %v477_v8  ;;  %1640 = vmatpush.msra.mxu1 %v669_v9  ;;  %v1317_v22 = vld [vmem:[#allocation5 + $0x26a8] sm:$0xff]  ;;  %v142_v62 = vld [vmem:[#allocation5 + $0x1f0] sm:$0xff] }
  0x9d   :  { %1672 = vmatpush.msrb.mxu2 %v1149_v11  ;;  %v1113_v25 = vld [vmem:[#allocation5 + $0x2048] sm:$0xff]  ;;  %1694 = vmatpush.msrb.mxu3 %v1317_v22  ;;  %v526_v63 = vld [vmem:[#allocation5 + $0xdf0] sm:$0xff] }
  0x9e   :  { %1621 = vmatpush.msra.mxu0 %v465_v13  ;;  %1641 = vmatpush.msra.mxu1 %v657_v14  ;;  %v1305_v26 = vld [vmem:[#allocation5 + $0x2648] sm:$0xff]  ;;  %v430_v0 = vld [vmem:[#allocation5 + $0xaf0] sm:$0xff] }
  0x9f   :  { %1673 = vmatpush.msrb.mxu2 %v1137_v16  ;;  %v1101_v29 = vld [vmem:[#allocation5 + $0x1fe8] sm:$0xff]  ;;  %1695 = vmatpush.msrb.mxu3 %v1305_v26  ;;  %v814_v1 = vld [vmem:[#allocation5 + $0x16f0] sm:$0xff] }
  0xa0   :  { %1706 = vmatpush.msrb.mxu1 %v262_v17  ;;  %1746 = vmatpush.msrb.mxu0 %v646_v19  ;;  %v1293_v30 = vld [vmem:[#allocation5 + $0x25e8] sm:$0xff]  ;;  %v130_v3 = vld [vmem:[#allocation5 + $0x190] sm:$0xff] }
  0xa1   :  { %1602 = vmatmul.f32.vlgmr.msra.gmra.mxu2 %v3842_v57  ;;  %v1089_v32 = vld [vmem:[#allocation5 + $0x1f88] sm:$0xff]  ;;  %1696 = vmatpush.msrb.mxu3 %v1293_v30  ;;  %v514_v4 = vld [vmem:[#allocation5 + $0xd90] sm:$0xff] }
  0xa2   :  { %1707 = vmatpush.msrb.mxu1 %v250_v20  ;;  %1674 = vmatpush.msrb.mxu2 %v1125_v21  ;;  %v1281_v33 = vld [vmem:[#allocation5 + $0x2588] sm:$0xff]  ;;  %v418_v5 = vld [vmem:[#allocation5 + $0xa90] sm:$0xff] }
  0xa3   :  { %1747 = vmatpush.msrb.mxu0 %v634_v23  ;;  %1662 = vmatmul.f32.vlgmr.msra.gmra.mxu3 %v3848_v7  ;;  %v1077_v36 = vld [vmem:[#allocation5 + $0x1f28] sm:$0xff]  ;;  %v802_v6 = vld [vmem:[#allocation5 + $0x1690] sm:$0xff] }
  0xa4   :  { %1708 = vmatpush.msrb.mxu1 %v238_v24  ;;  %1675 = vmatpush.msrb.mxu2 %v1113_v25  ;;  %v1269_v37 = vld [vmem:[#allocation5 + $0x2528] sm:$0xff]  ;;  %v118_v8 = vld [vmem:[#allocation5 + $0x130] sm:$0xff] }
  0xa5   :  { %1748 = vmatpush.msrb.mxu0 %v622_v27  ;;  %1697 = vmatpush.msrb.mxu3 %v1281_v33  ;;  %v1065_v41 = vld [vmem:[#allocation5 + $0x1ec8] sm:$0xff]  ;;  %v502_v9 = vld [vmem:[#allocation5 + $0xd30] sm:$0xff] }
  0xa6   :  { %1709 = vmatpush.msrb.mxu1 %v226_v28  ;;  %1676 = vmatpush.msrb.mxu2 %v1101_v29  ;;  %v1257_v42 = vld [vmem:[#allocation5 + $0x24c8] sm:$0xff]  ;;  %v406_v10 = vld [vmem:[#allocation5 + $0xa30] sm:$0xff] }
  0xa7   :  { %1749 = vmatpush.msrb.mxu0 %v610_v31  ;;  %1698 = vmatpush.msrb.mxu3 %v1269_v37  ;;  %v1053_v45 = vld [vmem:[#allocation5 + $0x1e68] sm:$0xff]  ;;  %v790_v11 = vld [vmem:[#allocation5 + $0x1630] sm:$0xff] }
  0xa8   :  { %1677 = vmatpush.msrb.mxu2 %v1089_v32  ;;  %1710 = vmatpush.msrb.mxu1 %v214_v34  ;;  %v1245_v46 = vld [vmem:[#allocation5 + $0x2468] sm:$0xff]  ;;  %v106_v13 = vld [vmem:[#allocation5 + $0xd0] sm:$0xff] }
  0xa9   :  { %1750 = vmatpush.msrb.mxu0 %v598_v35  ;;  %1642 = vmatmul.f32.vlgmr.msra.gmra.mxu1 %v3839_v52  ;;  %v1041_v49 = vld [vmem:[#allocation5 + $0x1e08] sm:$0xff]  ;;  %v490_v14 = vld [vmem:[#allocation5 + $0xcd0] sm:$0xff] }
  0xaa   :  { %1622 = vmatmul.f32.vlgmr.msra.gmra.mxu0 %v3834_v38  ;;  %1678 = vmatpush.msrb.mxu2 %v1077_v36  ;;  %v1233_v50 = vld [vmem:[#allocation5 + $0x2408] sm:$0xff]  ;;  %v394_v15 = vld [vmem:[#allocation5 + $0x9d0] sm:$0xff] }
  0xab   :  { %1711 = vmatpush.msrb.mxu1 %v202_v39  ;;  %1751 = vmatpush.msrb.mxu0 %v586_v40  ;;  %v778_v16 = vld [vmem:[#allocation5 + $0x15d0] sm:$0xff] }
  0xac   :  { %1679 = vmatpush.msrb.mxu2 %v1065_v41  ;;  %1699 = vmatpush.msrb.mxu3 %v1257_v42  ;;  %v94_v17 = vld [vmem:[#allocation5 + $0x70] sm:$0xff] }
  0xad   :  { %1712 = vmatpush.msrb.mxu1 %v190_v43  ;;  %1752 = vmatpush.msrb.mxu0 %v574_v44  ;;  %v478_v18 = vld [vmem:[#allocation5 + $0xc70] sm:$0xff] }
  0xae   :  { %1680 = vmatpush.msrb.mxu2 %v1053_v45  ;;  %1700 = vmatpush.msrb.mxu3 %v1245_v46  ;;  %v382_v19 = vld [vmem:[#allocation5 + $0x970] sm:$0xff] }
  0xaf   :  { %1713 = vmatpush.msrb.mxu1 %v178_v47  ;;  %1753 = vmatpush.msrb.mxu0 %v562_v48  ;;  %v766_v20 = vld [vmem:[#allocation5 + $0x1570] sm:$0xff] }
  0xb0   :  { %1681 = vmatpush.msrb.mxu2 %v1041_v49  ;;  %1701 = vmatpush.msrb.mxu3 %v1233_v50  ;;  %v82_v21 = vld [vmem:[#allocation5 + $0x10] sm:$0xff] }
  0xb1   :  { %1714 = vmatpush.msrb.mxu1 %v166_v53  ;;  %1754 = vmatpush.msrb.mxu0 %v550_v54  ;;  %v466_v22 = vld [vmem:[#allocation5 + $0xc10] sm:$0xff] }
  0xb2   :  { %1682 = vmatmul.f32.vlgmr.msrb.gmra.mxu2 %v3853_v12  ;;  %1726 = vmatpush.msra.mxu3 %v454_v55  ;;  %v370_v23 = vld [vmem:[#allocation5 + $0x910] sm:$0xff] }
  0xb3   :  { %1766 = vmatpush.msra.mxu2 %v838_v56  ;;  %1715 = vmatpush.msrb.mxu1 %v154_v58  ;;  %v754_v24 = vld [vmem:[#allocation5 + $0x1510] sm:$0xff] }
  0xb4   :  { %1755 = vmatpush.msrb.mxu0 %v538_v59  ;;  %3605 = vmatmul.msk.f32.vlgmr.msrb.gmra.mxu3 %vm1386_vm1, %v3846_v2  ;;  %v1030_v25 = vld [vmem:[#allocation5 + $0x1db0] sm:$0xff] }
  0xb5   :  { %1727 = vmatpush.msra.mxu3 %v442_v60  ;;  %1767 = vmatpush.msra.mxu2 %v826_v61  ;;  %v1330_v26 = vld [vmem:[#allocation5 + $0x2710] sm:$0xf] }
  0xb6   :  { %1716 = vmatpush.msrb.mxu1 %v142_v62  ;;  %1756 = vmatpush.msrb.mxu0 %v526_v63  ;;  %v358_v27 = vld [vmem:[#allocation5 + $0x8b0] sm:$0xff] }
  0xb7   :  { %1728 = vmatpush.msra.mxu3 %v430_v0  ;;  %1768 = vmatpush.msra.mxu2 %v814_v1  ;;  %v742_v28 = vld [vmem:[#allocation5 + $0x14b0] sm:$0xff]  ;;  %v263_v0 = vld [vmem:[#allocation5 + $0x5b8] sm:$0xff] }
  0xb8   :  { %1717 = vmatpush.msrb.mxu1 %v130_v3  ;;  %1757 = vmatpush.msrb.mxu0 %v514_v4  ;;  %v1018_v29 = vld [vmem:[#allocation5 + $0x1d50] sm:$0xff]  ;;  %v839_v1 = vld [vmem:[#allocation5 + $0x17b8] sm:$0xff] }
  0xb9   :  { %1729 = vmatpush.msra.mxu3 %v418_v5  ;;  %1769 = vmatpush.msra.mxu2 %v802_v6  ;;  %v1318_v30 = vld [vmem:[#allocation5 + $0x26b0] sm:$0xff]  ;;  %v251_v5 = vld [vmem:[#allocation5 + $0x558] sm:$0xff] }
  0xba   :  { %1718 = vmatpush.msrb.mxu1 %v118_v8  ;;  %1758 = vmatpush.msrb.mxu0 %v502_v9  ;;  %v346_v31 = vld [vmem:[#allocation5 + $0x850] sm:$0xff]  ;;  %v827_v6 = vld [vmem:[#allocation5 + $0x1758] sm:$0xff] }
  0xbb   :  { %1730 = vmatpush.msra.mxu3 %v406_v10  ;;  %1770 = vmatpush.msra.mxu2 %v790_v11  ;;  %v730_v32 = vld [vmem:[#allocation5 + $0x1450] sm:$0xff]  ;;  %v239_v10 = vld [vmem:[#allocation5 + $0x4f8] sm:$0xff] }
  0xbc   :  { %1719 = vmatpush.msrb.mxu1 %v106_v13  ;;  %1759 = vmatpush.msrb.mxu0 %v490_v14  ;;  %v1006_v33 = vld [vmem:[#allocation5 + $0x1cf0] sm:$0xff]  ;;  %v815_v11 = vld [vmem:[#allocation5 + $0x16f8] sm:$0xff] }
  0xbd   :  { %1731 = vmatpush.msra.mxu3 %v394_v15  ;;  %1771 = vmatpush.msra.mxu2 %v778_v16  ;;  %v1306_v34 = vld [vmem:[#allocation5 + $0x2650] sm:$0xff]  ;;  %v227_v15 = vld [vmem:[#allocation5 + $0x498] sm:$0xff] }
  0xbe   :  { %1720 = vmatpush.msrb.mxu1 %v94_v17  ;;  %1760 = vmatpush.msrb.mxu0 %v478_v18  ;;  %v334_v35 = vld [vmem:[#allocation5 + $0x7f0] sm:$0xff]  ;;  %v803_v16 = vld [vmem:[#allocation5 + $0x1698] sm:$0xff] }
  0xbf   :  { %1732 = vmatpush.msra.mxu3 %v382_v19  ;;  %1772 = vmatpush.msra.mxu2 %v766_v20  ;;  %v718_v36 = vld [vmem:[#allocation5 + $0x13f0] sm:$0xff]  ;;  %v215_v18 = vld [vmem:[#allocation5 + $0x438] sm:$0xff] }
  0xc0   :  { %1721 = vmatpush.msrb.mxu1 %v82_v21  ;;  %1761 = vmatpush.msrb.mxu0 %v466_v22  ;;  %v994_v37 = vld [vmem:[#allocation5 + $0x1c90] sm:$0xff]  ;;  %v791_v19 = vld [vmem:[#allocation5 + $0x1638] sm:$0xff] }
  0xc1   :  { %1733 = vmatpush.msra.mxu3 %v370_v23  ;;  %1773 = vmatpush.msra.mxu2 %v754_v24  ;;  %v1294_v39 = vld [vmem:[#allocation5 + $0x25f0] sm:$0xff]  ;;  %v203_v22 = vld [vmem:[#allocation5 + $0x3d8] sm:$0xff] }
  0xc2   :  { %1786 = vmatpush.msra.mxu1 %v1030_v25  ;;  %3606 = vmatpush.msk.msra.mxu0 %vm1389_vm0, %v1330_v26  ;;  %v322_v40 = vld [vmem:[#allocation5 + $0x790] sm:$0xff]  ;;  %v779_v23 = vld [vmem:[#allocation5 + $0x15d8] sm:$0xff] }
  0xc3   :  { %1734 = vmatpush.msra.mxu3 %v358_v27  ;;  %1774 = vmatpush.msra.mxu2 %v742_v28  ;;  %v706_v41 = vld [vmem:[#allocation5 + $0x1390] sm:$0xff]  ;;  %v191_v26 = vld [vmem:[#allocation5 + $0x378] sm:$0xff] }
  0xc4   :  { %1787 = vmatpush.msra.mxu1 %v1018_v29  ;;  %1834 = vmatpush.msra.mxu0 %v1318_v30  ;;  %v982_v42 = vld [vmem:[#allocation5 + $0x1c30] sm:$0xff]  ;;  %v767_v27 = vld [vmem:[#allocation5 + $0x1578] sm:$0xff] }
  0xc5   :  { %1735 = vmatpush.msra.mxu3 %v346_v31  ;;  %1775 = vmatpush.msra.mxu2 %v730_v32  ;;  %v1282_v43 = vld [vmem:[#allocation5 + $0x2590] sm:$0xff]  ;;  %v179_v29 = vld [vmem:[#allocation5 + $0x318] sm:$0xff] }
  0xc6   :  { %1788 = vmatpush.msra.mxu1 %v1006_v33  ;;  %1835 = vmatpush.msra.mxu0 %v1306_v34  ;;  %v310_v44 = vld [vmem:[#allocation5 + $0x730] sm:$0xff]  ;;  %v455_v30 = vld [vmem:[#allocation5 + $0xbb8] sm:$0xff] }
  0xc7   :  { %1736 = vmatpush.msra.mxu3 %v334_v35  ;;  %1776 = vmatpush.msra.mxu2 %v718_v36  ;;  %v694_v45 = vld [vmem:[#allocation5 + $0x1330] sm:$0xff]  ;;  %v755_v31 = vld [vmem:[#allocation5 + $0x1518] sm:$0xff] }
  0xc8   :  { %1789 = vmatpush.msra.mxu1 %v994_v37  ;;  %1836 = vmatpush.msra.mxu0 %v1294_v39  ;;  %v970_v46 = vld [vmem:[#allocation5 + $0x1bd0] sm:$0xff]  ;;  %v167_v33 = vld [vmem:[#allocation5 + $0x2b8] sm:$0xff] }
  0xc9   :  { %1737 = vmatpush.msra.mxu3 %v322_v40  ;;  %1777 = vmatpush.msra.mxu2 %v706_v41  ;;  %v1270_v47 = vld [vmem:[#allocation5 + $0x2530] sm:$0xff]  ;;  %v443_v34 = vld [vmem:[#allocation5 + $0xb58] sm:$0xff] }
  0xca   :  { %1790 = vmatpush.msra.mxu1 %v982_v42  ;;  %1837 = vmatpush.msra.mxu0 %v1282_v43  ;;  %v298_v48 = vld [vmem:[#allocation5 + $0x6d0] sm:$0xff]  ;;  %v743_v35 = vld [vmem:[#allocation5 + $0x14b8] sm:$0xff] }
  0xcb   :  { %v682_v49 = vld [vmem:[#allocation5 + $0x12d0] sm:$0xff]  ;;  %1738 = vmatpush.msra.mxu3 %v310_v44  ;;  %1778 = vmatpush.msra.mxu2 %v694_v45  ;;  %v731_v37 = vld [vmem:[#allocation5 + $0x1458] sm:$0xff] }
  0xcc   :  { %v958_v50 = vld [vmem:[#allocation5 + $0x1b70] sm:$0xff]  ;;  %1791 = vmatpush.msra.mxu1 %v970_v46  ;;  %1838 = vmatpush.msra.mxu0 %v1270_v47  ;;  %v143_v40 = vld [vmem:[#allocation5 + $0x1f8] sm:$0xff]  ;;  %v3871_v46 = vld [vmem:[#allocation7] sm:$0xff] }
  0xcd   :  { %v1258_v53 = vld [vmem:[#allocation5 + $0x24d0] sm:$0xff]  ;;  %1739 = vmatpush.msra.mxu3 %v298_v48  ;;  %1779 = vmatpush.msra.mxu2 %v682_v49  ;;  %v419_v41 = vld [vmem:[#allocation5 + $0xa98] sm:$0xff] }
  0xce   :  { %v286_v54 = vld [vmem:[#allocation5 + $0x670] sm:$0xff]  ;;  %1792 = vmatpush.msra.mxu1 %v958_v50  ;;  %1839 = vmatpush.msra.mxu0 %v1258_v53  ;;  %v719_v42 = vld [vmem:[#allocation5 + $0x13f8] sm:$0xff] }
  0xcf   :  { %v670_v55 = vld [vmem:[#allocation5 + $0x1270] sm:$0xff]  ;;  %1740 = vmatpush.msra.mxu3 %v286_v54  ;;  %1762 = vmatmul.f32.vlgmr.msrb.gmra.mxu0 %v3834_v38  ;;  %v131_v44 = vld [vmem:[#allocation5 + $0x198] sm:$0xff] }
  0xd0   :  { %v946_v56 = vld [vmem:[#allocation5 + $0x1b10] sm:$0xff]  ;;  %1780 = vmatpush.msra.mxu2 %v670_v55  ;;  %1722 = vmatmul.f32.vlgmr.msrb.gmra.mxu1 %v3837_v51  ;;  %v155_v51 = vld [vmem:[#allocation5 + $0x258] sm:$0xff]  ;;  %v1344_v55 = vperm.slane %v3871_v46, 0 }
  0xd1   :  { %v1246_v58 = vld [vmem:[#allocation5 + $0x2470] sm:$0xff]  ;;  %1793 = vmatpush.msra.mxu1 %v946_v56  ;;  %v407_v45 = vld [vmem:[#allocation5 + $0xa38] sm:$0xff] }
  0xd2   :  { %v274_v59 = vld [vmem:[#allocation5 + $0x610] sm:$0xff]  ;;  %1840 = vmatpush.msra.mxu0 %v1246_v58  ;;  %v707_v47 = vld [vmem:[#allocation5 + $0x1398] sm:$0xff] }
  0xd3   :  { %v658_v60 = vld [vmem:[#allocation5 + $0x1210] sm:$0xff]  ;;  %1741 = vmatpush.msra.mxu3 %v274_v59  ;;  %v119_v49 = vld [vmem:[#allocation5 + $0x138] sm:$0xff] }
  0xd4   :  { %v934_v61 = vld [vmem:[#allocation5 + $0x1ab0] sm:$0xff]  ;;  %1781 = vmatpush.msra.mxu2 %v658_v60  ;;  %1742 = vmatmul.f32.vlgmr.msra.gmra.mxu3 %v3842_v57  ;;  %v395_v50 = vld [vmem:[#allocation5 + $0x9d8] sm:$0xff] }
  0xd5   :  { %v1234_v62 = vld [vmem:[#allocation5 + $0x2410] sm:$0xff]  ;;  %1794 = vmatpush.msra.mxu1 %v934_v61  ;;  %1782 = vmatmul.f32.vlgmr.msra.gmra.mxu2 %v3839_v52  ;;  %v431_v52 = vld [vmem:[#allocation5 + $0xaf8] sm:$0xff] }
  0xd6   :  { %v1222_v63 = vld [vmem:[#allocation5 + $0x23b0] sm:$0xff]  ;;  %1841 = vmatpush.msra.mxu0 %v1234_v62  ;;  %1846 = vmatpush.msrb.mxu2 %v263_v0  ;;  %v695_v53 = vld [vmem:[#allocation5 + $0x1338] sm:$0xff]  ;;  %v1443_v62 = vpop.f32.mrf.mxu0 }
  0xd7   :  { %v922_v3 = vld [vmem:[#allocation5 + $0x1a50] sm:$0xff]  ;;  %1806 = vmatpush.msrb.mxu3 %v1222_v63  ;;  %v383_v56 = vld [vmem:[#allocation5 + $0x978] sm:$0xff]  ;;  %3607 = vmatmul.msk.f32.vlgmr.msra.gmra.mxu0 %vm1386_vm1, %v3846_v2 }
  0xd8   :  { %v1210_v4 = vld [vmem:[#allocation5 + $0x2350] sm:$0xff]  ;;  %1906 = vmatpush.msrb.mxu0 %v839_v1  ;;  %1795 = vmatpush.msra.mxu1 %v922_v3  ;;  %v683_v58 = vld [vmem:[#allocation5 + $0x12d8] sm:$0xff]  ;;  %v1444_v1 = vadd.f32 %v1443_v62, %v1344_v55 }
  0xd9   :  { %v910_v8 = vld [vmem:[#allocation5 + $0x19f0] sm:$0xff]  ;;  %1807 = vmatpush.msrb.mxu3 %v1210_v4  ;;  %1847 = vmatpush.msrb.mxu2 %v251_v5  ;;  %v95_v60 = vld [vmem:[#allocation5 + $0x78] sm:$0xff] }
  0xda   :  { %v1198_v9 = vld [vmem:[#allocation5 + $0x22f0] sm:$0xff]  ;;  %1907 = vmatpush.msrb.mxu0 %v827_v6  ;;  %1796 = vmatpush.msra.mxu1 %v910_v8  ;;  %v371_v61 = vld [vmem:[#allocation5 + $0x918] sm:$0xff]  ;;  %v1463_v6 = vpop.f32.mrf.mxu1 }
  0xdb   :  { %v898_v13 = vld [vmem:[#allocation5 + $0x1990] sm:$0xff]  ;;  %1808 = vmatpush.msrb.mxu3 %v1198_v9  ;;  %1848 = vmatpush.msrb.mxu2 %v239_v10  ;;  %v671_v63 = vld [vmem:[#allocation5 + $0x1278] sm:$0xff]  ;;  %v1464_v10 = vadd.f32 %v1463_v6, %v1444_v1  ;;  %v132_v1 = vld [vmem:[#allocation5 + $0x1a0] sm:$0xff] }
  0xdc   :  { %v1186_v14 = vld [vmem:[#allocation5 + $0x2290] sm:$0xff]  ;;  %1908 = vmatpush.msrb.mxu0 %v815_v11  ;;  %1797 = vmatpush.msra.mxu1 %v898_v13  ;;  %v83_v3 = vld [vmem:[#allocation5 + $0x18] sm:$0xff]  ;;  %v264_v13 = vld [vmem:[#allocation5 + $0x5c0] sm:$0xff] }
  0xdd   :  { %v886_v38 = vld [vmem:[#allocation5 + $0x1930] sm:$0xff]  ;;  %1809 = vmatpush.msrb.mxu3 %v1186_v14  ;;  %1849 = vmatpush.msrb.mxu2 %v227_v15  ;;  %v359_v4 = vld [vmem:[#allocation5 + $0x8b8] sm:$0xff]  ;;  %v120_v6 = vld [vmem:[#allocation5 + $0x140] sm:$0xff] }
  0xde   :  { %v1174_v17 = vld [vmem:[#allocation5 + $0x2230] sm:$0xff]  ;;  %1909 = vmatpush.msrb.mxu0 %v803_v16  ;;  %1798 = vmatpush.msra.mxu1 %v886_v38  ;;  %v659_v5 = vld [vmem:[#allocation5 + $0x1218] sm:$0xff] }
  0xdf   :  { %v874_v20 = vld [vmem:[#allocation5 + $0x18d0] sm:$0xff]  ;;  %1810 = vmatpush.msrb.mxu3 %v1174_v17  ;;  %1850 = vmatpush.msrb.mxu2 %v215_v18  ;;  %v647_v9 = vld [vmem:[#allocation5 + $0x11b8] sm:$0xff]  ;;  %v252_v17 = vld [vmem:[#allocation5 + $0x560] sm:$0xff] }
  0xe0   :  { %v1162_v21 = vld [vmem:[#allocation5 + $0x21d0] sm:$0xff]  ;;  %1910 = vmatpush.msrb.mxu0 %v791_v19  ;;  %1799 = vmatpush.msra.mxu1 %v874_v20  ;;  %v1031_v11 = vld [vmem:[#allocation5 + $0x1db8] sm:$0xff] }
  0xe1   :  { %v862_v24 = vld [vmem:[#allocation5 + $0x1870] sm:$0xff]  ;;  %1811 = vmatpush.msrb.mxu3 %v1162_v21  ;;  %1851 = vmatpush.msrb.mxu2 %v203_v22  ;;  %v347_v14 = vld [vmem:[#allocation5 + $0x858] sm:$0xff] }
  0xe2   :  { %v1150_v25 = vld [vmem:[#allocation5 + $0x2170] sm:$0xff]  ;;  %1911 = vmatpush.msrb.mxu0 %v779_v23  ;;  %1800 = vmatpush.msra.mxu1 %v862_v24  ;;  %v635_v15 = vld [vmem:[#allocation5 + $0x1158] sm:$0xff]  ;;  %v240_v23 = vld [vmem:[#allocation5 + $0x500] sm:$0xff] }
  0xe3   :  { %v850_v28 = vld [vmem:[#allocation5 + $0x1810] sm:$0xff]  ;;  %1812 = vmatpush.msrb.mxu3 %v1150_v25  ;;  %1852 = vmatpush.msrb.mxu2 %v191_v26  ;;  %v1019_v38 = vld [vmem:[#allocation5 + $0x1d58] sm:$0xff]  ;;  %v228_v26 = vld [vmem:[#allocation5 + $0x4a0] sm:$0xff] }
  0xe4   :  { %v1138_v57 = vld [vmem:[#allocation5 + $0x2110] sm:$0xff]  ;;  %1912 = vmatpush.msrb.mxu0 %v767_v27  ;;  %1801 = vmatpush.msra.mxu1 %v850_v28  ;;  %v335_v19 = vld [vmem:[#allocation5 + $0x7f8] sm:$0xff] }
  0xe5   :  { %v1126_v32 = vld [vmem:[#allocation5 + $0x20b0] sm:$0xff]  ;;  %1813 = vmatpush.msrb.mxu3 %v1138_v57  ;;  %1853 = vmatpush.msrb.mxu2 %v179_v29  ;;  %v623_v20 = vld [vmem:[#allocation5 + $0x10f8] sm:$0xff] }
  0xe6   :  { %1866 = vmatpush.msrb.mxu1 %v455_v30  ;;  %1913 = vmatpush.msrb.mxu0 %v755_v31  ;;  %v1114_v36 = vld [vmem:[#allocation5 + $0x2050] sm:$0xff]  ;;  %v1007_v22 = vld [vmem:[#allocation5 + $0x1cf8] sm:$0xff]  ;;  %v216_v30 = vld [vmem:[#allocation5 + $0x440] sm:$0xff] }
  0xe7   :  { %1814 = vmatpush.msrb.mxu3 %v1126_v32  ;;  %1854 = vmatpush.msrb.mxu2 %v167_v33  ;;  %v1102_v39 = vld [vmem:[#allocation5 + $0x1ff0] sm:$0xff]  ;;  %v611_v24 = vld [vmem:[#allocation5 + $0x1098] sm:$0xff] }
  0xe8   :  { %1867 = vmatpush.msrb.mxu1 %v443_v34  ;;  %1914 = vmatpush.msrb.mxu0 %v743_v35  ;;  %v1090_v43 = vld [vmem:[#allocation5 + $0x1f90] sm:$0xff]  ;;  %v995_v2 = vld [vmem:[#allocation5 + $0x1c98] sm:$0xff] }
  0xe9   :  { %1815 = vmatpush.msrb.mxu3 %v1114_v36  ;;  %1855 = vmatpush.msrb.mxu2 %v155_v51  ;;  %v1078_v48 = vld [vmem:[#allocation5 + $0x1f30] sm:$0xff]  ;;  %v311_v28 = vld [vmem:[#allocation5 + $0x738] sm:$0xff]  ;;  %v204_v51 = vld [vmem:[#allocation5 + $0x3e0] sm:$0xff] }
  0xea   :  { %1868 = vmatpush.msrb.mxu1 %v431_v52  ;;  %1915 = vmatpush.msrb.mxu0 %v731_v37  ;;  %v1066_v54 = vld [vmem:[#allocation5 + $0x1ed0] sm:$0xff]  ;;  %v599_v57 = vld [vmem:[#allocation5 + $0x1038] sm:$0xff] }
  0xeb   :  { %1802 = vmatmul.f32.vlgmr.msra.gmra.mxu1 %v3848_v7  ;;  %1816 = vmatpush.msrb.mxu3 %v1102_v39  ;;  %v107_v7 = vld [vmem:[#allocation5 + $0xd8] sm:$0xff]  ;;  %v1054_v59 = vld [vmem:[#allocation5 + $0x1e70] sm:$0xff] }
  0xec   :  { %1856 = vmatpush.msrb.mxu2 %v143_v40  ;;  %1869 = vmatpush.msrb.mxu1 %v419_v41  ;;  %v1042_v0 = vld [vmem:[#allocation5 + $0x1e10] sm:$0xff]  ;;  %v983_v29 = vld [vmem:[#allocation5 + $0x1c38] sm:$0xff]  ;;  %v192_v41 = vld [vmem:[#allocation5 + $0x380] sm:$0xff] }
  0xed   :  { %1916 = vmatpush.msrb.mxu0 %v719_v42  ;;  %1817 = vmatpush.msrb.mxu3 %v1090_v43  ;;  %v299_v32 = vld [vmem:[#allocation5 + $0x6d8] sm:$0xff] }
  0xee   :  { %1857 = vmatpush.msrb.mxu2 %v131_v44  ;;  %1870 = vmatpush.msrb.mxu1 %v407_v45  ;;  %v587_v33 = vld [vmem:[#allocation5 + $0xfd8] sm:$0xff] }
  0xef   :  { %1917 = vmatpush.msrb.mxu0 %v707_v47  ;;  %1818 = vmatpush.msrb.mxu3 %v1078_v48  ;;  %v971_v36 = vld [vmem:[#allocation5 + $0x1bd8] sm:$0xff]  ;;  %v180_v47 = vld [vmem:[#allocation5 + $0x320] sm:$0xff] }
  0xf0   :  { %1858 = vmatpush.msrb.mxu2 %v119_v49  ;;  %1871 = vmatpush.msrb.mxu1 %v395_v50  ;;  %v287_v52 = vld [vmem:[#allocation5 + $0x678] sm:$0xff] }
  0xf1   :  { %1918 = vmatpush.msrb.mxu0 %v695_v53  ;;  %1819 = vmatpush.msrb.mxu3 %v1066_v54  ;;  %v575_v37 = vld [vmem:[#allocation5 + $0xf78] sm:$0xff]  ;;  %v168_v53 = vld [vmem:[#allocation5 + $0x2c0] sm:$0xff] }
  0xf2   :  { %1859 = vmatpush.msrb.mxu2 %v107_v7  ;;  %1872 = vmatpush.msrb.mxu1 %v383_v56  ;;  %v1483_v8 = vpop.f32.mrf.mxu2  ;;  %v1503_v18 = vpop.f32.mrf.mxu3  ;;  %v959_v40 = vld [vmem:[#allocation5 + $0x1b78] sm:$0xff]  ;;  %v156_v56 = vld [vmem:[#allocation5 + $0x260] sm:$0xff] }
  0xf3   :  { %1919 = vmatpush.msrb.mxu0 %v683_v58  ;;  %1820 = vmatpush.msrb.mxu3 %v1054_v59  ;;  %v1484_v16 = vadd.f32 %v1483_v8, %v1464_v10  ;;  %v275_v42 = vld [vmem:[#allocation5 + $0x618] sm:$0xff] }
  0xf4   :  { %1860 = vmatpush.msrb.mxu2 %v95_v60  ;;  %1873 = vmatpush.msrb.mxu1 %v371_v61  ;;  %v563_v43 = vld [vmem:[#allocation5 + $0xf18] sm:$0xff]  ;;  %v144_v61 = vld [vmem:[#allocation5 + $0x200] sm:$0xff] }
  0xf5   :  { %1920 = vmatpush.msrb.mxu0 %v671_v63  ;;  %1821 = vmatpush.msrb.mxu3 %v1042_v0  ;;  %v1504_v21 = vadd.f32 %v1503_v18, %v1484_v16  ;;  %v947_v44 = vld [vmem:[#allocation5 + $0x1b18] sm:$0xff]  ;;  %v96_v16 = vld [vmem:[#allocation5 + $0x80] sm:$0xff] }
  0xf6   :  { %1861 = vmatpush.msrb.mxu2 %v83_v3  ;;  %1874 = vmatpush.msrb.mxu1 %v359_v4  ;;  %v1223_v45 = vld [vmem:[#allocation5 + $0x23b8] sm:$0xff] }
  0xf7   :  { %1921 = vmatpush.msrb.mxu0 %v659_v5  ;;  %1822 = vmatmul.f32.vlgmr.msrb.gmra.mxu3 %v3853_v12  ;;  %v323_v12 = vld [vmem:[#allocation5 + $0x798] sm:$0xff] }
  0xf8   :  { %1886 = vmatpush.msra.mxu3 %v647_v9  ;;  %1926 = vmatpush.msra.mxu2 %v1031_v11  ;;  %v551_v48 = vld [vmem:[#allocation5 + $0xeb8] sm:$0xff]  ;;  %v108_v11 = vld [vmem:[#allocation5 + $0xe0] sm:$0xff] }
  0xf9   :  { %1986 = vmatpush.msra.mxu0 %v264_v13  ;;  %1875 = vmatpush.msrb.mxu1 %v347_v14  ;;  %v935_v49 = vld [vmem:[#allocation5 + $0x1ab8] sm:$0xff] }
  0xfa   :  { %1887 = vmatpush.msra.mxu3 %v635_v15  ;;  %1927 = vmatpush.msra.mxu2 %v1019_v38  ;;  %v1211_v50 = vld [vmem:[#allocation5 + $0x2358] sm:$0xff] }
  0xfb   :  { %1987 = vmatpush.msra.mxu0 %v252_v17  ;;  %v1523_v25 = vpop.f32.mrf.mxu0  ;;  %1876 = vmatpush.msrb.mxu1 %v335_v19  ;;  %v539_v54 = vld [vmem:[#allocation5 + $0xe58] sm:$0xff]  ;;  %v84_v19 = vld [vmem:[#allocation5 + $0x20] sm:$0xff] }
  0xfc   :  { %1888 = vmatpush.msra.mxu3 %v623_v20  ;;  %v1524_v27 = vadd.f32 %v1523_v25, %v1504_v21  ;;  %1928 = vmatpush.msra.mxu2 %v1007_v22  ;;  %v923_v55 = vld [vmem:[#allocation5 + $0x1a58] sm:$0xff]  ;;  %v456_v21 = vld [vmem:[#allocation5 + $0xbc0] sm:$0xff] }
  0xfd   :  { %1988 = vmatpush.msra.mxu0 %v240_v23  ;;  %1877 = vmatpush.msrb.mxu1 %v323_v12  ;;  %v1199_v7 = vld [vmem:[#allocation5 + $0x22f8] sm:$0xff]  ;;  %v1032_v22 = vld [vmem:[#allocation5 + $0x1dc0] sm:$0xff]  ;;  %v3879_v23 = vld.sshfl [vmem:[#allocation1] sm:$0xff pattern:$0x73625140] }
  0xfe   :  { %1889 = vmatpush.msra.mxu3 %v611_v24  ;;  %v1543_v31 = vpop.f32.mrf.mxu1  ;;  %1929 = vmatpush.msra.mxu2 %v995_v2  ;;  %v527_v58 = vld [vmem:[#allocation5 + $0xdf8] sm:$0xff]  ;;  %v3882_v25 = vld.sshfl [vmem:[#allocation1 + $0x18] sm:$0xff pattern:$0x73625140] }
  0xff   :  { %1989 = vmatpush.msra.mxu0 %v228_v26  ;;  %v1544_v34 = vadd.f32 %v1543_v31, %v1524_v27  ;;  %v1563_v35 = vpop.f32.mrf.mxu2  ;;  %1878 = vmatpush.msrb.mxu1 %v311_v28  ;;  %v911_v59 = vld [vmem:[#allocation5 + $0x19f8] sm:$0xff]  ;;  %v444_v2 = vld [vmem:[#allocation5 + $0xb60] sm:$0xff] }
 0x100   :  { %1890 = vmatpush.msra.mxu3 %v599_v57  ;;  %1930 = vmatpush.msra.mxu2 %v983_v29  ;;  %v1187_v60 = vld [vmem:[#allocation5 + $0x2298] sm:$0xff]  ;;  %v1020_v26 = vld [vmem:[#allocation5 + $0x1d60] sm:$0xff] }
 0x101   :  { %1990 = vmatpush.msra.mxu0 %v216_v30  ;;  %v3877_v39 = vadd.f32 %v1563_v35, %v1544_v34  ;;  %1879 = vmatpush.msrb.mxu1 %v299_v32  ;;  %v515_v62 = vld [vmem:[#allocation5 + $0xd98] sm:$0xff]  ;;  %v432_v57 = vld [vmem:[#allocation5 + $0xb00] sm:$0xff] }
 0x102   :  { %1891 = vmatpush.msra.mxu3 %v587_v33  ;;  %1931 = vmatpush.msra.mxu2 %v971_v36  ;;  %v899_v63 = vld [vmem:[#allocation5 + $0x1998] sm:$0xff]  ;;  %v1008_v29 = vld [vmem:[#allocation5 + $0x1d00] sm:$0xff] }
 0x103   :  { %1991 = vmatpush.msra.mxu0 %v204_v51  ;;  %1880 = vmatpush.msrb.mxu1 %v287_v52  ;;  %v1175_v0 = vld [vmem:[#allocation5 + $0x2238] sm:$0xff]  ;;  %v420_v32 = vld [vmem:[#allocation5 + $0xaa0] sm:$0xff]  ;;  %vm3106_vm5 = vcmp.gt.f32.partialorder %v3877_v39, 0.0 }
 0x104   :  { %1892 = vmatpush.msra.mxu3 %v575_v37  ;;  %1932 = vmatpush.msra.mxu2 %v959_v40  ;;  %v503_v3 = vld [vmem:[#allocation5 + $0xd38] sm:$0xff]  ;;  %v996_v33 = vld [vmem:[#allocation5 + $0x1ca0] sm:$0xff]  ;;  %v1345_v37 = vperm.slane %v3871_v46, 1 }
 0x105   :  { %1992 = vmatpush.msra.mxu0 %v192_v41  ;;  %1881 = vmatpush.msrb.mxu1 %v275_v42  ;;  %v887_v4 = vld [vmem:[#allocation5 + $0x1938] sm:$0xff]  ;;  %v408_v36 = vld [vmem:[#allocation5 + $0xa40] sm:$0xff] }
 0x106   :  { %1893 = vmatpush.msra.mxu3 %v563_v43  ;;  %1933 = vmatpush.msra.mxu2 %v947_v44  ;;  %v1163_v5 = vld [vmem:[#allocation5 + $0x21d8] sm:$0xff]  ;;  %v984_v51 = vld [vmem:[#allocation5 + $0x1c40] sm:$0xff] }
 0x107   :  { %1946 = vmatpush.msra.mxu1 %v1223_v45  ;;  %1993 = vmatpush.msra.mxu0 %v180_v47  ;;  %v491_v8 = vld [vmem:[#allocation5 + $0xcd8] sm:$0xff]  ;;  %v396_v42 = vld [vmem:[#allocation5 + $0x9e0] sm:$0xff]  ;;  %v1583_v45 = vpop.f32.mrf.mxu3 }
 0x108   :  { %1894 = vmatpush.msra.mxu3 %v551_v48  ;;  %1934 = vmatpush.msra.mxu2 %v935_v49  ;;  %v875_v9 = vld [vmem:[#allocation5 + $0x18d8] sm:$0xff]  ;;  %v972_v43 = vld [vmem:[#allocation5 + $0x1be0] sm:$0xff]  ;;  %v1584_v49 = vadd.f32 %v1583_v45, %v1345_v37 }
 0x109   :  { %1947 = vmatpush.msra.mxu1 %v1211_v50  ;;  %1994 = vmatpush.msra.mxu0 %v168_v53  ;;  %v1151_v10 = vld [vmem:[#allocation5 + $0x2178] sm:$0xff]  ;;  %v384_v48 = vld [vmem:[#allocation5 + $0x980] sm:$0xff] }
 0x10a   :  { %1895 = vmatpush.msra.mxu3 %v539_v54  ;;  %1935 = vmatpush.msra.mxu2 %v923_v55  ;;  %v479_v13 = vld [vmem:[#allocation5 + $0xc78] sm:$0xff]  ;;  %v960_v46 = vld [vmem:[#allocation5 + $0x1b80] sm:$0xff]  ;;  %v3893_v55 = vld.sshfl [vmem:[#allocation1 + $0x20] sm:$0xff pattern:$0x73625140] }
 0x10b   :  { %1948 = vmatpush.msra.mxu1 %v1199_v7  ;;  %1995 = vmatpush.msra.mxu0 %v156_v56  ;;  %v863_v14 = vld [vmem:[#allocation5 + $0x1878] sm:$0xff]  ;;  %v372_v56 = vld [vmem:[#allocation5 + $0x920] sm:$0xff] }
 0x10c   :  { %1896 = vmatpush.msra.mxu3 %v527_v58  ;;  %1936 = vmatpush.msra.mxu2 %v911_v59  ;;  %v1139_v15 = vld [vmem:[#allocation5 + $0x2118] sm:$0xff]  ;;  %v840_v59 = vld [vmem:[#allocation5 + $0x17c0] sm:$0xff] }
 0x10d   :  { %1949 = vmatpush.msra.mxu1 %v1187_v60  ;;  %1996 = vmatpush.msra.mxu0 %v144_v61  ;;  %v467_v38 = vld [vmem:[#allocation5 + $0xc18] sm:$0xff]  ;;  %v948_v60 = vld [vmem:[#allocation5 + $0x1b20] sm:$0xff] }
 0x10e   :  { %1897 = vmatpush.msra.mxu3 %v515_v62  ;;  %1937 = vmatpush.msra.mxu2 %v899_v63  ;;  %v851_v17 = vld [vmem:[#allocation5 + $0x1818] sm:$0xff]  ;;  %v360_v62 = vld [vmem:[#allocation5 + $0x8c0] sm:$0xff] }
 0x10f   :  { %1950 = vmatpush.msra.mxu1 %v1175_v0  ;;  %1997 = vmatpush.msra.mxu0 %v132_v1  ;;  %v1127_v18 = vld [vmem:[#allocation5 + $0x20b8] sm:$0xff]  ;;  %v828_v0 = vld [vmem:[#allocation5 + $0x1760] sm:$0xff] }
 0x110   :  { %1898 = vmatpush.msra.mxu3 %v503_v3  ;;  %1938 = vmatpush.msra.mxu2 %v887_v4  ;;  %v1331_v20 = vld [vmem:[#allocation5 + $0x2718] sm:$0xf]  ;;  %v936_v1 = vld [vmem:[#allocation5 + $0x1ac0] sm:$0xff] }
 0x111   :  { %1951 = vmatpush.msra.mxu1 %v1163_v5  ;;  %1998 = vmatpush.msra.mxu0 %v120_v6  ;;  %v1115_v12 = vld [vmem:[#allocation5 + $0x2058] sm:$0xff]  ;;  %v348_v4 = vld [vmem:[#allocation5 + $0x860] sm:$0xff] }
 0x112   :  { %1899 = vmatpush.msra.mxu3 %v491_v8  ;;  %1939 = vmatpush.msra.mxu2 %v875_v9  ;;  %v1319_v24 = vld [vmem:[#allocation5 + $0x26b8] sm:$0xff]  ;;  %v648_v6 = vld [vmem:[#allocation5 + $0x11c0] sm:$0xff] }
 0x113   :  { %1952 = vmatpush.msra.mxu1 %v1151_v10  ;;  %1999 = vmatpush.msra.mxu0 %v108_v11  ;;  %v1103_v27 = vld [vmem:[#allocation5 + $0x1ff8] sm:$0xff]  ;;  %v816_v8 = vld [vmem:[#allocation5 + $0x1700] sm:$0xff] }
 0x114   :  { %1900 = vmatpush.msra.mxu3 %v479_v13  ;;  %1940 = vmatpush.msra.mxu2 %v863_v14  ;;  %v1307_v28 = vld [vmem:[#allocation5 + $0x2658] sm:$0xff]  ;;  %v924_v11 = vld [vmem:[#allocation5 + $0x1a60] sm:$0xff] }
 0x115   :  { %1953 = vmatpush.msra.mxu1 %v1139_v15  ;;  %2000 = vmatpush.msra.mxu0 %v96_v16  ;;  %v1091_v30 = vld [vmem:[#allocation5 + $0x1f98] sm:$0xff]  ;;  %v636_v14 = vld [vmem:[#allocation5 + $0x1160] sm:$0xff] }
 0x116   :  { %1901 = vmatpush.msra.mxu3 %v467_v38  ;;  %1941 = vmatpush.msra.mxu2 %v851_v17  ;;  %v1295_v31 = vld [vmem:[#allocation5 + $0x25f8] sm:$0xff]  ;;  %v336_v15 = vld [vmem:[#allocation5 + $0x800] sm:$0xff] }
 0x117   :  { %1954 = vmatpush.msra.mxu1 %v1127_v18  ;;  %2001 = vmatpush.msra.mxu0 %v84_v19  ;;  %v1079_v34 = vld [vmem:[#allocation5 + $0x1f38] sm:$0xff]  ;;  %v804_v38 = vld [vmem:[#allocation5 + $0x16a0] sm:$0xff] }
 0x118   :  { %1862 = vmatmul.f32.vlgmr.msrb.gmra.mxu2 %v3879_v23  ;;  %1922 = vmatmul.f32.vlgmr.msrb.gmra.mxu0 %v3882_v25  ;;  %v1283_v35 = vld [vmem:[#allocation5 + $0x2598] sm:$0xff]  ;;  %v912_v17 = vld [vmem:[#allocation5 + $0x1a00] sm:$0xff] }
 0x119   :  { %3608 = vmatpush.msk.msrb.mxu3 %vm1389_vm0, %v1331_v20  ;;  %2006 = vmatpush.msrb.mxu2 %v456_v21  ;;  %v1067_v52 = vld [vmem:[#allocation5 + $0x1ed8] sm:$0xff]  ;;  %v624_v19 = vld [vmem:[#allocation5 + $0x1100] sm:$0xff] }
 0x11a   :  { %2066 = vmatpush.msrb.mxu0 %v1032_v22  ;;  %1955 = vmatpush.msra.mxu1 %v1115_v12  ;;  %v3887_v40 = vld.sshfl [vmem:[#allocation1 + $0x10] sm:$0xff pattern:$0x73625140]  ;;  %v3890_v54 = vld.sshfl [vmem:[#allocation1 + $0x8] sm:$0xff pattern:$0x73625140] }
 0x11b   :  { %1974 = vmatpush.msrb.mxu3 %v1319_v24  ;;  %2007 = vmatpush.msrb.mxu2 %v444_v2  ;;  %v1271_v41 = vld [vmem:[#allocation5 + $0x2538] sm:$0xff]  ;;  %v324_v20 = vld [vmem:[#allocation5 + $0x7a0] sm:$0xff] }
 0x11c   :  { %2067 = vmatpush.msrb.mxu0 %v1020_v26  ;;  %1956 = vmatpush.msra.mxu1 %v1103_v27  ;;  %v1055_v44 = vld [vmem:[#allocation5 + $0x1e78] sm:$0xff]  ;;  %v792_v21 = vld [vmem:[#allocation5 + $0x1640] sm:$0xff] }
 0x11d   :  { %1975 = vmatpush.msrb.mxu3 %v1307_v28  ;;  %2008 = vmatpush.msrb.mxu2 %v432_v57  ;;  %v1259_v47 = vld [vmem:[#allocation5 + $0x24d8] sm:$0xff]  ;;  %v900_v22 = vld [vmem:[#allocation5 + $0x19a0] sm:$0xff] }
 0x11e   :  { %2068 = vmatpush.msrb.mxu0 %v1008_v29  ;;  %1957 = vmatpush.msra.mxu1 %v1091_v30  ;;  %v1043_v50 = vld [vmem:[#allocation5 + $0x1e18] sm:$0xff]  ;;  %v612_v12 = vld [vmem:[#allocation5 + $0x10a0] sm:$0xff] }
 0x11f   :  { %1976 = vmatpush.msrb.mxu3 %v1295_v31  ;;  %2009 = vmatpush.msrb.mxu2 %v420_v32  ;;  %v1247_v7 = vld [vmem:[#allocation5 + $0x2478] sm:$0xff]  ;;  %v312_v24 = vld [vmem:[#allocation5 + $0x740] sm:$0xff] }
 0x120   :  { %2069 = vmatpush.msrb.mxu0 %v996_v33  ;;  %1958 = vmatpush.msra.mxu1 %v1079_v34  ;;  %v1235_v61 = vld [vmem:[#allocation5 + $0x2418] sm:$0xff]  ;;  %v780_v2 = vld [vmem:[#allocation5 + $0x15e0] sm:$0xff] }
 0x121   :  { %1902 = vmatmul.f32.vlgmr.msra.gmra.mxu3 %v3887_v40  ;;  %2010 = vmatpush.msrb.mxu2 %v408_v36  ;;  %v3896_v13 = vld.sshfl [vmem:[#allocation1 + $0x30] sm:$0xff pattern:$0x73625140]  ;;  %v3900_v18 = vld.sshfl [vmem:[#allocation1 + $0x28] sm:$0xff pattern:$0x73625140] }
 0x122   :  { %1977 = vmatpush.msrb.mxu3 %v1283_v35  ;;  %2070 = vmatpush.msrb.mxu0 %v984_v51  ;;  %v888_v26 = vld [vmem:[#allocation5 + $0x1940] sm:$0xff] }
 0x123   :  { %1959 = vmatpush.msra.mxu1 %v1067_v52  ;;  %2011 = vmatpush.msrb.mxu2 %v396_v42  ;;  %v600_v27 = vld [vmem:[#allocation5 + $0x1040] sm:$0xff] }
 0x124   :  { %1978 = vmatpush.msrb.mxu3 %v1271_v41  ;;  %2071 = vmatpush.msrb.mxu0 %v972_v43  ;;  %v1603_v53 = vpop.f32.mrf.mxu2  ;;  %v300_v28 = vld [vmem:[#allocation5 + $0x6e0] sm:$0xff] }
 0x125   :  { %1960 = vmatpush.msra.mxu1 %v1055_v44  ;;  %1942 = vmatmul.f32.vlgmr.msra.gmra.mxu2 %v3893_v55  ;;  %v1604_v58 = vadd.f32 %v1603_v53, %v1584_v49  ;;  %v768_v57 = vld [vmem:[#allocation5 + $0x1580] sm:$0xff]  ;;  %v457_v44 = vld [vmem:[#allocation5 + $0xbc8] sm:$0xff] }
 0x126   :  { %1882 = vmatmul.f32.vlgmr.msrb.gmra.mxu1 %v3890_v54  ;;  %1979 = vmatpush.msrb.mxu3 %v1259_v47  ;;  %v1643_v5 = vpop.f32.mrf.mxu1  ;;  %v1663_v10 = vpop.f32.mrf.mxu3  ;;  %v876_v29 = vld [vmem:[#allocation5 + $0x18e0] sm:$0xff] }
 0x127   :  { %2012 = vmatpush.msrb.mxu2 %v384_v48  ;;  %2072 = vmatpush.msrb.mxu0 %v960_v46  ;;  %v1623_v63 = vpop.f32.mrf.mxu0  ;;  %v588_v30 = vld [vmem:[#allocation5 + $0xfe0] sm:$0xff]  ;;  %v445_v46 = vld [vmem:[#allocation5 + $0xb68] sm:$0xff] }
 0x128   :  { %1961 = vmatpush.msra.mxu1 %v1043_v50  ;;  %1980 = vmatpush.msrb.mxu3 %v1247_v7  ;;  %v1624_v3 = vadd.f32 %v1623_v63, %v1604_v58  ;;  %v288_v31 = vld [vmem:[#allocation5 + $0x680] sm:$0xff] }
 0x129   :  { %2013 = vmatpush.msrb.mxu2 %v372_v56  ;;  %2073 = vmatpush.msrb.mxu0 %v948_v60  ;;  %v756_v32 = vld [vmem:[#allocation5 + $0x1520] sm:$0xff]  ;;  %v433_v56 = vld [vmem:[#allocation5 + $0xb08] sm:$0xff] }
 0x12a   :  { %2046 = vmatpush.msrb.mxu1 %v840_v59  ;;  %1981 = vmatpush.msrb.mxu3 %v1235_v61  ;;  %v1644_v9 = vadd.f32 %v1643_v5, %v1624_v3  ;;  %v864_v33 = vld [vmem:[#allocation5 + $0x1880] sm:$0xff]  ;;  %v421_v61 = vld [vmem:[#allocation5 + $0xaa8] sm:$0xff] }
 0x12b   :  { %2014 = vmatpush.msrb.mxu2 %v360_v62  ;;  %2074 = vmatpush.msrb.mxu0 %v936_v1  ;;  %v576_v34 = vld [vmem:[#allocation5 + $0xf80] sm:$0xff]  ;;  %v409_v1 = vld [vmem:[#allocation5 + $0xa48] sm:$0xff] }
 0x12c   :  { %2047 = vmatpush.msrb.mxu1 %v828_v0  ;;  %3609 = vmatmul.msk.f32.vlgmr.msrb.gmra.mxu3 %vm1386_vm1, %v3896_v13  ;;  %v1664_v16 = vadd.f32 %v1663_v10, %v1644_v9  ;;  %v276_v35 = vld [vmem:[#allocation5 + $0x620] sm:$0xff] }
 0x12d   :  { %2015 = vmatpush.msrb.mxu2 %v348_v4  ;;  %2026 = vmatpush.msra.mxu3 %v648_v6  ;;  %v744_v51 = vld [vmem:[#allocation5 + $0x14c0] sm:$0xff]  ;;  %v397_v6 = vld [vmem:[#allocation5 + $0x9e8] sm:$0xff] }
 0x12e   :  { %2048 = vmatpush.msrb.mxu1 %v816_v8  ;;  %2075 = vmatpush.msrb.mxu0 %v924_v11  ;;  %v852_v52 = vld [vmem:[#allocation5 + $0x1820] sm:$0xff]  ;;  %v385_v11 = vld [vmem:[#allocation5 + $0x988] sm:$0xff] }
 0x12f   :  { %1962 = vmatmul.f32.vlgmr.msra.gmra.mxu1 %v3900_v18  ;;  %2027 = vmatpush.msra.mxu3 %v636_v14  ;;  %v564_v41 = vld [vmem:[#allocation5 + $0xf20] sm:$0xff] }
 0x130   :  { %2016 = vmatpush.msrb.mxu2 %v336_v15  ;;  %2049 = vmatpush.msrb.mxu1 %v804_v38  ;;  %v1224_v43 = vld [vmem:[#allocation5 + $0x23c0] sm:$0xff]  ;;  %v265_v38 = vld [vmem:[#allocation5 + $0x5c8] sm:$0xff] }
 0x131   :  { %2076 = vmatpush.msrb.mxu0 %v912_v17  ;;  %2028 = vmatpush.msra.mxu3 %v624_v19  ;;  %v732_v47 = vld [vmem:[#allocation5 + $0x1460] sm:$0xff]  ;;  %v373_v17 = vld [vmem:[#allocation5 + $0x928] sm:$0xff] }
 0x132   :  { %2017 = vmatpush.msrb.mxu2 %v324_v20  ;;  %2050 = vmatpush.msrb.mxu1 %v792_v21  ;;  %v552_v48 = vld [vmem:[#allocation5 + $0xec0] sm:$0xff]  ;;  %v253_v21 = vld [vmem:[#allocation5 + $0x568] sm:$0xff] }
 0x133   :  { %2077 = vmatpush.msrb.mxu0 %v900_v22  ;;  %2029 = vmatpush.msra.mxu3 %v612_v12  ;;  %v1212_v49 = vld [vmem:[#allocation5 + $0x2360] sm:$0xff]  ;;  %v361_v22 = vld [vmem:[#allocation5 + $0x8c8] sm:$0xff] }
 0x134   :  { %2018 = vmatpush.msrb.mxu2 %v312_v24  ;;  %2051 = vmatpush.msrb.mxu1 %v780_v2  ;;  %v720_v50 = vld [vmem:[#allocation5 + $0x1400] sm:$0xff]  ;;  %v241_v2 = vld [vmem:[#allocation5 + $0x508] sm:$0xff] }
 0x135   :  { %2078 = vmatpush.msrb.mxu0 %v888_v26  ;;  %2030 = vmatpush.msra.mxu3 %v600_v27  ;;  %v1683_v36 = vpop.f32.mrf.mxu2  ;;  %v540_v53 = vld [vmem:[#allocation5 + $0xe60] sm:$0xff]  ;;  %v349_v26 = vld [vmem:[#allocation5 + $0x868] sm:$0xff] }
 0x136   :  { %2019 = vmatpush.msrb.mxu2 %v300_v28  ;;  %2052 = vmatpush.msrb.mxu1 %v768_v57  ;;  %v1684_v37 = vadd.f32 %v1683_v36, %v1664_v16  ;;  %v1200_v7 = vld [vmem:[#allocation5 + $0x2300] sm:$0xff]  ;;  %v229_v57 = vld [vmem:[#allocation5 + $0x4a8] sm:$0xff] }
 0x137   :  { %2079 = vmatpush.msrb.mxu0 %v876_v29  ;;  %2031 = vmatpush.msra.mxu3 %v588_v30  ;;  %v1703_v42 = vpop.f32.mrf.mxu3  ;;  %v708_v58 = vld [vmem:[#allocation5 + $0x13a0] sm:$0xff]  ;;  %v337_v29 = vld [vmem:[#allocation5 + $0x808] sm:$0xff] }
 0x138   :  { %2020 = vmatpush.msrb.mxu2 %v288_v31  ;;  %2053 = vmatpush.msrb.mxu1 %v756_v32  ;;  %v3903_v45 = vadd.f32 %v1703_v42, %v1684_v37  ;;  %v528_v59 = vld [vmem:[#allocation5 + $0xe00] sm:$0xff]  ;;  %v217_v32 = vld [vmem:[#allocation5 + $0x448] sm:$0xff] }
 0x139   :  { %2080 = vmatpush.msrb.mxu0 %v864_v33  ;;  %2032 = vmatpush.msra.mxu3 %v576_v34  ;;  %v1188_v60 = vld [vmem:[#allocation5 + $0x22a0] sm:$0xff]  ;;  %v325_v33 = vld [vmem:[#allocation5 + $0x7a8] sm:$0xff] }
 0x13a   :  { %2021 = vmatpush.msrb.mxu2 %v276_v35  ;;  %2054 = vmatpush.msrb.mxu1 %v744_v51  ;;  %v696_v62 = vld [vmem:[#allocation5 + $0x1340] sm:$0xff]  ;;  %v205_v36 = vld [vmem:[#allocation5 + $0x3e8] sm:$0xff]  ;;  %vm3107_vm3 = vcmp.gt.f32.partialorder %v3903_v45, 0.0 }
 0x13b   :  { %2081 = vmatpush.msrb.mxu0 %v852_v52  ;;  %2033 = vmatpush.msra.mxu3 %v564_v41  ;;  %v516_v63 = vld [vmem:[#allocation5 + $0xda0] sm:$0xff]  ;;  %v313_v51 = vld [vmem:[#allocation5 + $0x748] sm:$0xff] }
 0x13c   :  { %2002 = vmatmul.f32.vlgmr.msra.gmra.mxu0 %v3879_v23  ;;  %2086 = vmatpush.msra.mxu2 %v1224_v43  ;;  %v1176_v0 = vld [vmem:[#allocation5 + $0x2240] sm:$0xff]  ;;  %v193_v41 = vld [vmem:[#allocation5 + $0x388] sm:$0xff] }
 0x13d   :  { %2146 = vmatpush.msra.mxu0 %v457_v44  ;;  %2055 = vmatpush.msrb.mxu1 %v732_v47  ;;  %v684_v3 = vld [vmem:[#allocation5 + $0x12e0] sm:$0xff]  ;;  %v301_v42 = vld [vmem:[#allocation5 + $0x6e8] sm:$0xff] }
 0x13e   :  { %2034 = vmatpush.msra.mxu3 %v552_v48  ;;  %2087 = vmatpush.msra.mxu2 %v1212_v49  ;;  %v504_v4 = vld [vmem:[#allocation5 + $0xd40] sm:$0xff]  ;;  %v181_v47 = vld [vmem:[#allocation5 + $0x328] sm:$0xff] }
 0x13f   :  { %2147 = vmatpush.msra.mxu0 %v445_v46  ;;  %2056 = vmatpush.msrb.mxu1 %v720_v50  ;;  %v1164_v5 = vld [vmem:[#allocation5 + $0x21e0] sm:$0xff]  ;;  %v289_v48 = vld [vmem:[#allocation5 + $0x688] sm:$0xff] }
 0x140   :  { %2035 = vmatpush.msra.mxu3 %v540_v53  ;;  %2088 = vmatpush.msra.mxu2 %v1200_v7  ;;  %v672_v8 = vld [vmem:[#allocation5 + $0x1280] sm:$0xff]  ;;  %v169_v50 = vld [vmem:[#allocation5 + $0x2c8] sm:$0xff] }
 0x141   :  { %2148 = vmatpush.msra.mxu0 %v433_v56  ;;  %2057 = vmatpush.msrb.mxu1 %v708_v58  ;;  %v492_v9 = vld [vmem:[#allocation5 + $0xce0] sm:$0xff]  ;;  %v277_v53 = vld [vmem:[#allocation5 + $0x628] sm:$0xff] }
 0x142   :  { %2036 = vmatpush.msra.mxu3 %v528_v59  ;;  %2089 = vmatpush.msra.mxu2 %v1188_v60  ;;  %v1152_v10 = vld [vmem:[#allocation5 + $0x2180] sm:$0xff]  ;;  %v841_v56 = vld [vmem:[#allocation5 + $0x17c8] sm:$0xff] }
 0x143   :  { %2149 = vmatpush.msra.mxu0 %v421_v61  ;;  %2058 = vmatpush.msrb.mxu1 %v696_v62  ;;  %v660_v14 = vld [vmem:[#allocation5 + $0x1220] sm:$0xff]  ;;  %v1225_v58 = vld [vmem:[#allocation5 + $0x23c8] sm:$0xff] }
 0x144   :  { %2037 = vmatpush.msra.mxu3 %v516_v63  ;;  %2090 = vmatpush.msra.mxu2 %v1176_v0  ;;  %v480_v15 = vld [vmem:[#allocation5 + $0xc80] sm:$0xff]  ;;  %v157_v59 = vld [vmem:[#allocation5 + $0x268] sm:$0xff] }
 0x145   :  { %2150 = vmatpush.msra.mxu0 %v409_v1  ;;  %2059 = vmatpush.msrb.mxu1 %v684_v3  ;;  %v1140_v16 = vld [vmem:[#allocation5 + $0x2120] sm:$0xff]  ;;  %v829_v61 = vld [vmem:[#allocation5 + $0x1768] sm:$0xff] }
 0x146   :  { %2038 = vmatpush.msra.mxu3 %v504_v4  ;;  %2091 = vmatpush.msra.mxu2 %v1164_v5  ;;  %v468_v19 = vld [vmem:[#allocation5 + $0xc20] sm:$0xff]  ;;  %v1213_v62 = vld [vmem:[#allocation5 + $0x2368] sm:$0xff] }
 0x147   :  { %2151 = vmatpush.msra.mxu0 %v397_v6  ;;  %2060 = vmatpush.msrb.mxu1 %v672_v8  ;;  %v1128_v20 = vld [vmem:[#allocation5 + $0x20c0] sm:$0xff]  ;;  %v145_v63 = vld [vmem:[#allocation5 + $0x208] sm:$0xff] }
 0x148   :  { %2022 = vmatmul.f32.vlgmr.msrb.gmra.mxu2 %v3890_v54  ;;  %2039 = vmatpush.msra.mxu3 %v492_v9  ;;  %v1116_v12 = vld [vmem:[#allocation5 + $0x2060] sm:$0xff]  ;;  %v649_v0 = vld [vmem:[#allocation5 + $0x11c8] sm:$0xff] }
 0x149   :  { %2092 = vmatpush.msra.mxu2 %v1152_v10  ;;  %2152 = vmatpush.msra.mxu0 %v385_v11  ;;  %v1332_v24 = vld [vmem:[#allocation5 + $0x2720] sm:$0xf]  ;;  %v817_v1 = vld [vmem:[#allocation5 + $0x1708] sm:$0xff] }
 0x14a   :  { %2061 = vmatpush.msrb.mxu1 %v660_v14  ;;  %2040 = vmatpush.msra.mxu3 %v480_v15  ;;  %v1104_v27 = vld [vmem:[#allocation5 + $0x2000] sm:$0xff]  ;;  %v1201_v3 = vld [vmem:[#allocation5 + $0x2308] sm:$0xff] }
 0x14b   :  { %2093 = vmatpush.msra.mxu2 %v1140_v16  ;;  %2153 = vmatpush.msra.mxu0 %v373_v17  ;;  %v1320_v28 = vld [vmem:[#allocation5 + $0x26c0] sm:$0xff]  ;;  %v133_v4 = vld [vmem:[#allocation5 + $0x1a8] sm:$0xff] }
 0x14c   :  { %2126 = vmatpush.msra.mxu1 %v265_v38  ;;  %2041 = vmatpush.msra.mxu3 %v468_v19  ;;  %v1092_v30 = vld [vmem:[#allocation5 + $0x1fa0] sm:$0xff]  ;;  %v637_v5 = vld [vmem:[#allocation5 + $0x1168] sm:$0xff] }
 0x14d   :  { %2094 = vmatpush.msra.mxu2 %v1128_v20  ;;  %2154 = vmatpush.msra.mxu0 %v361_v22  ;;  %v1308_v31 = vld [vmem:[#allocation5 + $0x2660] sm:$0xff]  ;;  %v805_v6 = vld [vmem:[#allocation5 + $0x16a8] sm:$0xff] }
 0x14e   :  { %2127 = vmatpush.msra.mxu1 %v253_v21  ;;  %2042 = vmatmul.f32.vlgmr.msra.gmra.mxu3 %v3887_v40  ;;  %v1080_v34 = vld [vmem:[#allocation5 + $0x1f40] sm:$0xff]  ;;  %v1189_v8 = vld [vmem:[#allocation5 + $0x22a8] sm:$0xff] }
 0x14f   :  { %2095 = vmatpush.msra.mxu2 %v1116_v12  ;;  %3610 = vmatpush.msk.msrb.mxu3 %vm1389_vm0, %v1332_v24  ;;  %v1296_v35 = vld [vmem:[#allocation5 + $0x2600] sm:$0xff]  ;;  %v121_v9 = vld [vmem:[#allocation5 + $0x148] sm:$0xff] }
 0x150   :  { %2128 = vmatpush.msra.mxu1 %v241_v2  ;;  %2155 = vmatpush.msra.mxu0 %v349_v26  ;;  %v1284_v52 = vld [vmem:[#allocation5 + $0x25a0] sm:$0xff]  ;;  %v625_v10 = vld [vmem:[#allocation5 + $0x1108] sm:$0xff] }
 0x151   :  { %2096 = vmatpush.msra.mxu2 %v1104_v27  ;;  %2114 = vmatpush.msrb.mxu3 %v1320_v28  ;;  %v1068_v37 = vld [vmem:[#allocation5 + $0x1ee0] sm:$0xff]  ;;  %v793_v11 = vld [vmem:[#allocation5 + $0x1648] sm:$0xff] }
 0x152   :  { %2129 = vmatpush.msra.mxu1 %v229_v57  ;;  %2156 = vmatpush.msra.mxu0 %v337_v29  ;;  %v1272_v43 = vld [vmem:[#allocation5 + $0x2540] sm:$0xff]  ;;  %v1177_v14 = vld [vmem:[#allocation5 + $0x2248] sm:$0xff] }
 0x153   :  { %2097 = vmatpush.msra.mxu2 %v1092_v30  ;;  %2115 = vmatpush.msrb.mxu3 %v1308_v31  ;;  %v1056_v44 = vld [vmem:[#allocation5 + $0x1e80] sm:$0xff]  ;;  %v109_v15 = vld [vmem:[#allocation5 + $0xe8] sm:$0xff] }
 0x154   :  { %2130 = vmatpush.msra.mxu1 %v217_v32  ;;  %2157 = vmatpush.msra.mxu0 %v325_v33  ;;  %v1260_v49 = vld [vmem:[#allocation5 + $0x24e0] sm:$0xff]  ;;  %v613_v16 = vld [vmem:[#allocation5 + $0x10a8] sm:$0xff] }
 0x155   :  { %2098 = vmatpush.msra.mxu2 %v1080_v34  ;;  %2116 = vmatpush.msrb.mxu3 %v1296_v35  ;;  %v1044_v46 = vld [vmem:[#allocation5 + $0x1e20] sm:$0xff]  ;;  %v781_v38 = vld [vmem:[#allocation5 + $0x15e8] sm:$0xff] }
 0x156   :  { %2131 = vmatpush.msra.mxu1 %v205_v36  ;;  %2158 = vmatpush.msra.mxu0 %v313_v51  ;;  %v1248_v7 = vld [vmem:[#allocation5 + $0x2480] sm:$0xff]  ;;  %v1165_v17 = vld [vmem:[#allocation5 + $0x21e8] sm:$0xff] }
 0x157   :  { %2062 = vmatmul.f32.vlgmr.msrb.gmra.mxu1 %v3882_v25  ;;  %2117 = vmatpush.msrb.mxu3 %v1284_v52  ;;  %v1236_v60 = vld [vmem:[#allocation5 + $0x2420] sm:$0xff]  ;;  %v97_v19 = vld [vmem:[#allocation5 + $0x88] sm:$0xff] }
 0x158   :  { %2099 = vmatpush.msra.mxu2 %v1068_v37  ;;  %2132 = vmatpush.msra.mxu1 %v193_v41  ;;  %v601_v20 = vld [vmem:[#allocation5 + $0x1048] sm:$0xff] }
 0x159   :  { %2159 = vmatpush.msra.mxu0 %v301_v42  ;;  %2118 = vmatpush.msrb.mxu3 %v1272_v43  ;;  %v769_v21 = vld [vmem:[#allocation5 + $0x1588] sm:$0xff] }
 0x15a   :  { %2082 = vmatmul.f32.vlgmr.msrb.gmra.mxu0 %v3893_v55  ;;  %2100 = vmatpush.msra.mxu2 %v1056_v44  ;;  %v1153_v22 = vld [vmem:[#allocation5 + $0x2188] sm:$0xff] }
 0x15b   :  { %2133 = vmatpush.msra.mxu1 %v181_v47  ;;  %2160 = vmatpush.msra.mxu0 %v289_v48  ;;  %v85_v12 = vld [vmem:[#allocation5 + $0x28] sm:$0xff] }
 0x15c   :  { %2119 = vmatpush.msrb.mxu3 %v1260_v49  ;;  %2101 = vmatpush.msra.mxu2 %v1044_v46  ;;  %v589_v24 = vld [vmem:[#allocation5 + $0xfe8] sm:$0xff] }
 0x15d   :  { %2134 = vmatpush.msra.mxu1 %v169_v50  ;;  %2161 = vmatpush.msra.mxu0 %v277_v53  ;;  %v757_v2 = vld [vmem:[#allocation5 + $0x1528] sm:$0xff] }
 0x15e   :  { %2102 = vmatmul.f32.vlgmr.msra.gmra.mxu2 %v3900_v18  ;;  %2120 = vmatpush.msrb.mxu3 %v1248_v7  ;;  %v1033_v26 = vld [vmem:[#allocation5 + $0x1dc8] sm:$0xff] }
 0x15f   :  { %2186 = vmatpush.msrb.mxu2 %v841_v56  ;;  %2226 = vmatpush.msrb.mxu0 %v1225_v58  ;;  %v1141_v27 = vld [vmem:[#allocation5 + $0x2128] sm:$0xff] }
 0x160   :  { %2135 = vmatpush.msra.mxu1 %v157_v59  ;;  %2121 = vmatpush.msrb.mxu3 %v1236_v60  ;;  %v577_v28 = vld [vmem:[#allocation5 + $0xf88] sm:$0xff] }
 0x161   :  { %2187 = vmatpush.msrb.mxu2 %v829_v61  ;;  %2227 = vmatpush.msrb.mxu0 %v1213_v62  ;;  %v745_v57 = vld [vmem:[#allocation5 + $0x14c8] sm:$0xff] }
 0x162   :  { %3611 = vmatmul.msk.f32.vlgmr.msrb.gmra.mxu3 %vm1386_vm1, %v3896_v13  ;;  %2136 = vmatpush.msra.mxu1 %v145_v63  ;;  %v1021_v29 = vld [vmem:[#allocation5 + $0x1d68] sm:$0xff] }
 0x163   :  { %2166 = vmatpush.msra.mxu3 %v649_v0  ;;  %2188 = vmatpush.msrb.mxu2 %v817_v1  ;;  %v1129_v30 = vld [vmem:[#allocation5 + $0x20c8] sm:$0xff] }
 0x164   :  { %2228 = vmatpush.msrb.mxu0 %v1201_v3  ;;  %2137 = vmatpush.msra.mxu1 %v133_v4  ;;  %v565_v31 = vld [vmem:[#allocation5 + $0xf28] sm:$0xff]  ;;  %v266_v3 = vld [vmem:[#allocation5 + $0x5d0] sm:$0xff] }
 0x165   :  { %2167 = vmatpush.msra.mxu3 %v637_v5  ;;  %2189 = vmatpush.msrb.mxu2 %v805_v6  ;;  %v733_v32 = vld [vmem:[#allocation5 + $0x1468] sm:$0xff]  ;;  %v842_v4 = vld [vmem:[#allocation5 + $0x17d0] sm:$0xff] }
 0x166   :  { %2229 = vmatpush.msrb.mxu0 %v1189_v8  ;;  %2138 = vmatpush.msra.mxu1 %v121_v9  ;;  %v1009_v33 = vld [vmem:[#allocation5 + $0x1d08] sm:$0xff]  ;;  %v254_v8 = vld [vmem:[#allocation5 + $0x570] sm:$0xff] }
 0x167   :  { %2168 = vmatpush.msra.mxu3 %v625_v10  ;;  %2190 = vmatpush.msrb.mxu2 %v793_v11  ;;  %v1117_v34 = vld [vmem:[#allocation5 + $0x2068] sm:$0xff]  ;;  %v830_v9 = vld [vmem:[#allocation5 + $0x1770] sm:$0xff] }
 0x168   :  { %2230 = vmatpush.msrb.mxu0 %v1177_v14  ;;  %2139 = vmatpush.msra.mxu1 %v109_v15  ;;  %v553_v35 = vld [vmem:[#allocation5 + $0xec8] sm:$0xff]  ;;  %v242_v14 = vld [vmem:[#allocation5 + $0x510] sm:$0xff] }
 0x169   :  { %2169 = vmatpush.msra.mxu3 %v613_v16  ;;  %2191 = vmatpush.msrb.mxu2 %v781_v38  ;;  %v721_v36 = vld [vmem:[#allocation5 + $0x1408] sm:$0xff]  ;;  %v818_v15 = vld [vmem:[#allocation5 + $0x1710] sm:$0xff] }
 0x16a   :  { %2231 = vmatpush.msrb.mxu0 %v1165_v17  ;;  %2140 = vmatpush.msra.mxu1 %v97_v19  ;;  %v997_v51 = vld [vmem:[#allocation5 + $0x1ca8] sm:$0xff]  ;;  %v230_v17 = vld [vmem:[#allocation5 + $0x4b0] sm:$0xff] }
 0x16b   :  { %2170 = vmatpush.msra.mxu3 %v601_v20  ;;  %2192 = vmatpush.msrb.mxu2 %v769_v21  ;;  %v1105_v52 = vld [vmem:[#allocation5 + $0x2008] sm:$0xff]  ;;  %v806_v19 = vld [vmem:[#allocation5 + $0x16b0] sm:$0xff] }
 0x16c   :  { %2232 = vmatpush.msrb.mxu0 %v1153_v22  ;;  %2141 = vmatpush.msra.mxu1 %v85_v12  ;;  %v541_v37 = vld [vmem:[#allocation5 + $0xe68] sm:$0xff]  ;;  %v218_v21 = vld [vmem:[#allocation5 + $0x450] sm:$0xff] }
 0x16d   :  { %2171 = vmatpush.msra.mxu3 %v589_v24  ;;  %2193 = vmatpush.msrb.mxu2 %v757_v2  ;;  %v709_v41 = vld [vmem:[#allocation5 + $0x13a8] sm:$0xff]  ;;  %v794_v22 = vld [vmem:[#allocation5 + $0x1650] sm:$0xff] }
 0x16e   :  { %2206 = vmatpush.msrb.mxu1 %v1033_v26  ;;  %2233 = vmatpush.msrb.mxu0 %v1141_v27  ;;  %v985_v42 = vld [vmem:[#allocation5 + $0x1c48] sm:$0xff]  ;;  %v206_v2 = vld [vmem:[#allocation5 + $0x3f0] sm:$0xff] }
 0x16f   :  { %2172 = vmatpush.msra.mxu3 %v577_v28  ;;  %2194 = vmatpush.msrb.mxu2 %v745_v57  ;;  %v1093_v43 = vld [vmem:[#allocation5 + $0x1fa8] sm:$0xff]  ;;  %v782_v26 = vld [vmem:[#allocation5 + $0x15f0] sm:$0xff] }
 0x170   :  { %2207 = vmatpush.msrb.mxu1 %v1021_v29  ;;  %2234 = vmatpush.msrb.mxu0 %v1129_v30  ;;  %v529_v44 = vld [vmem:[#allocation5 + $0xe08] sm:$0xff]  ;;  %v194_v57 = vld [vmem:[#allocation5 + $0x390] sm:$0xff] }
 0x171   :  { %2173 = vmatpush.msra.mxu3 %v565_v31  ;;  %2195 = vmatpush.msrb.mxu2 %v733_v32  ;;  %v697_v47 = vld [vmem:[#allocation5 + $0x1348] sm:$0xff]  ;;  %v770_v29 = vld [vmem:[#allocation5 + $0x1590] sm:$0xff] }
 0x172   :  { %2208 = vmatpush.msrb.mxu1 %v1009_v33  ;;  %2235 = vmatpush.msrb.mxu0 %v1117_v34  ;;  %v973_v48 = vld [vmem:[#allocation5 + $0x1be8] sm:$0xff]  ;;  %v182_v32 = vld [vmem:[#allocation5 + $0x330] sm:$0xff] }
 0x173   :  { %2174 = vmatpush.msra.mxu3 %v553_v35  ;;  %2196 = vmatpush.msrb.mxu2 %v721_v36  ;;  %v1081_v49 = vld [vmem:[#allocation5 + $0x1f48] sm:$0xff]  ;;  %v650_v33 = vld [vmem:[#allocation5 + $0x11d0] sm:$0xff] }
 0x174   :  { %2209 = vmatpush.msrb.mxu1 %v997_v51  ;;  %2236 = vmatpush.msrb.mxu0 %v1105_v52  ;;  %v517_v46 = vld [vmem:[#allocation5 + $0xda8] sm:$0xff]  ;;  %v758_v34 = vld [vmem:[#allocation5 + $0x1530] sm:$0xff] }
 0x175   :  { %2175 = vmatpush.msra.mxu3 %v541_v37  ;;  %2197 = vmatpush.msrb.mxu2 %v709_v41  ;;  %v685_v50 = vld [vmem:[#allocation5 + $0x12e8] sm:$0xff]  ;;  %v170_v36 = vld [vmem:[#allocation5 + $0x2d0] sm:$0xff] }
 0x176   :  { %2210 = vmatpush.msrb.mxu1 %v985_v42  ;;  %2237 = vmatpush.msrb.mxu0 %v1093_v43  ;;  %v961_v53 = vld [vmem:[#allocation5 + $0x1b88] sm:$0xff]  ;;  %v638_v51 = vld [vmem:[#allocation5 + $0x1170] sm:$0xff] }
 0x177   :  { %2176 = vmatpush.msra.mxu3 %v529_v44  ;;  %2198 = vmatpush.msrb.mxu2 %v697_v47  ;;  %v1069_v7 = vld [vmem:[#allocation5 + $0x1ee8] sm:$0xff]  ;;  %v746_v52 = vld [vmem:[#allocation5 + $0x14d0] sm:$0xff] }
 0x178   :  { %2211 = vmatpush.msrb.mxu1 %v973_v48  ;;  %v505_v56 = vld [vmem:[#allocation5 + $0xd48] sm:$0xff]  ;;  %2238 = vmatpush.msrb.mxu0 %v1081_v49  ;;  %v626_v41 = vld [vmem:[#allocation5 + $0x1110] sm:$0xff] }
 0x179   :  { %2177 = vmatpush.msra.mxu3 %v517_v46  ;;  %v673_v58 = vld [vmem:[#allocation5 + $0x1288] sm:$0xff]  ;;  %2199 = vmatpush.msrb.mxu2 %v685_v50  ;;  %v734_v42 = vld [vmem:[#allocation5 + $0x1470] sm:$0xff] }
 0x17a   :  { %v949_v59 = vld [vmem:[#allocation5 + $0x1b28] sm:$0xff]  ;;  %2212 = vmatpush.msrb.mxu1 %v961_v53  ;;  %2239 = vmatpush.msrb.mxu0 %v1069_v7  ;;  %v146_v44 = vld [vmem:[#allocation5 + $0x210] sm:$0xff] }
 0x17b   :  { %v1057_v60 = vld [vmem:[#allocation5 + $0x1e88] sm:$0xff]  ;;  %2178 = vmatpush.msra.mxu3 %v505_v56  ;;  %2200 = vmatpush.msrb.mxu2 %v673_v58  ;;  %v722_v47 = vld [vmem:[#allocation5 + $0x1410] sm:$0xff] }
 0x17c   :  { %v493_v61 = vld [vmem:[#allocation5 + $0xce8] sm:$0xff]  ;;  %2213 = vmatpush.msrb.mxu1 %v949_v59  ;;  %2240 = vmatpush.msrb.mxu0 %v1057_v60  ;;  %v134_v48 = vld [vmem:[#allocation5 + $0x1b0] sm:$0xff] }
 0x17d   :  { %v661_v62 = vld [vmem:[#allocation5 + $0x1228] sm:$0xff]  ;;  %2179 = vmatpush.msra.mxu3 %v493_v61  ;;  %2162 = vmatmul.f32.vlgmr.msra.gmra.mxu0 %v3890_v54  ;;  %v446_v49 = vld [vmem:[#allocation5 + $0xb70] sm:$0xff] }
 0x17e   :  { %v937_v63 = vld [vmem:[#allocation5 + $0x1ac8] sm:$0xff]  ;;  %2201 = vmatpush.msrb.mxu2 %v661_v62  ;;  %2142 = vmatmul.f32.vlgmr.msra.gmra.mxu1 %v3879_v23  ;;  %v458_v23 = vld [vmem:[#allocation5 + $0xbd0] sm:$0xff] }
 0x17f   :  { %v1045_v0 = vld [vmem:[#allocation5 + $0x1e28] sm:$0xff]  ;;  %2214 = vmatpush.msrb.mxu1 %v937_v63  ;;  %2202 = vmatmul.f32.vlgmr.msrb.gmra.mxu2 %v3882_v25  ;;  %v614_v25 = vld [vmem:[#allocation5 + $0x10b0] sm:$0xff] }
 0x180   :  { %v481_v1 = vld [vmem:[#allocation5 + $0xc88] sm:$0xff]  ;;  %2241 = vmatpush.msrb.mxu0 %v1045_v0  ;;  %2266 = vmatpush.msra.mxu2 %v266_v3  ;;  %v602_v46 = vld [vmem:[#allocation5 + $0x1050] sm:$0xff] }
 0x181   :  { %v925_v5 = vld [vmem:[#allocation5 + $0x1a68] sm:$0xff]  ;;  %2180 = vmatpush.msra.mxu3 %v481_v1  ;;  %v710_v50 = vld [vmem:[#allocation5 + $0x13b0] sm:$0xff] }
 0x182   :  { %v469_v6 = vld [vmem:[#allocation5 + $0xc28] sm:$0xff]  ;;  %2326 = vmatpush.msra.mxu0 %v842_v4  ;;  %2215 = vmatpush.msrb.mxu1 %v925_v5  ;;  %v122_v53 = vld [vmem:[#allocation5 + $0x150] sm:$0xff] }
 0x183   :  { %v913_v10 = vld [vmem:[#allocation5 + $0x1a08] sm:$0xff]  ;;  %2181 = vmatpush.msra.mxu3 %v469_v6  ;;  %2267 = vmatpush.msra.mxu2 %v254_v8  ;;  %v434_v7 = vld [vmem:[#allocation5 + $0xb10] sm:$0xff]  ;;  %v267_v6 = vld [vmem:[#allocation5 + $0x5d8] sm:$0xff] }
 0x184   :  { %v1333_v11 = vld [vmem:[#allocation5 + $0x2728] sm:$0xf]  ;;  %2327 = vmatpush.msra.mxu0 %v830_v9  ;;  %2216 = vmatpush.msrb.mxu1 %v913_v10  ;;  %v590_v56 = vld [vmem:[#allocation5 + $0xff0] sm:$0xff] }
 0x185   :  { %v901_v16 = vld [vmem:[#allocation5 + $0x19a8] sm:$0xff]  ;;  %3612 = vmatpush.msk.msrb.mxu3 %vm1389_vm0, %v1333_v11  ;;  %2268 = vmatpush.msra.mxu2 %v242_v14  ;;  %v698_v58 = vld [vmem:[#allocation5 + $0x1350] sm:$0xff]  ;;  %v255_v11 = vld [vmem:[#allocation5 + $0x578] sm:$0xff] }
 0x186   :  { %v1321_v38 = vld [vmem:[#allocation5 + $0x26c8] sm:$0xff]  ;;  %2328 = vmatpush.msra.mxu0 %v818_v15  ;;  %2217 = vmatpush.msrb.mxu1 %v901_v16  ;;  %v110_v59 = vld [vmem:[#allocation5 + $0xf0] sm:$0xff] }
 0x187   :  { %v889_v54 = vld [vmem:[#allocation5 + $0x1948] sm:$0xff]  ;;  %2254 = vmatpush.msrb.mxu3 %v1321_v38  ;;  %2269 = vmatpush.msra.mxu2 %v230_v17  ;;  %v578_v60 = vld [vmem:[#allocation5 + $0xf90] sm:$0xff]  ;;  %v243_v38 = vld [vmem:[#allocation5 + $0x518] sm:$0xff] }
 0x188   :  { %v1309_v20 = vld [vmem:[#allocation5 + $0x2668] sm:$0xff]  ;;  %2329 = vmatpush.msra.mxu0 %v806_v19  ;;  %2218 = vmatpush.msrb.mxu1 %v889_v54  ;;  %v686_v61 = vld [vmem:[#allocation5 + $0x12f0] sm:$0xff] }
 0x189   :  { %v877_v12 = vld [vmem:[#allocation5 + $0x18e8] sm:$0xff]  ;;  %2255 = vmatpush.msrb.mxu3 %v1309_v20  ;;  %2270 = vmatpush.msra.mxu2 %v218_v21  ;;  %v98_v62 = vld [vmem:[#allocation5 + $0x90] sm:$0xff]  ;;  %v231_v20 = vld [vmem:[#allocation5 + $0x4b8] sm:$0xff] }
 0x18a   :  { %v1297_v24 = vld [vmem:[#allocation5 + $0x2608] sm:$0xff]  ;;  %2330 = vmatpush.msra.mxu0 %v794_v22  ;;  %2219 = vmatpush.msrb.mxu1 %v877_v12  ;;  %v566_v63 = vld [vmem:[#allocation5 + $0xf30] sm:$0xff] }
 0x18b   :  { %v865_v27 = vld [vmem:[#allocation5 + $0x1888] sm:$0xff]  ;;  %2256 = vmatpush.msrb.mxu3 %v1297_v24  ;;  %2271 = vmatpush.msra.mxu2 %v206_v2  ;;  %v674_v0 = vld [vmem:[#allocation5 + $0x1290] sm:$0xff]  ;;  %v219_v24 = vld [vmem:[#allocation5 + $0x458] sm:$0xff] }
 0x18c   :  { %v1285_v28 = vld [vmem:[#allocation5 + $0x25a8] sm:$0xff]  ;;  %2331 = vmatpush.msra.mxu0 %v782_v26  ;;  %2220 = vmatpush.msrb.mxu1 %v865_v27  ;;  %v86_v1 = vld [vmem:[#allocation5 + $0x30] sm:$0xff] }
 0x18d   :  { %v853_v30 = vld [vmem:[#allocation5 + $0x1828] sm:$0xff]  ;;  %2257 = vmatpush.msrb.mxu3 %v1285_v28  ;;  %2272 = vmatpush.msra.mxu2 %v194_v57  ;;  %v398_v3 = vld [vmem:[#allocation5 + $0x9f0] sm:$0xff]  ;;  %v207_v28 = vld [vmem:[#allocation5 + $0x3f8] sm:$0xff] }
 0x18e   :  { %v1273_v31 = vld [vmem:[#allocation5 + $0x2548] sm:$0xff]  ;;  %2182 = vmatmul.f32.vlgmr.msra.gmra.mxu3 %v3887_v40  ;;  %2332 = vmatpush.msra.mxu0 %v770_v29  ;;  %v158_v40 = vld [vmem:[#allocation5 + $0x270] sm:$0xff] }
 0x18f   :  { %2221 = vmatpush.msrb.mxu1 %v853_v30  ;;  %2258 = vmatpush.msrb.mxu3 %v1273_v31  ;;  %v1261_v35 = vld [vmem:[#allocation5 + $0x24e8] sm:$0xff]  ;;  %v554_v4 = vld [vmem:[#allocation5 + $0xed0] sm:$0xff]  ;;  %v195_v31 = vld [vmem:[#allocation5 + $0x398] sm:$0xff] }
 0x190   :  { %2273 = vmatpush.msra.mxu2 %v182_v32  ;;  %v1249_v37 = vld [vmem:[#allocation5 + $0x2488] sm:$0xff]  ;;  %2333 = vmatpush.msra.mxu0 %v758_v34  ;;  %v1034_v5 = vld [vmem:[#allocation5 + $0x1dd0] sm:$0xff] }
 0x191   :  { %2306 = vmatpush.msra.mxu1 %v650_v33  ;;  %2259 = vmatpush.msrb.mxu3 %v1261_v35  ;;  %v1237_v43 = vld [vmem:[#allocation5 + $0x2428] sm:$0xff]  ;;  %v386_v8 = vld [vmem:[#allocation5 + $0x990] sm:$0xff] }
 0x192   :  { %2274 = vmatpush.msra.mxu2 %v170_v36  ;;  %2334 = vmatpush.msra.mxu0 %v746_v52  ;;  %v542_v9 = vld [vmem:[#allocation5 + $0xe70] sm:$0xff]  ;;  %v183_v36 = vld [vmem:[#allocation5 + $0x338] sm:$0xff] }
 0x193   :  { %2307 = vmatpush.msra.mxu1 %v638_v51  ;;  %2260 = vmatpush.msrb.mxu3 %v1249_v37  ;;  %v1022_v10 = vld [vmem:[#allocation5 + $0x1d70] sm:$0xff] }
 0x194   :  { %2275 = vmatpush.msra.mxu2 %v158_v40  ;;  %2335 = vmatpush.msra.mxu0 %v734_v42  ;;  %v374_v14 = vld [vmem:[#allocation5 + $0x930] sm:$0xff]  ;;  %v171_v40 = vld [vmem:[#allocation5 + $0x2d8] sm:$0xff] }
 0x195   :  { %2308 = vmatpush.msra.mxu1 %v626_v41  ;;  %2261 = vmatpush.msrb.mxu3 %v1237_v43  ;;  %v530_v15 = vld [vmem:[#allocation5 + $0xe10] sm:$0xff] }
 0x196   :  { %3613 = vmatmul.msk.f32.vlgmr.msrb.gmra.mxu3 %vm1386_vm1, %v3896_v13  ;;  %2276 = vmatpush.msra.mxu2 %v146_v44  ;;  %v422_v13 = vld [vmem:[#allocation5 + $0xab0] sm:$0xff]  ;;  %v159_v44 = vld [vmem:[#allocation5 + $0x278] sm:$0xff] }
 0x197   :  { %2286 = vmatpush.msra.mxu3 %v458_v23  ;;  %2309 = vmatpush.msra.mxu1 %v614_v25  ;;  %v1010_v16 = vld [vmem:[#allocation5 + $0x1d10] sm:$0xff] }
 0x198   :  { %2336 = vmatpush.msra.mxu0 %v722_v47  ;;  %2222 = vmatmul.f32.vlgmr.msrb.gmra.mxu1 %v3893_v55  ;;  %v410_v55 = vld [vmem:[#allocation5 + $0xa50] sm:$0xff] }
 0x199   :  { %2277 = vmatpush.msra.mxu2 %v134_v48  ;;  %2287 = vmatpush.msra.mxu3 %v446_v49  ;;  %v362_v17 = vld [vmem:[#allocation5 + $0x8d0] sm:$0xff]  ;;  %v147_v49 = vld [vmem:[#allocation5 + $0x218] sm:$0xff] }
 0x19a   :  { %2310 = vmatpush.msra.mxu1 %v602_v46  ;;  %2337 = vmatpush.msra.mxu0 %v710_v50  ;;  %v518_v19 = vld [vmem:[#allocation5 + $0xdb0] sm:$0xff] }
 0x19b   :  { %2242 = vmatmul.f32.vlgmr.msrb.gmra.mxu0 %v3900_v18  ;;  %2278 = vmatpush.msra.mxu2 %v122_v53  ;;  %v662_v18 = vld [vmem:[#allocation5 + $0x1230] sm:$0xff] }
 0x19c   :  { %2288 = vmatpush.msra.mxu3 %v434_v7  ;;  %2311 = vmatpush.msra.mxu1 %v590_v56  ;;  %v998_v54 = vld [vmem:[#allocation5 + $0x1cb0] sm:$0xff]  ;;  %v135_v7 = vld [vmem:[#allocation5 + $0x1b8] sm:$0xff] }
 0x19d   :  { %2338 = vmatpush.msra.mxu0 %v698_v58  ;;  %2279 = vmatpush.msra.mxu2 %v110_v59  ;;  %v350_v21 = vld [vmem:[#allocation5 + $0x870] sm:$0xff] }
 0x19e   :  { %2289 = vmatpush.msra.mxu3 %v422_v13  ;;  %2312 = vmatpush.msra.mxu1 %v578_v60  ;;  %v506_v22 = vld [vmem:[#allocation5 + $0xd50] sm:$0xff]  ;;  %v123_v13 = vld [vmem:[#allocation5 + $0x158] sm:$0xff] }
 0x19f   :  { %2339 = vmatpush.msra.mxu0 %v686_v61  ;;  %2280 = vmatpush.msra.mxu2 %v98_v62  ;;  %v986_v12 = vld [vmem:[#allocation5 + $0x1c50] sm:$0xff] }
 0x1a0   :  { %2290 = vmatpush.msra.mxu3 %v410_v55  ;;  %2313 = vmatpush.msra.mxu1 %v566_v63  ;;  %v338_v2 = vld [vmem:[#allocation5 + $0x810] sm:$0xff]  ;;  %v111_v55 = vld [vmem:[#allocation5 + $0xf8] sm:$0xff] }
 0x1a1   :  { %2340 = vmatpush.msra.mxu0 %v674_v0  ;;  %2281 = vmatpush.msra.mxu2 %v86_v1  ;;  %v494_v26 = vld [vmem:[#allocation5 + $0xcf0] sm:$0xff] }
 0x1a2   :  { %2291 = vmatpush.msra.mxu3 %v398_v3  ;;  %2314 = vmatpush.msra.mxu1 %v554_v4  ;;  %v974_v27 = vld [vmem:[#allocation5 + $0x1bf0] sm:$0xff]  ;;  %v99_v3 = vld [vmem:[#allocation5 + $0x98] sm:$0xff] }
 0x1a3   :  { %2341 = vmatpush.msra.mxu0 %v662_v18  ;;  %2346 = vmatpush.msrb.mxu2 %v1034_v5  ;;  %v326_v57 = vld [vmem:[#allocation5 + $0x7b0] sm:$0xff] }
 0x1a4   :  { %2292 = vmatpush.msra.mxu3 %v386_v8  ;;  %2315 = vmatpush.msra.mxu1 %v542_v9  ;;  %v482_v29 = vld [vmem:[#allocation5 + $0xc90] sm:$0xff]  ;;  %v459_v8 = vld [vmem:[#allocation5 + $0xbd8] sm:$0xff] }
 0x1a5   :  { %2406 = vmatpush.msrb.mxu0 %v267_v6  ;;  %2347 = vmatpush.msrb.mxu2 %v1022_v10  ;;  %v962_v30 = vld [vmem:[#allocation5 + $0x1b90] sm:$0xff]  ;;  %v87_v6 = vld [vmem:[#allocation5 + $0x38] sm:$0xff] }
 0x1a6   :  { %2293 = vmatpush.msra.mxu3 %v374_v14  ;;  %2316 = vmatpush.msra.mxu1 %v530_v15  ;;  %v314_v32 = vld [vmem:[#allocation5 + $0x750] sm:$0xff]  ;;  %v651_v9 = vld [vmem:[#allocation5 + $0x11d8] sm:$0xff] }
 0x1a7   :  { %2407 = vmatpush.msrb.mxu0 %v255_v11  ;;  %2348 = vmatpush.msrb.mxu2 %v1010_v16  ;;  %v470_v33 = vld [vmem:[#allocation5 + $0xc30] sm:$0xff]  ;;  %v1035_v11 = vld [vmem:[#allocation5 + $0x1dd8] sm:$0xff]  ;;  %v3930_v16 = vld.sshfl [vmem:[#allocation1 + $0x18] sm:$0xff pattern:$0x73625140] }
 0x1a8   :  { %2294 = vmatpush.msra.mxu3 %v362_v17  ;;  %2317 = vmatpush.msra.mxu1 %v518_v19  ;;  %v950_v34 = vld [vmem:[#allocation5 + $0x1b30] sm:$0xff]  ;;  %v3927_v15 = vld.sshfl [vmem:[#allocation1 + $0x10] sm:$0xff pattern:$0x73625140] }
 0x1a9   :  { %2408 = vmatpush.msrb.mxu0 %v243_v38  ;;  %2349 = vmatpush.msrb.mxu2 %v998_v54  ;;  %v1334_v35 = vld [vmem:[#allocation5 + $0x2730] sm:$0xf]  ;;  %v447_v38 = vld [vmem:[#allocation5 + $0xb78] sm:$0xff] }
 0x1aa   :  { %2295 = vmatpush.msra.mxu3 %v350_v21  ;;  %2318 = vmatpush.msra.mxu1 %v506_v22  ;;  %v302_v51 = vld [vmem:[#allocation5 + $0x6f0] sm:$0xff]  ;;  %v639_v17 = vld [vmem:[#allocation5 + $0x1178] sm:$0xff] }
 0x1ab   :  { %2409 = vmatpush.msrb.mxu0 %v231_v20  ;;  %2350 = vmatpush.msrb.mxu2 %v986_v12  ;;  %v938_v52 = vld [vmem:[#allocation5 + $0x1ad0] sm:$0xff]  ;;  %v1023_v19 = vld [vmem:[#allocation5 + $0x1d78] sm:$0xff] }
 0x1ac   :  { %2296 = vmatpush.msra.mxu3 %v338_v2  ;;  %2319 = vmatpush.msra.mxu1 %v494_v26  ;;  %v1322_v37 = vld [vmem:[#allocation5 + $0x26d0] sm:$0xff]  ;;  %v435_v20 = vld [vmem:[#allocation5 + $0xb18] sm:$0xff] }
 0x1ad   :  { %2410 = vmatpush.msrb.mxu0 %v219_v24  ;;  %2351 = vmatpush.msrb.mxu2 %v974_v27  ;;  %v290_v41 = vld [vmem:[#allocation5 + $0x690] sm:$0xff]  ;;  %v627_v21 = vld [vmem:[#allocation5 + $0x1118] sm:$0xff] }
 0x1ae   :  { %2297 = vmatpush.msra.mxu3 %v326_v57  ;;  %2320 = vmatpush.msra.mxu1 %v482_v29  ;;  %v926_v42 = vld [vmem:[#allocation5 + $0x1a70] sm:$0xff]  ;;  %v1011_v22 = vld [vmem:[#allocation5 + $0x1d18] sm:$0xff] }
 0x1af   :  { %2411 = vmatpush.msrb.mxu0 %v207_v28  ;;  %2352 = vmatpush.msrb.mxu2 %v962_v30  ;;  %v1310_v43 = vld [vmem:[#allocation5 + $0x2670] sm:$0xff]  ;;  %v423_v24 = vld [vmem:[#allocation5 + $0xab8] sm:$0xff] }
 0x1b0   :  { %2298 = vmatpush.msra.mxu3 %v314_v32  ;;  %2321 = vmatpush.msra.mxu1 %v470_v33  ;;  %v278_v23 = vld [vmem:[#allocation5 + $0x630] sm:$0xff]  ;;  %v615_v2 = vld [vmem:[#allocation5 + $0x10b8] sm:$0xff] }
 0x1b1   :  { %2412 = vmatpush.msrb.mxu0 %v195_v31  ;;  %2353 = vmatpush.msrb.mxu2 %v950_v34  ;;  %v914_v25 = vld [vmem:[#allocation5 + $0x1a10] sm:$0xff]  ;;  %v999_v26 = vld [vmem:[#allocation5 + $0x1cb8] sm:$0xff] }
 0x1b2   :  { %3614 = vmatpush.msk.msrb.mxu1 %vm1389_vm0, %v1334_v35  ;;  %2299 = vmatpush.msra.mxu3 %v302_v51  ;;  %v1226_v47 = vld [vmem:[#allocation5 + $0x23d0] sm:$0xff]  ;;  %v411_v28 = vld [vmem:[#allocation5 + $0xa58] sm:$0xff] }
 0x1b3   :  { %2413 = vmatpush.msrb.mxu0 %v183_v36  ;;  %2354 = vmatpush.msrb.mxu2 %v938_v52  ;;  %v1298_v48 = vld [vmem:[#allocation5 + $0x2610] sm:$0xff]  ;;  %v603_v29 = vld [vmem:[#allocation5 + $0x1058] sm:$0xff] }
 0x1b4   :  { %2394 = vmatpush.msrb.mxu1 %v1322_v37  ;;  %2300 = vmatpush.msra.mxu3 %v290_v41  ;;  %v902_v46 = vld [vmem:[#allocation5 + $0x19b0] sm:$0xff]  ;;  %v987_v30 = vld [vmem:[#allocation5 + $0x1c58] sm:$0xff] }
 0x1b5   :  { %2414 = vmatpush.msrb.mxu0 %v171_v40  ;;  %2355 = vmatpush.msrb.mxu2 %v926_v42  ;;  %v1214_v50 = vld [vmem:[#allocation5 + $0x2370] sm:$0xff]  ;;  %v399_v32 = vld [vmem:[#allocation5 + $0x9f8] sm:$0xff] }
 0x1b6   :  { %2395 = vmatpush.msrb.mxu1 %v1310_v43  ;;  %2301 = vmatpush.msra.mxu3 %v278_v23  ;;  %v1286_v53 = vld [vmem:[#allocation5 + $0x25b0] sm:$0xff]  ;;  %v591_v33 = vld [vmem:[#allocation5 + $0xff8] sm:$0xff] }
 0x1b7   :  { %2415 = vmatpush.msrb.mxu0 %v159_v44  ;;  %2356 = vmatpush.msrb.mxu2 %v914_v25  ;;  %v890_v56 = vld [vmem:[#allocation5 + $0x1950] sm:$0xff]  ;;  %v975_v34 = vld [vmem:[#allocation5 + $0x1bf8] sm:$0xff] }
 0x1b8   :  { %2366 = vmatpush.msrb.mxu3 %v1226_v47  ;;  %2396 = vmatpush.msrb.mxu1 %v1298_v48  ;;  %v1202_v58 = vld [vmem:[#allocation5 + $0x2310] sm:$0xff]  ;;  %v387_v36 = vld [vmem:[#allocation5 + $0x998] sm:$0xff] }
 0x1b9   :  { %2416 = vmatpush.msrb.mxu0 %v147_v49  ;;  %2357 = vmatpush.msrb.mxu2 %v902_v46  ;;  %v1274_v59 = vld [vmem:[#allocation5 + $0x2550] sm:$0xff]  ;;  %v579_v51 = vld [vmem:[#allocation5 + $0xf98] sm:$0xff] }
 0x1ba   :  { %2367 = vmatpush.msrb.mxu3 %v1214_v50  ;;  %2397 = vmatpush.msrb.mxu1 %v1286_v53  ;;  %v878_v60 = vld [vmem:[#allocation5 + $0x18f0] sm:$0xff]  ;;  %v963_v52 = vld [vmem:[#allocation5 + $0x1b98] sm:$0xff] }
 0x1bb   :  { %2417 = vmatpush.msrb.mxu0 %v135_v7  ;;  %2358 = vmatpush.msrb.mxu2 %v890_v56  ;;  %v1190_v61 = vld [vmem:[#allocation5 + $0x22b0] sm:$0xff]  ;;  %v375_v41 = vld [vmem:[#allocation5 + $0x938] sm:$0xff] }
 0x1bc   :  { %v1262_v62 = vld [vmem:[#allocation5 + $0x24f0] sm:$0xff]  ;;  %2368 = vmatpush.msrb.mxu3 %v1202_v58  ;;  %2398 = vmatpush.msrb.mxu1 %v1274_v59  ;;  %v567_v42 = vld [vmem:[#allocation5 + $0xf38] sm:$0xff] }
 0x1bd   :  { %v866_v63 = vld [vmem:[#allocation5 + $0x1890] sm:$0xff]  ;;  %2418 = vmatpush.msrb.mxu0 %v123_v13  ;;  %2359 = vmatpush.msrb.mxu2 %v878_v60  ;;  %v951_v43 = vld [vmem:[#allocation5 + $0x1b38] sm:$0xff] }
 0x1be   :  { %v1178_v0 = vld [vmem:[#allocation5 + $0x2250] sm:$0xff]  ;;  %2369 = vmatpush.msrb.mxu3 %v1190_v61  ;;  %2399 = vmatpush.msrb.mxu1 %v1262_v62  ;;  %v363_v23 = vld [vmem:[#allocation5 + $0x8d8] sm:$0xff] }
 0x1bf   :  { %v1250_v1 = vld [vmem:[#allocation5 + $0x2490] sm:$0xff]  ;;  %2419 = vmatpush.msrb.mxu0 %v111_v55  ;;  %2360 = vmatpush.msrb.mxu2 %v866_v63  ;;  %v555_v25 = vld [vmem:[#allocation5 + $0xed8] sm:$0xff] }
 0x1c0   :  { %v854_v4 = vld [vmem:[#allocation5 + $0x1830] sm:$0xff]  ;;  %2370 = vmatpush.msrb.mxu3 %v1178_v0  ;;  %2400 = vmatpush.msrb.mxu1 %v1250_v1  ;;  %v939_v47 = vld [vmem:[#allocation5 + $0x1ad8] sm:$0xff] }
 0x1c1   :  { %v1166_v18 = vld [vmem:[#allocation5 + $0x21f0] sm:$0xff]  ;;  %2420 = vmatpush.msrb.mxu0 %v99_v3  ;;  %2361 = vmatpush.msrb.mxu2 %v854_v4  ;;  %v351_v49 = vld [vmem:[#allocation5 + $0x878] sm:$0xff] }
 0x1c2   :  { %v1238_v5 = vld [vmem:[#allocation5 + $0x2430] sm:$0xff]  ;;  %2371 = vmatpush.msrb.mxu3 %v1166_v18  ;;  %2322 = vmatmul.f32.vlgmr.msra.gmra.mxu1 %v3927_v15  ;;  %v543_v46 = vld [vmem:[#allocation5 + $0xe78] sm:$0xff] }
 0x1c3   :  { %2401 = vmatpush.msrb.mxu1 %v1238_v5  ;;  %2421 = vmatpush.msrb.mxu0 %v87_v6  ;;  %v3924_v10 = vld.sshfl [vmem:[#allocation1] sm:$0xff pattern:$0x73625140]  ;;  %v3933_v57 = vld.sshfl [vmem:[#allocation1 + $0x8] sm:$0xff pattern:$0x73625140] }
 0x1c4   :  { %2282 = vmatmul.f32.vlgmr.msra.gmra.mxu2 %v3924_v10  ;;  %v1154_v14 = vld [vmem:[#allocation5 + $0x2190] sm:$0xff]  ;;  %2342 = vmatmul.f32.vlgmr.msra.gmra.mxu0 %v3930_v16  ;;  %v927_v50 = vld [vmem:[#allocation5 + $0x1a78] sm:$0xff] }
 0x1c5   :  { %2426 = vmatpush.msra.mxu1 %v459_v8  ;;  %2446 = vmatpush.msra.mxu2 %v651_v9  ;;  %v1142_v54 = vld [vmem:[#allocation5 + $0x2130] sm:$0xff]  ;;  %v339_v7 = vld [vmem:[#allocation5 + $0x818] sm:$0xff] }
 0x1c6   :  { %2486 = vmatpush.msra.mxu0 %v1035_v11  ;;  %2372 = vmatpush.msrb.mxu3 %v1154_v14  ;;  %v1130_v12 = vld [vmem:[#allocation5 + $0x20d0] sm:$0xff]  ;;  %v531_v56 = vld [vmem:[#allocation5 + $0xe18] sm:$0xff] }
 0x1c7   :  { %2427 = vmatpush.msra.mxu1 %v447_v38  ;;  %2447 = vmatpush.msra.mxu2 %v639_v17  ;;  %v1118_v27 = vld [vmem:[#allocation5 + $0x2070] sm:$0xff]  ;;  %v843_v58 = vld [vmem:[#allocation5 + $0x17d8] sm:$0xff] }
 0x1c8   :  { %2487 = vmatpush.msra.mxu0 %v1023_v19  ;;  %2373 = vmatpush.msrb.mxu3 %v1142_v54  ;;  %v1106_v31 = vld [vmem:[#allocation5 + $0x2010] sm:$0xff]  ;;  %v915_v59 = vld [vmem:[#allocation5 + $0x1a18] sm:$0xff] }
 0x1c9   :  { %2428 = vmatpush.msra.mxu1 %v435_v20  ;;  %2448 = vmatpush.msra.mxu2 %v627_v21  ;;  %v1094_v35 = vld [vmem:[#allocation5 + $0x1fb0] sm:$0xff]  ;;  %v327_v13 = vld [vmem:[#allocation5 + $0x7b8] sm:$0xff] }
 0x1ca   :  { %2488 = vmatpush.msra.mxu0 %v1011_v22  ;;  %2374 = vmatpush.msrb.mxu3 %v1130_v12  ;;  %v1082_v37 = vld [vmem:[#allocation5 + $0x1f50] sm:$0xff]  ;;  %v519_v61 = vld [vmem:[#allocation5 + $0xdb8] sm:$0xff]  ;;  %v460_v12 = vld [vmem:[#allocation5 + $0xbe0] sm:$0xff] }
 0x1cb   :  { %2302 = vmatmul.f32.vlgmr.msra.gmra.mxu3 %v3933_v57  ;;  %2429 = vmatpush.msra.mxu1 %v423_v24  ;;  %v3936_v40 = vld.sshfl [vmem:[#allocation1 + $0x20] sm:$0xff pattern:$0x73625140]  ;;  %v3939_v60 = vld.sshfl [vmem:[#allocation1 + $0x28] sm:$0xff pattern:$0x73625140] }
 0x1cc   :  { %2449 = vmatpush.msra.mxu2 %v615_v2  ;;  %2489 = vmatpush.msra.mxu0 %v999_v26  ;;  %v1070_v44 = vld [vmem:[#allocation5 + $0x1ef0] sm:$0xff]  ;;  %v831_v62 = vld [vmem:[#allocation5 + $0x1778] sm:$0xff] }
 0x1cd   :  { %2375 = vmatpush.msrb.mxu3 %v1118_v27  ;;  %2430 = vmatpush.msra.mxu1 %v411_v28  ;;  %v1058_v48 = vld [vmem:[#allocation5 + $0x1e90] sm:$0xff]  ;;  %v903_v55 = vld [vmem:[#allocation5 + $0x19b8] sm:$0xff]  ;;  %v448_v27 = vld [vmem:[#allocation5 + $0xb80] sm:$0xff] }
 0x1ce   :  { %2450 = vmatpush.msra.mxu2 %v603_v29  ;;  %2490 = vmatpush.msra.mxu0 %v987_v30  ;;  %v1046_v53 = vld [vmem:[#allocation5 + $0x1e30] sm:$0xff]  ;;  %v315_v63 = vld [vmem:[#allocation5 + $0x758] sm:$0xff] }
 0x1cf   :  { %2376 = vmatpush.msrb.mxu3 %v1106_v31  ;;  %2431 = vmatpush.msra.mxu1 %v399_v32  ;;  %v507_v0 = vld [vmem:[#allocation5 + $0xd58] sm:$0xff]  ;;  %v436_v31 = vld [vmem:[#allocation5 + $0xb20] sm:$0xff] }
 0x1d0   :  { %2451 = vmatpush.msra.mxu2 %v591_v33  ;;  %2491 = vmatpush.msra.mxu0 %v975_v34  ;;  %v819_v1 = vld [vmem:[#allocation5 + $0x1718] sm:$0xff] }
 0x1d1   :  { %2377 = vmatpush.msrb.mxu3 %v1094_v35  ;;  %2362 = vmatmul.f32.vlgmr.msrb.gmra.mxu2 %v3936_v40  ;;  %v891_v3 = vld [vmem:[#allocation5 + $0x1958] sm:$0xff]  ;;  %v424_v35 = vld [vmem:[#allocation5 + $0xac0] sm:$0xff] }
 0x1d2   :  { %2432 = vmatpush.msra.mxu1 %v387_v36  ;;  %2452 = vmatpush.msra.mxu2 %v579_v51  ;;  %v303_v4 = vld [vmem:[#allocation5 + $0x6f8] sm:$0xff] }
 0x1d3   :  { %2492 = vmatpush.msra.mxu0 %v963_v52  ;;  %2378 = vmatpush.msrb.mxu3 %v1082_v37  ;;  %v495_v18 = vld [vmem:[#allocation5 + $0xcf8] sm:$0xff]  ;;  %v412_v37 = vld [vmem:[#allocation5 + $0xa60] sm:$0xff] }
 0x1d4   :  { %2433 = vmatpush.msra.mxu1 %v375_v41  ;;  %2453 = vmatpush.msra.mxu2 %v567_v42  ;;  %v807_v5 = vld [vmem:[#allocation5 + $0x16b8] sm:$0xff] }
 0x1d5   :  { %2493 = vmatpush.msra.mxu0 %v951_v43  ;;  %2379 = vmatpush.msrb.mxu3 %v1070_v44  ;;  %v879_v6 = vld [vmem:[#allocation5 + $0x18f8] sm:$0xff]  ;;  %v400_v44 = vld [vmem:[#allocation5 + $0xa00] sm:$0xff] }
 0x1d6   :  { %2434 = vmatpush.msra.mxu1 %v363_v23  ;;  %2454 = vmatpush.msra.mxu2 %v555_v25  ;;  %v291_v8 = vld [vmem:[#allocation5 + $0x698] sm:$0xff] }
 0x1d7   :  { %2494 = vmatpush.msra.mxu0 %v939_v47  ;;  %2380 = vmatpush.msrb.mxu3 %v1058_v48  ;;  %v483_v9 = vld [vmem:[#allocation5 + $0xc98] sm:$0xff]  ;;  %v388_v48 = vld [vmem:[#allocation5 + $0x9a0] sm:$0xff] }
 0x1d8   :  { %2435 = vmatpush.msra.mxu1 %v351_v49  ;;  %2455 = vmatpush.msra.mxu2 %v543_v46  ;;  %v795_v11 = vld [vmem:[#allocation5 + $0x1658] sm:$0xff] }
 0x1d9   :  { %2495 = vmatpush.msra.mxu0 %v927_v50  ;;  %2381 = vmatpush.msrb.mxu3 %v1046_v53  ;;  %v867_v14 = vld [vmem:[#allocation5 + $0x1898] sm:$0xff]  ;;  %v376_v53 = vld [vmem:[#allocation5 + $0x940] sm:$0xff] }
 0x1da   :  { %2382 = vmatmul.f32.vlgmr.msrb.gmra.mxu3 %v3939_v60  ;;  %2436 = vmatpush.msra.mxu1 %v339_v7  ;;  %v3942_v38 = vld.sshfl [vmem:[#allocation1 + $0x30] sm:$0xff pattern:$0x73625140] }
 0x1db   :  { %2456 = vmatpush.msra.mxu2 %v531_v56  ;;  %2466 = vmatpush.msra.mxu3 %v843_v58  ;;  %v279_v17 = vld [vmem:[#allocation5 + $0x638] sm:$0xff] }
 0x1dc   :  { %2496 = vmatpush.msra.mxu0 %v915_v59  ;;  %2437 = vmatpush.msra.mxu1 %v327_v13  ;;  %v471_v19 = vld [vmem:[#allocation5 + $0xc38] sm:$0xff]  ;;  %v364_v59 = vld [vmem:[#allocation5 + $0x8e0] sm:$0xff] }
 0x1dd   :  { %2457 = vmatpush.msra.mxu2 %v519_v61  ;;  %2467 = vmatpush.msra.mxu3 %v831_v62  ;;  %v783_v54 = vld [vmem:[#allocation5 + $0x15f8] sm:$0xff]  ;;  %v652_v61 = vld [vmem:[#allocation5 + $0x11e0] sm:$0xff] }
 0x1de   :  { %2497 = vmatpush.msra.mxu0 %v903_v55  ;;  %2438 = vmatpush.msra.mxu1 %v315_v63  ;;  %v855_v20 = vld [vmem:[#allocation5 + $0x1838] sm:$0xff]  ;;  %v352_v55 = vld [vmem:[#allocation5 + $0x880] sm:$0xff] }
 0x1df   :  { %2458 = vmatpush.msra.mxu2 %v507_v0  ;;  %2468 = vmatpush.msra.mxu3 %v819_v1  ;;  %v1227_v21 = vld [vmem:[#allocation5 + $0x23d8] sm:$0xff]  ;;  %v640_v0 = vld [vmem:[#allocation5 + $0x1180] sm:$0xff] }
 0x1e0   :  { %2498 = vmatpush.msra.mxu0 %v891_v3  ;;  %2439 = vmatpush.msra.mxu1 %v303_v4  ;;  %v1335_v22 = vld [vmem:[#allocation5 + $0x2738] sm:$0xf]  ;;  %v268_v3 = vld [vmem:[#allocation5 + $0x5e0] sm:$0xff] }
 0x1e1   :  { %2459 = vmatpush.msra.mxu2 %v495_v18  ;;  %2469 = vmatpush.msra.mxu3 %v807_v5  ;;  %v771_v24 = vld [vmem:[#allocation5 + $0x1598] sm:$0xff]  ;;  %v340_v4 = vld [vmem:[#allocation5 + $0x820] sm:$0xff] }
 0x1e2   :  { %2499 = vmatpush.msra.mxu0 %v879_v6  ;;  %3615 = vmatmul.msk.f32.vlgmr.msrb.gmra.mxu1 %vm1386_vm1, %v3942_v38  ;;  %v1215_v2 = vld [vmem:[#allocation5 + $0x2378] sm:$0xff]  ;;  %v628_v18 = vld [vmem:[#allocation5 + $0x1120] sm:$0xff] }
 0x1e3   :  { %2440 = vmatpush.msra.mxu1 %v291_v8  ;;  %2460 = vmatpush.msra.mxu2 %v483_v9  ;;  %v1323_v26 = vld [vmem:[#allocation5 + $0x26d8] sm:$0xff]  ;;  %v256_v6 = vld [vmem:[#allocation5 + $0x580] sm:$0xff] }
 0x1e4   :  { %2470 = vmatpush.msra.mxu3 %v795_v11  ;;  %2500 = vmatpush.msra.mxu0 %v867_v14  ;;  %v759_v28 = vld [vmem:[#allocation5 + $0x1538] sm:$0xff]  ;;  %v328_v8 = vld [vmem:[#allocation5 + $0x7c0] sm:$0xff] }
 0x1e5   :  { %2441 = vmatpush.msra.mxu1 %v279_v17  ;;  %2461 = vmatpush.msra.mxu2 %v471_v19  ;;  %v1203_v29 = vld [vmem:[#allocation5 + $0x2318] sm:$0xff]  ;;  %v616_v9 = vld [vmem:[#allocation5 + $0x10c0] sm:$0xff] }
 0x1e6   :  { %2471 = vmatpush.msra.mxu3 %v783_v54  ;;  %2501 = vmatpush.msra.mxu0 %v855_v20  ;;  %v1311_v30 = vld [vmem:[#allocation5 + $0x2678] sm:$0xff]  ;;  %v244_v14 = vld [vmem:[#allocation5 + $0x520] sm:$0xff] }
 0x1e7   :  { %2422 = vmatmul.f32.vlgmr.msrb.gmra.mxu0 %v3924_v10  ;;  %2506 = vmatpush.msrb.mxu1 %v1227_v21  ;;  %v747_v32 = vld [vmem:[#allocation5 + $0x14d8] sm:$0xff]  ;;  %v316_v17 = vld [vmem:[#allocation5 + $0x760] sm:$0xff] }
 0x1e8   :  { %3616 = vmatpush.msk.msrb.mxu2 %vm1389_vm0, %v1335_v22  ;;  %2566 = vmatpush.msrb.mxu0 %v460_v12  ;;  %v1191_v33 = vld [vmem:[#allocation5 + $0x22b8] sm:$0xff]  ;;  %v604_v19 = vld [vmem:[#allocation5 + $0x1060] sm:$0xff] }
 0x1e9   :  { %2472 = vmatpush.msra.mxu3 %v771_v24  ;;  %2507 = vmatpush.msrb.mxu1 %v1215_v2  ;;  %v1299_v34 = vld [vmem:[#allocation5 + $0x2618] sm:$0xff]  ;;  %v232_v20 = vld [vmem:[#allocation5 + $0x4c0] sm:$0xff] }
 0x1ea   :  { %2534 = vmatpush.msrb.mxu2 %v1323_v26  ;;  %2567 = vmatpush.msrb.mxu0 %v448_v27  ;;  %v735_v36 = vld [vmem:[#allocation5 + $0x1478] sm:$0xff]  ;;  %v304_v21 = vld [vmem:[#allocation5 + $0x700] sm:$0xff] }
 0x1eb   :  { %2473 = vmatpush.msra.mxu3 %v759_v28  ;;  %2508 = vmatpush.msrb.mxu1 %v1203_v29  ;;  %v1179_v51 = vld [vmem:[#allocation5 + $0x2258] sm:$0xff]  ;;  %v592_v22 = vld [vmem:[#allocation5 + $0x1000] sm:$0xff] }
 0x1ec   :  { %2535 = vmatpush.msrb.mxu2 %v1311_v30  ;;  %2568 = vmatpush.msrb.mxu0 %v436_v31  ;;  %v1287_v52 = vld [vmem:[#allocation5 + $0x25b8] sm:$0xff]  ;;  %v220_v24 = vld [vmem:[#allocation5 + $0x460] sm:$0xff] }
 0x1ed   :  { %2474 = vmatpush.msra.mxu3 %v747_v32  ;;  %2509 = vmatpush.msrb.mxu1 %v1191_v33  ;;  %v723_v41 = vld [vmem:[#allocation5 + $0x1418] sm:$0xff]  ;;  %v292_v2 = vld [vmem:[#allocation5 + $0x6a0] sm:$0xff] }
 0x1ee   :  { %2536 = vmatpush.msrb.mxu2 %v1299_v34  ;;  %2569 = vmatpush.msrb.mxu0 %v424_v35  ;;  %v1167_v42 = vld [vmem:[#allocation5 + $0x21f8] sm:$0xff]  ;;  %v580_v26 = vld [vmem:[#allocation5 + $0xfa0] sm:$0xff] }
 0x1ef   :  { %2475 = vmatpush.msra.mxu3 %v735_v36  ;;  %2510 = vmatpush.msrb.mxu1 %v1179_v51  ;;  %v1275_v43 = vld [vmem:[#allocation5 + $0x2558] sm:$0xff]  ;;  %v208_v28 = vld [vmem:[#allocation5 + $0x400] sm:$0xff] }
 0x1f0   :  { %2537 = vmatpush.msrb.mxu2 %v1287_v52  ;;  %2570 = vmatpush.msrb.mxu0 %v412_v37  ;;  %v711_v23 = vld [vmem:[#allocation5 + $0x13b8] sm:$0xff]  ;;  %v280_v29 = vld [vmem:[#allocation5 + $0x640] sm:$0xff] }
 0x1f1   :  { %v1155_v25 = vld [vmem:[#allocation5 + $0x2198] sm:$0xff]  ;;  %2476 = vmatpush.msra.mxu3 %v723_v41  ;;  %2511 = vmatpush.msrb.mxu1 %v1167_v42  ;;  %v568_v30 = vld [vmem:[#allocation5 + $0xf40] sm:$0xff] }
 0x1f2   :  { %v1263_v47 = vld [vmem:[#allocation5 + $0x24f8] sm:$0xff]  ;;  %2538 = vmatpush.msrb.mxu2 %v1275_v43  ;;  %2571 = vmatpush.msrb.mxu0 %v400_v44  ;;  %v844_v31 = vld [vmem:[#allocation5 + $0x17e0] sm:$0xff] }
 0x1f3   :  { %v699_v49 = vld [vmem:[#allocation5 + $0x1358] sm:$0xff]  ;;  %2477 = vmatpush.msra.mxu3 %v711_v23  ;;  %2512 = vmatpush.msrb.mxu1 %v1155_v25  ;;  %v1228_v32 = vld [vmem:[#allocation5 + $0x23e0] sm:$0xff] }
 0x1f4   :  { %v1143_v46 = vld [vmem:[#allocation5 + $0x2138] sm:$0xff]  ;;  %2539 = vmatpush.msrb.mxu2 %v1263_v47  ;;  %2572 = vmatpush.msrb.mxu0 %v388_v48  ;;  %v196_v33 = vld [vmem:[#allocation5 + $0x3a0] sm:$0xff] }
 0x1f5   :  { %v1251_v50 = vld [vmem:[#allocation5 + $0x2498] sm:$0xff]  ;;  %2478 = vmatpush.msra.mxu3 %v699_v49  ;;  %2462 = vmatmul.f32.vlgmr.msra.gmra.mxu2 %v3927_v15  ;;  %v556_v34 = vld [vmem:[#allocation5 + $0xee0] sm:$0xff] }
 0x1f6   :  { %v687_v7 = vld [vmem:[#allocation5 + $0x12f8] sm:$0xff]  ;;  %2513 = vmatpush.msrb.mxu1 %v1143_v46  ;;  %2540 = vmatpush.msrb.mxu2 %v1251_v50  ;;  %v832_v35 = vld [vmem:[#allocation5 + $0x1780] sm:$0xff] }
 0x1f7   :  { %v1131_v56 = vld [vmem:[#allocation5 + $0x20d8] sm:$0xff]  ;;  %2573 = vmatpush.msrb.mxu0 %v376_v53  ;;  %2479 = vmatpush.msra.mxu3 %v687_v7  ;;  %v1216_v36 = vld [vmem:[#allocation5 + $0x2380] sm:$0xff] }
 0x1f8   :  { %v1239_v58 = vld [vmem:[#allocation5 + $0x2438] sm:$0xff]  ;;  %2514 = vmatpush.msrb.mxu1 %v1131_v56  ;;  %2502 = vmatmul.f32.vlgmr.msra.gmra.mxu0 %v3936_v40  ;;  %v184_v51 = vld [vmem:[#allocation5 + $0x340] sm:$0xff] }
 0x1f9   :  { %v675_v13 = vld [vmem:[#allocation5 + $0x1298] sm:$0xff]  ;;  %2541 = vmatpush.msrb.mxu2 %v1239_v58  ;;  %2574 = vmatpush.msrb.mxu0 %v364_v59  ;;  %v544_v52 = vld [vmem:[#allocation5 + $0xe80] sm:$0xff] }
 0x1fa   :  { %v1119_v62 = vld [vmem:[#allocation5 + $0x2078] sm:$0xff]  ;;  %2480 = vmatpush.msra.mxu3 %v675_v13  ;;  %2442 = vmatmul.f32.vlgmr.msra.gmra.mxu1 %v3933_v57  ;;  %v820_v37 = vld [vmem:[#allocation5 + $0x1720] sm:$0xff] }
 0x1fb   :  { %v663_v63 = vld [vmem:[#allocation5 + $0x1238] sm:$0xff]  ;;  %2586 = vmatpush.msra.mxu2 %v652_v61  ;;  %2515 = vmatpush.msrb.mxu1 %v1119_v62  ;;  %v1204_v41 = vld [vmem:[#allocation5 + $0x2320] sm:$0xff] }
 0x1fc   :  { %v1107_v1 = vld [vmem:[#allocation5 + $0x2018] sm:$0xff]  ;;  %2575 = vmatpush.msrb.mxu0 %v352_v55  ;;  %2481 = vmatpush.msra.mxu3 %v663_v63  ;;  %v172_v42 = vld [vmem:[#allocation5 + $0x2e0] sm:$0xff] }
 0x1fd   :  { %2587 = vmatpush.msra.mxu2 %v640_v0  ;;  %v1095_v5 = vld [vmem:[#allocation5 + $0x1fb8] sm:$0xff]  ;;  %2482 = vmatmul.f32.vlgmr.msra.gmra.mxu3 %v3930_v16  ;;  %v532_v43 = vld [vmem:[#allocation5 + $0xe20] sm:$0xff] }
 0x1fe   :  { %2516 = vmatpush.msrb.mxu1 %v1107_v1  ;;  %2546 = vmatpush.msrb.mxu3 %v268_v3  ;;  %v1083_v11 = vld [vmem:[#allocation5 + $0x1f58] sm:$0xff]  ;;  %v808_v44 = vld [vmem:[#allocation5 + $0x16c0] sm:$0xff] }
 0x1ff   :  { %2576 = vmatpush.msrb.mxu0 %v340_v4  ;;  %2588 = vmatpush.msra.mxu2 %v628_v18  ;;  %v1071_v54 = vld [vmem:[#allocation5 + $0x1ef8] sm:$0xff]  ;;  %v1192_v23 = vld [vmem:[#allocation5 + $0x22c0] sm:$0xff] }
 0x200   :  { %2517 = vmatpush.msrb.mxu1 %v1095_v5  ;;  %2547 = vmatpush.msrb.mxu3 %v256_v6  ;;  %v1059_v12 = vld [vmem:[#allocation5 + $0x1e98] sm:$0xff]  ;;  %v160_v25 = vld [vmem:[#allocation5 + $0x280] sm:$0xff] }
 0x201   :  { %2577 = vmatpush.msrb.mxu0 %v328_v8  ;;  %2589 = vmatpush.msra.mxu2 %v616_v9  ;;  %v1047_v27 = vld [vmem:[#allocation5 + $0x1e38] sm:$0xff]  ;;  %v520_v47 = vld [vmem:[#allocation5 + $0xdc0] sm:$0xff] }
 0x202   :  { %2518 = vmatpush.msrb.mxu1 %v1083_v11  ;;  %2548 = vmatpush.msrb.mxu3 %v244_v14  ;;  %v796_v48 = vld [vmem:[#allocation5 + $0x1660] sm:$0xff] }
 0x203   :  { %2578 = vmatpush.msrb.mxu0 %v316_v17  ;;  %2590 = vmatpush.msra.mxu2 %v604_v19  ;;  %v1180_v49 = vld [vmem:[#allocation5 + $0x2260] sm:$0xff] }
 0x204   :  { %2519 = vmatpush.msrb.mxu1 %v1071_v54  ;;  %2549 = vmatpush.msrb.mxu3 %v232_v20  ;;  %v148_v46 = vld [vmem:[#allocation5 + $0x220] sm:$0xff] }
 0x205   :  { %2579 = vmatpush.msrb.mxu0 %v304_v21  ;;  %3617 = vmatmul.msk.f32.vlgmr.msrb.gmra.mxu2 %vm1386_vm1, %v3942_v38  ;;  %v508_v50 = vld [vmem:[#allocation5 + $0xd60] sm:$0xff] }
 0x206   :  { %2591 = vmatpush.msra.mxu2 %v592_v22  ;;  %2520 = vmatpush.msrb.mxu1 %v1059_v12  ;;  %v784_v53 = vld [vmem:[#allocation5 + $0x1600] sm:$0xff] }
 0x207   :  { %2550 = vmatpush.msrb.mxu3 %v220_v24  ;;  %2580 = vmatpush.msrb.mxu0 %v292_v2  ;;  %v1168_v7 = vld [vmem:[#allocation5 + $0x2200] sm:$0xff] }
 0x208   :  { %2592 = vmatpush.msra.mxu2 %v580_v26  ;;  %2521 = vmatpush.msrb.mxu1 %v1047_v27  ;;  %v136_v56 = vld [vmem:[#allocation5 + $0x1c0] sm:$0xff] }
 0x209   :  { %2551 = vmatpush.msrb.mxu3 %v208_v28  ;;  %2581 = vmatpush.msrb.mxu0 %v280_v29  ;;  %v496_v58 = vld [vmem:[#allocation5 + $0xd00] sm:$0xff] }
 0x20a   :  { %2522 = vmatmul.f32.vlgmr.msrb.gmra.mxu1 %v3939_v60  ;;  %2593 = vmatpush.msra.mxu2 %v568_v30  ;;  %v772_v59 = vld [vmem:[#allocation5 + $0x15a0] sm:$0xff] }
 0x20b   :  { %2606 = vmatpush.msra.mxu1 %v844_v31  ;;  %2646 = vmatpush.msra.mxu0 %v1228_v32  ;;  %v1156_v13 = vld [vmem:[#allocation5 + $0x21a0] sm:$0xff] }
 0x20c   :  { %2552 = vmatpush.msrb.mxu3 %v196_v33  ;;  %2594 = vmatpush.msra.mxu2 %v556_v34  ;;  %v124_v61 = vld [vmem:[#allocation5 + $0x160] sm:$0xff] }
 0x20d   :  { %2607 = vmatpush.msra.mxu1 %v832_v35  ;;  %2647 = vmatpush.msra.mxu0 %v1216_v36  ;;  %v484_v62 = vld [vmem:[#allocation5 + $0xca0] sm:$0xff] }
 0x20e   :  { %2553 = vmatpush.msrb.mxu3 %v184_v51  ;;  %2595 = vmatpush.msra.mxu2 %v544_v52  ;;  %v760_v55 = vld [vmem:[#allocation5 + $0x1540] sm:$0xff] }
 0x20f   :  { %2608 = vmatpush.msra.mxu1 %v820_v37  ;;  %2648 = vmatpush.msra.mxu0 %v1204_v41  ;;  %v1144_v63 = vld [vmem:[#allocation5 + $0x2140] sm:$0xff]  ;;  %v269_v41 = vld [vmem:[#allocation5 + $0x5e8] sm:$0xff] }
 0x210   :  { %2554 = vmatpush.msrb.mxu3 %v172_v42  ;;  %2596 = vmatpush.msra.mxu2 %v532_v43  ;;  %v112_v0 = vld [vmem:[#allocation5 + $0x100] sm:$0xff]  ;;  %v845_v42 = vld [vmem:[#allocation5 + $0x17e8] sm:$0xff] }
 0x211   :  { %2609 = vmatpush.msra.mxu1 %v808_v44  ;;  %2649 = vmatpush.msra.mxu0 %v1192_v23  ;;  %v472_v1 = vld [vmem:[#allocation5 + $0xc40] sm:$0xff]  ;;  %v257_v23 = vld [vmem:[#allocation5 + $0x588] sm:$0xff] }
 0x212   :  { %2555 = vmatpush.msrb.mxu3 %v160_v25  ;;  %2597 = vmatpush.msra.mxu2 %v520_v47  ;;  %v748_v3 = vld [vmem:[#allocation5 + $0x14e0] sm:$0xff]  ;;  %v833_v25 = vld [vmem:[#allocation5 + $0x1788] sm:$0xff] }
 0x213   :  { %2610 = vmatpush.msra.mxu1 %v796_v48  ;;  %2650 = vmatpush.msra.mxu0 %v1180_v49  ;;  %v1132_v4 = vld [vmem:[#allocation5 + $0x20e0] sm:$0xff]  ;;  %v461_v48 = vld [vmem:[#allocation5 + $0xbe8] sm:$0xff] }
 0x214   :  { %2556 = vmatpush.msrb.mxu3 %v148_v46  ;;  %2598 = vmatpush.msra.mxu2 %v508_v50  ;;  %v100_v18 = vld [vmem:[#allocation5 + $0xa0] sm:$0xff]  ;;  %v245_v49 = vld [vmem:[#allocation5 + $0x528] sm:$0xff] }
 0x215   :  { %2611 = vmatpush.msra.mxu1 %v784_v53  ;;  %2651 = vmatpush.msra.mxu0 %v1168_v7  ;;  %v1336_v5 = vld [vmem:[#allocation5 + $0x2740] sm:$0xf]  ;;  %v821_v46 = vld [vmem:[#allocation5 + $0x1728] sm:$0xff] }
 0x216   :  { %2557 = vmatpush.msrb.mxu3 %v136_v56  ;;  %2599 = vmatpush.msra.mxu2 %v496_v58  ;;  %v736_v6 = vld [vmem:[#allocation5 + $0x1480] sm:$0xff]  ;;  %v449_v53 = vld [vmem:[#allocation5 + $0xb88] sm:$0xff] }
 0x217   :  { %2612 = vmatpush.msra.mxu1 %v772_v59  ;;  %2652 = vmatpush.msra.mxu0 %v1156_v13  ;;  %v1120_v8 = vld [vmem:[#allocation5 + $0x2080] sm:$0xff]  ;;  %v233_v7 = vld [vmem:[#allocation5 + $0x4c8] sm:$0xff] }
 0x218   :  { %2558 = vmatpush.msrb.mxu3 %v124_v61  ;;  %2600 = vmatpush.msra.mxu2 %v484_v62  ;;  %v88_v9 = vld [vmem:[#allocation5 + $0x40] sm:$0xff]  ;;  %v437_v58 = vld [vmem:[#allocation5 + $0xb28] sm:$0xff] }
 0x219   :  { %2613 = vmatpush.msra.mxu1 %v760_v55  ;;  %2653 = vmatpush.msra.mxu0 %v1144_v63  ;;  %v1324_v11 = vld [vmem:[#allocation5 + $0x26e0] sm:$0xff]  ;;  %v221_v59 = vld [vmem:[#allocation5 + $0x468] sm:$0xff] }
 0x21a   :  { %2559 = vmatpush.msrb.mxu3 %v112_v0  ;;  %2601 = vmatpush.msra.mxu2 %v472_v1  ;;  %v724_v14 = vld [vmem:[#allocation5 + $0x1420] sm:$0xff]  ;;  %v797_v13 = vld [vmem:[#allocation5 + $0x1668] sm:$0xff] }
 0x21b   :  { %2614 = vmatpush.msra.mxu1 %v748_v3  ;;  %2654 = vmatpush.msra.mxu0 %v1132_v4  ;;  %v1036_v17 = vld [vmem:[#allocation5 + $0x1de0] sm:$0xff]  ;;  %v209_v62 = vld [vmem:[#allocation5 + $0x408] sm:$0xff] }
 0x21c   :  { %2560 = vmatpush.msrb.mxu3 %v100_v18  ;;  %3618 = vmatpush.msk.msrb.mxu2 %vm1389_vm0, %v1336_v5  ;;  %v1108_v19 = vld [vmem:[#allocation5 + $0x2020] sm:$0xff]  ;;  %v785_v55 = vld [vmem:[#allocation5 + $0x1608] sm:$0xff] }
 0x21d   :  { %2615 = vmatpush.msra.mxu1 %v736_v6  ;;  %2655 = vmatpush.msra.mxu0 %v1120_v8  ;;  %v1312_v54 = vld [vmem:[#allocation5 + $0x2680] sm:$0xff]  ;;  %v197_v0 = vld [vmem:[#allocation5 + $0x3a8] sm:$0xff] }
 0x21e   :  { %2561 = vmatpush.msrb.mxu3 %v88_v9  ;;  %2674 = vmatpush.msrb.mxu2 %v1324_v11  ;;  %v712_v20 = vld [vmem:[#allocation5 + $0x13c0] sm:$0xff]  ;;  %v773_v1 = vld [vmem:[#allocation5 + $0x15a8] sm:$0xff] }
 0x21f   :  { %v1024_v21 = vld [vmem:[#allocation5 + $0x1d80] sm:$0xff]  ;;  %2616 = vmatpush.msra.mxu1 %v724_v14  ;;  %2656 = vmatpush.msra.mxu0 %v1108_v19  ;;  %v401_v4 = vld [vmem:[#allocation5 + $0xa08] sm:$0xff] }
 0x220   :  { %2626 = vmatpush.msra.mxu3 %v1036_v17  ;;  %v1096_v22 = vld [vmem:[#allocation5 + $0x1fc0] sm:$0xff]  ;;  %2675 = vmatpush.msrb.mxu2 %v1312_v54  ;;  %v185_v18 = vld [vmem:[#allocation5 + $0x348] sm:$0xff] }
 0x221   :  { %v1300_v12 = vld [vmem:[#allocation5 + $0x2620] sm:$0xff]  ;;  %2617 = vmatpush.msra.mxu1 %v712_v20  ;;  %2657 = vmatpush.msra.mxu0 %v1096_v22  ;;  %v761_v5 = vld [vmem:[#allocation5 + $0x1548] sm:$0xff] }
 0x222   :  { %v700_v24 = vld [vmem:[#allocation5 + $0x1360] sm:$0xff]  ;;  %2627 = vmatpush.msra.mxu3 %v1024_v21  ;;  %2676 = vmatpush.msrb.mxu2 %v1300_v12  ;;  %v389_v8 = vld [vmem:[#allocation5 + $0x9a8] sm:$0xff] }
 0x223   :  { %v1012_v2 = vld [vmem:[#allocation5 + $0x1d20] sm:$0xff]  ;;  %2618 = vmatpush.msra.mxu1 %v700_v24  ;;  %2582 = vmatmul.f32.vlgmr.msrb.gmra.mxu0 %v3933_v57  ;;  %v809_v57 = vld [vmem:[#allocation5 + $0x16c8] sm:$0xff] }
 0x224   :  { %v1084_v26 = vld [vmem:[#allocation5 + $0x1f60] sm:$0xff]  ;;  %2628 = vmatpush.msra.mxu3 %v1012_v2  ;;  %2602 = vmatmul.f32.vlgmr.msra.gmra.mxu2 %v3927_v15  ;;  %v425_v15 = vld [vmem:[#allocation5 + $0xac8] sm:$0xff] }
 0x225   :  { %v1288_v27 = vld [vmem:[#allocation5 + $0x25c0] sm:$0xff]  ;;  %2658 = vmatpush.msra.mxu0 %v1084_v26  ;;  %2562 = vmatmul.f32.vlgmr.msrb.gmra.mxu3 %v3924_v10  ;;  %v413_v10 = vld [vmem:[#allocation5 + $0xa68] sm:$0xff] }
 0x226   :  { %v688_v28 = vld [vmem:[#allocation5 + $0x1300] sm:$0xff]  ;;  %2677 = vmatpush.msrb.mxu2 %v1288_v27  ;;  %v173_v9 = vld [vmem:[#allocation5 + $0x2e8] sm:$0xff] }
 0x227   :  { %v1000_v29 = vld [vmem:[#allocation5 + $0x1cc0] sm:$0xff]  ;;  %2619 = vmatpush.msra.mxu1 %v688_v28  ;;  %v749_v11 = vld [vmem:[#allocation5 + $0x14e8] sm:$0xff] }
 0x228   :  { %v1072_v30 = vld [vmem:[#allocation5 + $0x1f00] sm:$0xff]  ;;  %2629 = vmatpush.msra.mxu3 %v1000_v29  ;;  %v377_v17 = vld [vmem:[#allocation5 + $0x948] sm:$0xff] }
 0x229   :  { %v1276_v31 = vld [vmem:[#allocation5 + $0x2560] sm:$0xff]  ;;  %2659 = vmatpush.msra.mxu0 %v1072_v30  ;;  %v161_v19 = vld [vmem:[#allocation5 + $0x288] sm:$0xff] }
 0x22a   :  { %v676_v32 = vld [vmem:[#allocation5 + $0x12a0] sm:$0xff]  ;;  %2678 = vmatpush.msrb.mxu2 %v1276_v31  ;;  %v737_v54 = vld [vmem:[#allocation5 + $0x1488] sm:$0xff] }
 0x22b   :  { %v988_v33 = vld [vmem:[#allocation5 + $0x1c60] sm:$0xff]  ;;  %2620 = vmatpush.msra.mxu1 %v676_v32  ;;  %v365_v21 = vld [vmem:[#allocation5 + $0x8e8] sm:$0xff] }
 0x22c   :  { %v1060_v34 = vld [vmem:[#allocation5 + $0x1ea0] sm:$0xff]  ;;  %2630 = vmatpush.msra.mxu3 %v988_v33  ;;  %v149_v22 = vld [vmem:[#allocation5 + $0x228] sm:$0xff] }
 0x22d   :  { %v1264_v35 = vld [vmem:[#allocation5 + $0x2500] sm:$0xff]  ;;  %2660 = vmatpush.msra.mxu0 %v1060_v34  ;;  %v653_v12 = vld [vmem:[#allocation5 + $0x11e8] sm:$0xff] }
 0x22e   :  { %v664_v36 = vld [vmem:[#allocation5 + $0x1240] sm:$0xff]  ;;  %2679 = vmatpush.msrb.mxu2 %v1264_v35  ;;  %v725_v24 = vld [vmem:[#allocation5 + $0x1428] sm:$0xff] }
 0x22f   :  { %v976_v51 = vld [vmem:[#allocation5 + $0x1c00] sm:$0xff]  ;;  %2621 = vmatpush.msra.mxu1 %v664_v36  ;;  %v353_v2 = vld [vmem:[#allocation5 + $0x888] sm:$0xff] }
 0x230   :  { %v1048_v52 = vld [vmem:[#allocation5 + $0x1e40] sm:$0xff]  ;;  %2631 = vmatpush.msra.mxu3 %v976_v51  ;;  %2622 = vmatmul.f32.vlgmr.msra.gmra.mxu1 %v3930_v16  ;;  %v137_v26 = vld [vmem:[#allocation5 + $0x1c8] sm:$0xff] }
 0x231   :  { %v1252_v37 = vld [vmem:[#allocation5 + $0x24a0] sm:$0xff]  ;;  %2661 = vmatpush.msra.mxu0 %v1048_v52  ;;  %2686 = vmatpush.msrb.mxu1 %v269_v41  ;;  %v641_v16 = vld [vmem:[#allocation5 + $0x1188] sm:$0xff] }
 0x232   :  { %v964_v43 = vld [vmem:[#allocation5 + $0x1ba0] sm:$0xff]  ;;  %2680 = vmatpush.msrb.mxu2 %v1252_v37  ;;  %v713_v27 = vld [vmem:[#allocation5 + $0x13c8] sm:$0xff]  ;;  %2662 = vmatmul.f32.vlgmr.msra.gmra.mxu0 %v3939_v60 }
 0x233   :  { %v1240_v44 = vld [vmem:[#allocation5 + $0x2440] sm:$0xff]  ;;  %2746 = vmatpush.msrb.mxu0 %v845_v42  ;;  %2632 = vmatpush.msra.mxu3 %v964_v43  ;;  %v341_v28 = vld [vmem:[#allocation5 + $0x828] sm:$0xff] }
 0x234   :  { %v952_v47 = vld [vmem:[#allocation5 + $0x1b40] sm:$0xff]  ;;  %2681 = vmatpush.msrb.mxu2 %v1240_v44  ;;  %2687 = vmatpush.msrb.mxu1 %v257_v23  ;;  %v125_v29 = vld [vmem:[#allocation5 + $0x168] sm:$0xff]  ;;  %v270_v23 = vld [vmem:[#allocation5 + $0x5f0] sm:$0xff] }
 0x235   :  { %2747 = vmatpush.msrb.mxu0 %v833_v25  ;;  %v940_v50 = vld [vmem:[#allocation5 + $0x1ae0] sm:$0xff]  ;;  %2633 = vmatpush.msra.mxu3 %v952_v47  ;;  %v629_v30 = vld [vmem:[#allocation5 + $0x1128] sm:$0xff] }
 0x236   :  { %2706 = vmatpush.msra.mxu2 %v461_v48  ;;  %2688 = vmatpush.msrb.mxu1 %v245_v49  ;;  %v928_v56 = vld [vmem:[#allocation5 + $0x1a80] sm:$0xff]  ;;  %v701_v31 = vld [vmem:[#allocation5 + $0x1368] sm:$0xff]  ;;  %v258_v49 = vld [vmem:[#allocation5 + $0x590] sm:$0xff] }
 0x237   :  { %2748 = vmatpush.msrb.mxu0 %v821_v46  ;;  %2634 = vmatpush.msra.mxu3 %v940_v50  ;;  %v916_v61 = vld [vmem:[#allocation5 + $0x1a20] sm:$0xff]  ;;  %v329_v32 = vld [vmem:[#allocation5 + $0x7c8] sm:$0xff] }
 0x238   :  { %2707 = vmatpush.msra.mxu2 %v449_v53  ;;  %2689 = vmatpush.msrb.mxu1 %v233_v7  ;;  %v904_v63 = vld [vmem:[#allocation5 + $0x19c0] sm:$0xff]  ;;  %v113_v33 = vld [vmem:[#allocation5 + $0x108] sm:$0xff]  ;;  %v246_v53 = vld [vmem:[#allocation5 + $0x530] sm:$0xff] }
 0x239   :  { %2749 = vmatpush.msrb.mxu0 %v809_v57  ;;  %2635 = vmatpush.msra.mxu3 %v928_v56  ;;  %v892_v3 = vld [vmem:[#allocation5 + $0x1960] sm:$0xff]  ;;  %v617_v34 = vld [vmem:[#allocation5 + $0x10c8] sm:$0xff] }
 0x23a   :  { %2708 = vmatpush.msra.mxu2 %v437_v58  ;;  %2690 = vmatpush.msrb.mxu1 %v221_v59  ;;  %v880_v6 = vld [vmem:[#allocation5 + $0x1900] sm:$0xff]  ;;  %v317_v35 = vld [vmem:[#allocation5 + $0x768] sm:$0xff]  ;;  %v234_v58 = vld [vmem:[#allocation5 + $0x4d0] sm:$0xff] }
 0x23b   :  { %2750 = vmatpush.msrb.mxu0 %v797_v13  ;;  %2636 = vmatpush.msra.mxu3 %v916_v61  ;;  %v868_v14 = vld [vmem:[#allocation5 + $0x18a0] sm:$0xff]  ;;  %v101_v36 = vld [vmem:[#allocation5 + $0xa8] sm:$0xff] }
 0x23c   :  { %2709 = vmatpush.msra.mxu2 %v425_v15  ;;  %2691 = vmatpush.msrb.mxu1 %v209_v62  ;;  %v856_v20 = vld [vmem:[#allocation5 + $0x1840] sm:$0xff]  ;;  %v605_v51 = vld [vmem:[#allocation5 + $0x1068] sm:$0xff]  ;;  %v222_v15 = vld [vmem:[#allocation5 + $0x470] sm:$0xff] }
 0x23d   :  { %2751 = vmatpush.msrb.mxu0 %v785_v55  ;;  %2637 = vmatpush.msra.mxu3 %v904_v63  ;;  %v677_v52 = vld [vmem:[#allocation5 + $0x12a8] sm:$0xff] }
 0x23e   :  { %2710 = vmatpush.msra.mxu2 %v413_v10  ;;  %2692 = vmatpush.msrb.mxu1 %v197_v0  ;;  %v305_v37 = vld [vmem:[#allocation5 + $0x708] sm:$0xff]  ;;  %v210_v10 = vld [vmem:[#allocation5 + $0x410] sm:$0xff] }
 0x23f   :  { %2752 = vmatpush.msrb.mxu0 %v773_v1  ;;  %2638 = vmatpush.msra.mxu3 %v892_v3  ;;  %v89_v41 = vld [vmem:[#allocation5 + $0x48] sm:$0xff] }
 0x240   :  { %2711 = vmatpush.msra.mxu2 %v401_v4  ;;  %2693 = vmatpush.msrb.mxu1 %v185_v18  ;;  %v593_v42 = vld [vmem:[#allocation5 + $0x1008] sm:$0xff]  ;;  %v198_v4 = vld [vmem:[#allocation5 + $0x3b0] sm:$0xff] }
 0x241   :  { %2753 = vmatpush.msrb.mxu0 %v761_v5  ;;  %2639 = vmatpush.msra.mxu3 %v880_v6  ;;  %v665_v43 = vld [vmem:[#allocation5 + $0x1248] sm:$0xff] }
 0x242   :  { %2712 = vmatpush.msra.mxu2 %v389_v8  ;;  %2694 = vmatpush.msrb.mxu1 %v173_v9  ;;  %v1037_v44 = vld [vmem:[#allocation5 + $0x1de8] sm:$0xff]  ;;  %v186_v8 = vld [vmem:[#allocation5 + $0x350] sm:$0xff] }
 0x243   :  { %2754 = vmatpush.msrb.mxu0 %v749_v11  ;;  %2640 = vmatpush.msra.mxu3 %v868_v14  ;;  %v581_v25 = vld [vmem:[#allocation5 + $0xfa8] sm:$0xff] }
 0x244   :  { %2713 = vmatpush.msra.mxu2 %v377_v17  ;;  %2695 = vmatpush.msrb.mxu1 %v161_v19  ;;  %v281_v47 = vld [vmem:[#allocation5 + $0x648] sm:$0xff]  ;;  %v174_v17 = vld [vmem:[#allocation5 + $0x2f0] sm:$0xff] }
 0x245   :  { %2755 = vmatpush.msrb.mxu0 %v737_v54  ;;  %2641 = vmatpush.msra.mxu3 %v856_v20  ;;  %v1025_v48 = vld [vmem:[#allocation5 + $0x1d88] sm:$0xff] }
 0x246   :  { %2714 = vmatpush.msra.mxu2 %v365_v21  ;;  %2642 = vmatmul.f32.vlgmr.msra.gmra.mxu3 %v3936_v40  ;;  %v689_v40 = vld [vmem:[#allocation5 + $0x1308] sm:$0xff]  ;;  %v162_v21 = vld [vmem:[#allocation5 + $0x290] sm:$0xff] }
 0x247   :  { %2696 = vmatpush.msrb.mxu1 %v149_v22  ;;  %2726 = vmatpush.msrb.mxu3 %v653_v12  ;;  %v569_v46 = vld [vmem:[#allocation5 + $0xf48] sm:$0xff] }
 0x248   :  { %2756 = vmatpush.msrb.mxu0 %v725_v24  ;;  %2715 = vmatpush.msra.mxu2 %v353_v2  ;;  %v1229_v60 = vld [vmem:[#allocation5 + $0x23e8] sm:$0xff] }
 0x249   :  { %2697 = vmatpush.msrb.mxu1 %v137_v26  ;;  %2727 = vmatpush.msrb.mxu3 %v641_v16  ;;  %v1013_v50 = vld [vmem:[#allocation5 + $0x1d28] sm:$0xff]  ;;  %v150_v26 = vld [vmem:[#allocation5 + $0x230] sm:$0xff] }
 0x24a   :  { %2757 = vmatpush.msrb.mxu0 %v713_v27  ;;  %2716 = vmatpush.msra.mxu2 %v341_v28  ;;  %v557_v7 = vld [vmem:[#allocation5 + $0xee8] sm:$0xff] }
 0x24b   :  { %2698 = vmatpush.msrb.mxu1 %v125_v29  ;;  %3619 = vmatmul.msk.f32.vlgmr.msrb.gmra.mxu2 %vm1386_vm1, %v3942_v38  ;;  %v293_v38 = vld [vmem:[#allocation5 + $0x6a8] sm:$0xff]  ;;  %v138_v29 = vld [vmem:[#allocation5 + $0x1d0] sm:$0xff] }
 0x24c   :  { %2728 = vmatpush.msrb.mxu3 %v629_v30  ;;  %2758 = vmatpush.msrb.mxu0 %v701_v31  ;;  %v1217_v57 = vld [vmem:[#allocation5 + $0x2388] sm:$0xff] }
 0x24d   :  { %2717 = vmatpush.msra.mxu2 %v329_v32  ;;  %2699 = vmatpush.msrb.mxu1 %v113_v33  ;;  %v1001_v56 = vld [vmem:[#allocation5 + $0x1cc8] sm:$0xff]  ;;  %v126_v33 = vld [vmem:[#allocation5 + $0x170] sm:$0xff] }
 0x24e   :  { %2729 = vmatpush.msrb.mxu3 %v617_v34  ;;  %2759 = vmatpush.msrb.mxu0 %v689_v40  ;;  %v545_v59 = vld [vmem:[#allocation5 + $0xe88] sm:$0xff] }
 0x24f   :  { %2718 = vmatpush.msra.mxu2 %v317_v35  ;;  %2700 = vmatpush.msrb.mxu1 %v101_v36  ;;  %v1205_v13 = vld [vmem:[#allocation5 + $0x2328] sm:$0xff]  ;;  %v114_v36 = vld [vmem:[#allocation5 + $0x110] sm:$0xff] }
 0x250   :  { %2730 = vmatpush.msrb.mxu3 %v605_v51  ;;  %2760 = vmatpush.msrb.mxu0 %v677_v52  ;;  %v989_v61 = vld [vmem:[#allocation5 + $0x1c68] sm:$0xff] }
 0x251   :  { %2719 = vmatpush.msra.mxu2 %v305_v37  ;;  %2701 = vmatpush.msrb.mxu1 %v89_v41  ;;  %v533_v62 = vld [vmem:[#allocation5 + $0xe28] sm:$0xff]  ;;  %v102_v41 = vld [vmem:[#allocation5 + $0xb0] sm:$0xff] }
 0x252   :  { %2731 = vmatpush.msrb.mxu3 %v593_v42  ;;  %2761 = vmatpush.msrb.mxu0 %v665_v43  ;;  %v1193_v55 = vld [vmem:[#allocation5 + $0x22c8] sm:$0xff] }
 0x253   :  { %2720 = vmatpush.msra.mxu2 %v293_v38  ;;  %2766 = vmatpush.msra.mxu1 %v1037_v44  ;;  %v977_v63 = vld [vmem:[#allocation5 + $0x1c08] sm:$0xff]  ;;  %v90_v44 = vld [vmem:[#allocation5 + $0x50] sm:$0xff] }
 0x254   :  { %2826 = vmatpush.msra.mxu0 %v270_v23  ;;  %2732 = vmatpush.msrb.mxu3 %v581_v25  ;;  %v521_v0 = vld [vmem:[#allocation5 + $0xdc8] sm:$0xff]  ;;  %v654_v25 = vld [vmem:[#allocation5 + $0x11f0] sm:$0xff] }
 0x255   :  { %2721 = vmatpush.msra.mxu2 %v281_v47  ;;  %2767 = vmatpush.msra.mxu1 %v1025_v48  ;;  %v1181_v1 = vld [vmem:[#allocation5 + $0x2268] sm:$0xff]  ;;  %v1038_v47 = vld [vmem:[#allocation5 + $0x1df0] sm:$0xff] }
 0x256   :  { %2827 = vmatpush.msra.mxu0 %v258_v49  ;;  %2733 = vmatpush.msrb.mxu3 %v569_v46  ;;  %v965_v3 = vld [vmem:[#allocation5 + $0x1ba8] sm:$0xff] }
 0x257   :  { %2786 = vmatpush.msrb.mxu2 %v1229_v60  ;;  %2768 = vmatpush.msra.mxu1 %v1013_v50  ;;  %v509_v18 = vld [vmem:[#allocation5 + $0xd68] sm:$0xff]  ;;  %v642_v60 = vld [vmem:[#allocation5 + $0x1190] sm:$0xff] }
 0x258   :  { %2828 = vmatpush.msra.mxu0 %v246_v53  ;;  %2734 = vmatpush.msrb.mxu3 %v557_v7  ;;  %v1169_v5 = vld [vmem:[#allocation5 + $0x2208] sm:$0xff]  ;;  %v1026_v53 = vld [vmem:[#allocation5 + $0x1d90] sm:$0xff] }
 0x259   :  { %2787 = vmatpush.msrb.mxu2 %v1217_v57  ;;  %2769 = vmatpush.msra.mxu1 %v1001_v56  ;;  %v953_v6 = vld [vmem:[#allocation5 + $0x1b48] sm:$0xff]  ;;  %v846_v57 = vld [vmem:[#allocation5 + $0x17f0] sm:$0xff] }
 0x25a   :  { %2829 = vmatpush.msra.mxu0 %v234_v58  ;;  %2735 = vmatpush.msrb.mxu3 %v545_v59  ;;  %v497_v9 = vld [vmem:[#allocation5 + $0xd08] sm:$0xff]  ;;  %v3971_v56 = vld.sshfl [vmem:[#allocation1 + $0x8] sm:$0xff pattern:$0x73625140] }
 0x25b   :  { %2788 = vmatpush.msrb.mxu2 %v1205_v13  ;;  %2770 = vmatpush.msra.mxu1 %v989_v61  ;;  %v1157_v11 = vld [vmem:[#allocation5 + $0x21a8] sm:$0xff]  ;;  %v630_v58 = vld [vmem:[#allocation5 + $0x1130] sm:$0xff] }
 0x25c   :  { %2830 = vmatpush.msra.mxu0 %v222_v15  ;;  %2736 = vmatpush.msrb.mxu3 %v533_v62  ;;  %v941_v14 = vld [vmem:[#allocation5 + $0x1ae8] sm:$0xff]  ;;  %v1014_v59 = vld [vmem:[#allocation5 + $0x1d30] sm:$0xff]  ;;  %v3974_v62 = vld.sshfl [vmem:[#allocation1 + $0x10] sm:$0xff pattern:$0x73625140] }
 0x25d   :  { %2789 = vmatpush.msrb.mxu2 %v1193_v55  ;;  %2771 = vmatpush.msra.mxu1 %v977_v63  ;;  %v485_v19 = vld [vmem:[#allocation5 + $0xca8] sm:$0xff]  ;;  %v834_v61 = vld [vmem:[#allocation5 + $0x1790] sm:$0xff] }
 0x25e   :  { %2831 = vmatpush.msra.mxu0 %v210_v10  ;;  %2737 = vmatpush.msrb.mxu3 %v521_v0  ;;  %v1145_v54 = vld [vmem:[#allocation5 + $0x2148] sm:$0xff]  ;;  %v462_v15 = vld [vmem:[#allocation5 + $0xbf0] sm:$0xff] }
 0x25f   :  { %2790 = vmatpush.msrb.mxu2 %v1181_v1  ;;  %2772 = vmatpush.msra.mxu1 %v965_v3  ;;  %v929_v20 = vld [vmem:[#allocation5 + $0x1a88] sm:$0xff]  ;;  %v618_v55 = vld [vmem:[#allocation5 + $0x10d0] sm:$0xff] }
 0x260   :  { %2832 = vmatpush.msra.mxu0 %v198_v4  ;;  %2738 = vmatpush.msrb.mxu3 %v509_v18  ;;  %v473_v22 = vld [vmem:[#allocation5 + $0xc48] sm:$0xff]  ;;  %v1002_v63 = vld [vmem:[#allocation5 + $0x1cd0] sm:$0xff] }
 0x261   :  { %2791 = vmatpush.msrb.mxu2 %v1169_v5  ;;  %2773 = vmatpush.msra.mxu1 %v953_v6  ;;  %v1133_v12 = vld [vmem:[#allocation5 + $0x20e8] sm:$0xff]  ;;  %v822_v10 = vld [vmem:[#allocation5 + $0x1730] sm:$0xff] }
 0x262   :  { %2833 = vmatpush.msra.mxu0 %v186_v8  ;;  %2739 = vmatpush.msrb.mxu3 %v497_v9  ;;  %v917_v24 = vld [vmem:[#allocation5 + $0x1a28] sm:$0xff]  ;;  %v450_v0 = vld [vmem:[#allocation5 + $0xb90] sm:$0xff] }
 0x263   :  { %2792 = vmatpush.msrb.mxu2 %v1157_v11  ;;  %2774 = vmatpush.msra.mxu1 %v941_v14  ;;  %v1337_v2 = vld [vmem:[#allocation5 + $0x2748] sm:$0xf]  ;;  %v606_v1 = vld [vmem:[#allocation5 + $0x1070] sm:$0xff] }
 0x264   :  { %2834 = vmatpush.msra.mxu0 %v174_v17  ;;  %2740 = vmatpush.msrb.mxu3 %v485_v19  ;;  %v1121_v16 = vld [vmem:[#allocation5 + $0x2088] sm:$0xff]  ;;  %v990_v3 = vld [vmem:[#allocation5 + $0x1c70] sm:$0xff] }
 0x265   :  { %2793 = vmatpush.msrb.mxu2 %v1145_v54  ;;  %2775 = vmatpush.msra.mxu1 %v929_v20  ;;  %v905_v27 = vld [vmem:[#allocation5 + $0x19c8] sm:$0xff]  ;;  %v810_v4 = vld [vmem:[#allocation5 + $0x16d0] sm:$0xff]  ;;  %v3980_v54 = vld.sshfl [vmem:[#allocation1 + $0x30] sm:$0xff pattern:$0x73625140] }
 0x266   :  { %2835 = vmatpush.msra.mxu0 %v162_v21  ;;  %2741 = vmatpush.msrb.mxu3 %v473_v22  ;;  %v1325_v28 = vld [vmem:[#allocation5 + $0x26e8] sm:$0xff]  ;;  %v438_v18 = vld [vmem:[#allocation5 + $0xb30] sm:$0xff] }
 0x267   :  { %2794 = vmatpush.msrb.mxu2 %v1133_v12  ;;  %2776 = vmatpush.msra.mxu1 %v917_v24  ;;  %v1109_v30 = vld [vmem:[#allocation5 + $0x2028] sm:$0xff]  ;;  %v594_v5 = vld [vmem:[#allocation5 + $0x1010] sm:$0xff] }
 0x268   :  { %3620 = vmatpush.msk.msra.mxu3 %vm1389_vm0, %v1337_v2  ;;  %2836 = vmatpush.msra.mxu0 %v150_v26  ;;  %v893_v31 = vld [vmem:[#allocation5 + $0x1968] sm:$0xff]  ;;  %v978_v6 = vld [vmem:[#allocation5 + $0x1c10] sm:$0xff] }
 0x269   :  { %2795 = vmatpush.msrb.mxu2 %v1121_v16  ;;  %2777 = vmatpush.msra.mxu1 %v905_v27  ;;  %v1313_v32 = vld [vmem:[#allocation5 + $0x2688] sm:$0xff]  ;;  %v798_v8 = vld [vmem:[#allocation5 + $0x1670] sm:$0xff] }
 0x26a   :  { %2814 = vmatpush.msra.mxu3 %v1325_v28  ;;  %2837 = vmatpush.msra.mxu0 %v138_v29  ;;  %v1097_v34 = vld [vmem:[#allocation5 + $0x1fc8] sm:$0xff]  ;;  %v582_v9 = vld [vmem:[#allocation5 + $0xfb0] sm:$0xff] }
 0x26b   :  { %v881_v40 = vld [vmem:[#allocation5 + $0x1908] sm:$0xff]  ;;  %2796 = vmatpush.msrb.mxu2 %v1109_v30  ;;  %2778 = vmatpush.msra.mxu1 %v893_v31  ;;  %v3977_v11 = vld.sshfl [vmem:[#allocation1 + $0x28] sm:$0xff pattern:$0x73625140] }
 0x26c   :  { %v1301_v35 = vld [vmem:[#allocation5 + $0x2628] sm:$0xff]  ;;  %2815 = vmatpush.msra.mxu3 %v1313_v32  ;;  %2838 = vmatpush.msra.mxu0 %v126_v33  ;;  %v426_v14 = vld [vmem:[#allocation5 + $0xad0] sm:$0xff] }
 0x26d   :  { %v1085_v51 = vld [vmem:[#allocation5 + $0x1f68] sm:$0xff]  ;;  %2797 = vmatpush.msrb.mxu2 %v1097_v34  ;;  %2779 = vmatpush.msra.mxu1 %v881_v40  ;;  %v966_v17 = vld [vmem:[#allocation5 + $0x1bb0] sm:$0xff] }
 0x26e   :  { %v869_v52 = vld [vmem:[#allocation5 + $0x18a8] sm:$0xff]  ;;  %2816 = vmatpush.msra.mxu3 %v1301_v35  ;;  %2839 = vmatpush.msra.mxu0 %v114_v36  ;;  %v786_v19 = vld [vmem:[#allocation5 + $0x1610] sm:$0xff] }
 0x26f   :  { %v1289_v37 = vld [vmem:[#allocation5 + $0x25c8] sm:$0xff]  ;;  %2798 = vmatpush.msrb.mxu2 %v1085_v51  ;;  %2780 = vmatpush.msra.mxu1 %v869_v52  ;;  %v414_v20 = vld [vmem:[#allocation5 + $0xa70] sm:$0xff] }
 0x270   :  { %v1073_v42 = vld [vmem:[#allocation5 + $0x1f08] sm:$0xff]  ;;  %2817 = vmatpush.msra.mxu3 %v1289_v37  ;;  %2840 = vmatpush.msra.mxu0 %v102_v41  ;;  %v570_v21 = vld [vmem:[#allocation5 + $0xf50] sm:$0xff] }
 0x271   :  { %v857_v43 = vld [vmem:[#allocation5 + $0x1848] sm:$0xff]  ;;  %2799 = vmatpush.msrb.mxu2 %v1073_v42  ;;  %2742 = vmatmul.f32.vlgmr.msrb.gmra.mxu3 %v3974_v62  ;;  %v954_v22 = vld [vmem:[#allocation5 + $0x1b50] sm:$0xff] }
 0x272   :  { %v1277_v38 = vld [vmem:[#allocation5 + $0x2568] sm:$0xff]  ;;  %2781 = vmatpush.msra.mxu1 %v857_v43  ;;  %2841 = vmatpush.msra.mxu0 %v90_v44  ;;  %v774_v12 = vld [vmem:[#allocation5 + $0x15b0] sm:$0xff] }
 0x273   :  { %v1061_v23 = vld [vmem:[#allocation5 + $0x1ea8] sm:$0xff]  ;;  %2818 = vmatpush.msra.mxu3 %v1277_v38  ;;  %2722 = vmatmul.f32.vlgmr.msra.gmra.mxu2 %v3971_v56  ;;  %v402_v2 = vld [vmem:[#allocation5 + $0xa10] sm:$0xff] }
 0x274   :  { %v1265_v48 = vld [vmem:[#allocation5 + $0x2508] sm:$0xff]  ;;  %2800 = vmatpush.msrb.mxu2 %v1061_v23  ;;  %v558_v26 = vld [vmem:[#allocation5 + $0xef0] sm:$0xff] }
 0x275   :  { %v3965_v49 = vld.sshfl [vmem:[#allocation1] sm:$0xff pattern:$0x73625140]  ;;  %v3968_v46 = vld.sshfl [vmem:[#allocation1 + $0x18] sm:$0xff pattern:$0x73625140]  ;;  %2819 = vmatpush.msra.mxu3 %v1265_v48 }
 0x276   :  { %2702 = vmatmul.f32.vlgmr.msrb.gmra.mxu1 %v3965_v49  ;;  %2762 = vmatmul.f32.vlgmr.msrb.gmra.mxu0 %v3968_v46  ;;  %v1049_v50 = vld [vmem:[#allocation5 + $0x1e48] sm:$0xff]  ;;  %v942_v16 = vld [vmem:[#allocation5 + $0x1af0] sm:$0xff] }
 0x277   :  { %2866 = vmatpush.msrb.mxu1 %v654_v25  ;;  %2906 = vmatpush.msrb.mxu0 %v1038_v47  ;;  %v1253_v7 = vld [vmem:[#allocation5 + $0x24a8] sm:$0xff]  ;;  %v762_v27 = vld [vmem:[#allocation5 + $0x1550] sm:$0xff] }
 0x278   :  { %2801 = vmatpush.msrb.mxu2 %v1049_v50  ;;  %v1241_v13 = vld [vmem:[#allocation5 + $0x2448] sm:$0xff]  ;;  %2820 = vmatpush.msra.mxu3 %v1253_v7  ;;  %v390_v28 = vld [vmem:[#allocation5 + $0x9b0] sm:$0xff] }
 0x279   :  { %2867 = vmatpush.msrb.mxu1 %v642_v60  ;;  %2907 = vmatpush.msrb.mxu0 %v1026_v53  ;;  %v3984_v24 = vld.sshfl [vmem:[#allocation1 + $0x20] sm:$0xff pattern:$0x73625140] }
 0x27a   :  { %2886 = vmatpush.msra.mxu2 %v846_v57  ;;  %2821 = vmatpush.msra.mxu3 %v1241_v13  ;;  %v546_v29 = vld [vmem:[#allocation5 + $0xe90] sm:$0xff]  ;;  %v463_v13 = vld [vmem:[#allocation5 + $0xbf8] sm:$0xff] }
 0x27b   :  { %2868 = vmatpush.msrb.mxu1 %v630_v58  ;;  %2908 = vmatpush.msrb.mxu0 %v1014_v59  ;;  %v930_v30 = vld [vmem:[#allocation5 + $0x1a90] sm:$0xff] }
 0x27c   :  { %2887 = vmatpush.msra.mxu2 %v834_v61  ;;  %2846 = vmatpush.msrb.mxu3 %v462_v15  ;;  %v750_v31 = vld [vmem:[#allocation5 + $0x14f0] sm:$0xff] }
 0x27d   :  { %2869 = vmatpush.msrb.mxu1 %v618_v55  ;;  %2909 = vmatpush.msrb.mxu0 %v1002_v63  ;;  %v378_v32 = vld [vmem:[#allocation5 + $0x950] sm:$0xff]  ;;  %v451_v63 = vld [vmem:[#allocation5 + $0xb98] sm:$0xff] }
 0x27e   :  { %2888 = vmatpush.msra.mxu2 %v822_v10  ;;  %2847 = vmatpush.msrb.mxu3 %v450_v0  ;;  %v534_v33 = vld [vmem:[#allocation5 + $0xe30] sm:$0xff]  ;;  %v271_v0 = vld [vmem:[#allocation5 + $0x5f8] sm:$0xff] }
 0x27f   :  { %2870 = vmatpush.msrb.mxu1 %v606_v1  ;;  %2910 = vmatpush.msrb.mxu0 %v990_v3  ;;  %v918_v34 = vld [vmem:[#allocation5 + $0x1a30] sm:$0xff]  ;;  %v439_v3 = vld [vmem:[#allocation5 + $0xb38] sm:$0xff] }
 0x280   :  { %2889 = vmatpush.msra.mxu2 %v810_v4  ;;  %2848 = vmatpush.msrb.mxu3 %v438_v18  ;;  %v738_v40 = vld [vmem:[#allocation5 + $0x1490] sm:$0xff]  ;;  %v259_v18 = vld [vmem:[#allocation5 + $0x598] sm:$0xff] }
 0x281   :  { %2802 = vmatmul.f32.vlgmr.msrb.gmra.mxu2 %v3977_v11  ;;  %2871 = vmatpush.msrb.mxu1 %v594_v5  ;;  %v366_v35 = vld [vmem:[#allocation5 + $0x8f0] sm:$0xff] }
 0x282   :  { %2911 = vmatpush.msrb.mxu0 %v978_v6  ;;  %2890 = vmatpush.msra.mxu2 %v798_v8  ;;  %v522_v36 = vld [vmem:[#allocation5 + $0xdd0] sm:$0xff]  ;;  %v427_v8 = vld [vmem:[#allocation5 + $0xad8] sm:$0xff] }
 0x283   :  { %3621 = vmatmul.msk.f32.vlgmr.msra.gmra.mxu3 %vm1386_vm1, %v3980_v54  ;;  %2872 = vmatpush.msrb.mxu1 %v582_v9  ;;  %v906_v51 = vld [vmem:[#allocation5 + $0x19d0] sm:$0xff]  ;;  %v247_v9 = vld [vmem:[#allocation5 + $0x538] sm:$0xff] }
 0x284   :  { %2849 = vmatpush.msrb.mxu3 %v426_v14  ;;  %2912 = vmatpush.msrb.mxu0 %v966_v17  ;;  %v726_v52 = vld [vmem:[#allocation5 + $0x1430] sm:$0xff] }
 0x285   :  { %2891 = vmatpush.msra.mxu2 %v786_v19  ;;  %2782 = vmatmul.f32.vlgmr.msra.gmra.mxu1 %v3984_v24  ;;  %v354_v37 = vld [vmem:[#allocation5 + $0x890] sm:$0xff]  ;;  %v415_v19 = vld [vmem:[#allocation5 + $0xa78] sm:$0xff] }
 0x286   :  { %2850 = vmatpush.msrb.mxu3 %v414_v20  ;;  %2873 = vmatpush.msrb.mxu1 %v570_v21  ;;  %v510_v41 = vld [vmem:[#allocation5 + $0xd70] sm:$0xff]  ;;  %v235_v20 = vld [vmem:[#allocation5 + $0x4d8] sm:$0xff] }
 0x287   :  { %2913 = vmatpush.msrb.mxu0 %v954_v22  ;;  %2892 = vmatpush.msra.mxu2 %v774_v12  ;;  %v894_v42 = vld [vmem:[#allocation5 + $0x1970] sm:$0xff]  ;;  %v403_v12 = vld [vmem:[#allocation5 + $0xa18] sm:$0xff] }
 0x288   :  { %2851 = vmatpush.msrb.mxu3 %v402_v2  ;;  %2874 = vmatpush.msrb.mxu1 %v558_v26  ;;  %v714_v43 = vld [vmem:[#allocation5 + $0x13d0] sm:$0xff]  ;;  %v223_v2 = vld [vmem:[#allocation5 + $0x478] sm:$0xff] }
 0x289   :  { %2914 = vmatpush.msrb.mxu0 %v942_v16  ;;  %2893 = vmatpush.msra.mxu2 %v762_v27  ;;  %v342_v38 = vld [vmem:[#allocation5 + $0x830] sm:$0xff]  ;;  %v391_v27 = vld [vmem:[#allocation5 + $0x9b8] sm:$0xff] }
 0x28a   :  { %2852 = vmatpush.msrb.mxu3 %v390_v28  ;;  %2875 = vmatpush.msrb.mxu1 %v546_v29  ;;  %v498_v44 = vld [vmem:[#allocation5 + $0xd10] sm:$0xff]  ;;  %v211_v28 = vld [vmem:[#allocation5 + $0x418] sm:$0xff] }
 0x28b   :  { %2915 = vmatpush.msrb.mxu0 %v930_v30  ;;  %2894 = vmatpush.msra.mxu2 %v750_v31  ;;  %v882_v23 = vld [vmem:[#allocation5 + $0x1910] sm:$0xff]  ;;  %v379_v31 = vld [vmem:[#allocation5 + $0x958] sm:$0xff] }
 0x28c   :  { %2853 = vmatpush.msrb.mxu3 %v378_v32  ;;  %2876 = vmatpush.msrb.mxu1 %v534_v33  ;;  %v702_v25 = vld [vmem:[#allocation5 + $0x1370] sm:$0xff]  ;;  %v199_v32 = vld [vmem:[#allocation5 + $0x3b8] sm:$0xff] }
 0x28d   :  { %2916 = vmatpush.msrb.mxu0 %v918_v34  ;;  %2895 = vmatpush.msra.mxu2 %v738_v40  ;;  %v330_v47 = vld [vmem:[#allocation5 + $0x7d0] sm:$0xff]  ;;  %v367_v40 = vld [vmem:[#allocation5 + $0x8f8] sm:$0xff] }
 0x28e   :  { %2854 = vmatpush.msrb.mxu3 %v366_v35  ;;  %2877 = vmatpush.msrb.mxu1 %v522_v36  ;;  %v486_v48 = vld [vmem:[#allocation5 + $0xcb0] sm:$0xff]  ;;  %v187_v35 = vld [vmem:[#allocation5 + $0x358] sm:$0xff] }
 0x28f   :  { %2917 = vmatpush.msrb.mxu0 %v906_v51  ;;  %2896 = vmatpush.msra.mxu2 %v726_v52  ;;  %v870_v60 = vld [vmem:[#allocation5 + $0x18b0] sm:$0xff]  ;;  %v655_v36 = vld [vmem:[#allocation5 + $0x11f8] sm:$0xff] }
 0x290   :  { %2855 = vmatpush.msrb.mxu3 %v354_v37  ;;  %2878 = vmatpush.msrb.mxu1 %v510_v41  ;;  %v690_v50 = vld [vmem:[#allocation5 + $0x1310] sm:$0xff]  ;;  %v355_v52 = vld [vmem:[#allocation5 + $0x898] sm:$0xff] }
 0x291   :  { %2918 = vmatpush.msrb.mxu0 %v894_v42  ;;  %2897 = vmatpush.msra.mxu2 %v714_v43  ;;  %v318_v53 = vld [vmem:[#allocation5 + $0x770] sm:$0xff]  ;;  %v175_v37 = vld [vmem:[#allocation5 + $0x2f8] sm:$0xff] }
 0x292   :  { %2856 = vmatpush.msrb.mxu3 %v342_v38  ;;  %2879 = vmatpush.msrb.mxu1 %v498_v44  ;;  %v474_v7 = vld [vmem:[#allocation5 + $0xc50] sm:$0xff]  ;;  %v643_v41 = vld [vmem:[#allocation5 + $0x1198] sm:$0xff] }
 0x293   :  { %2919 = vmatpush.msrb.mxu0 %v882_v23  ;;  %2898 = vmatpush.msra.mxu2 %v702_v25  ;;  %v858_v57 = vld [vmem:[#allocation5 + $0x1850] sm:$0xff]  ;;  %v343_v43 = vld [vmem:[#allocation5 + $0x838] sm:$0xff] }
 0x294   :  { %2857 = vmatpush.msrb.mxu3 %v330_v47  ;;  %2880 = vmatpush.msrb.mxu1 %v486_v48  ;;  %v678_v58 = vld [vmem:[#allocation5 + $0x12b0] sm:$0xff]  ;;  %v163_v38 = vld [vmem:[#allocation5 + $0x298] sm:$0xff] }
 0x295   :  { %2920 = vmatpush.msrb.mxu0 %v870_v60  ;;  %2899 = vmatpush.msra.mxu2 %v690_v50  ;;  %v1338_v59 = vld [vmem:[#allocation5 + $0x2750] sm:$0xf]  ;;  %v631_v44 = vld [vmem:[#allocation5 + $0x1138] sm:$0xff] }
 0x296   :  { %2858 = vmatpush.msrb.mxu3 %v318_v53  ;;  %2881 = vmatpush.msrb.mxu1 %v474_v7  ;;  %v306_v61 = vld [vmem:[#allocation5 + $0x710] sm:$0xff]  ;;  %v331_v25 = vld [vmem:[#allocation5 + $0x7d8] sm:$0xff] }
 0x297   :  { %2921 = vmatpush.msrb.mxu0 %v858_v57  ;;  %2900 = vmatpush.msra.mxu2 %v678_v58  ;;  %v666_v15 = vld [vmem:[#allocation5 + $0x1250] sm:$0xff]  ;;  %v151_v47 = vld [vmem:[#allocation5 + $0x238] sm:$0xff] }
 0x298   :  { %v1326_v55 = vld [vmem:[#allocation5 + $0x26f0] sm:$0xff]  ;;  %2842 = vmatmul.f32.vlgmr.msra.gmra.mxu0 %v3965_v49  ;;  %3622 = vmatpush.msk.msra.mxu1 %vm1389_vm0, %v1338_v59  ;;  %v619_v48 = vld [vmem:[#allocation5 + $0x10d8] sm:$0xff] }
 0x299   :  { %v294_v10 = vld [vmem:[#allocation5 + $0x6b0] sm:$0xff]  ;;  %2986 = vmatpush.msra.mxu0 %v463_v13  ;;  %2859 = vmatpush.msrb.mxu3 %v306_v61  ;;  %v319_v50 = vld [vmem:[#allocation5 + $0x778] sm:$0xff] }
 0x29a   :  { %v1314_v1 = vld [vmem:[#allocation5 + $0x2690] sm:$0xff]  ;;  %2901 = vmatpush.msra.mxu2 %v666_v15  ;;  %2954 = vmatpush.msra.mxu1 %v1326_v55  ;;  %v139_v53 = vld [vmem:[#allocation5 + $0x1d8] sm:$0xff]  ;;  %v3993_v55 = vpop.f32.mrf.mxu1 }
 0x29b   :  { %v282_v4 = vld [vmem:[#allocation5 + $0x650] sm:$0xff]  ;;  %2987 = vmatpush.msra.mxu0 %v451_v63  ;;  %2860 = vmatpush.msrb.mxu3 %v294_v10  ;;  %v607_v7 = vld [vmem:[#allocation5 + $0x1078] sm:$0xff]  ;;  %v3995_v63 = vpop.f32.mrf.mxu3 }
 0x29c   :  { %v1230_v5 = vld [vmem:[#allocation5 + $0x23f0] sm:$0xff]  ;;  %2966 = vmatpush.msrb.mxu2 %v271_v0  ;;  %2955 = vmatpush.msra.mxu1 %v1314_v1  ;;  %v307_v58 = vld [vmem:[#allocation5 + $0x718] sm:$0xff] }
 0x29d   :  { %v1302_v6 = vld [vmem:[#allocation5 + $0x2630] sm:$0xff]  ;;  %2988 = vmatpush.msra.mxu0 %v439_v3  ;;  %2861 = vmatpush.msrb.mxu3 %v282_v4  ;;  %v127_v59 = vld [vmem:[#allocation5 + $0x178] sm:$0xff] }
 0x29e   :  { %v1218_v14 = vld [vmem:[#allocation5 + $0x2390] sm:$0xff]  ;;  %2967 = vmatpush.msrb.mxu2 %v259_v18  ;;  %2956 = vmatpush.msra.mxu1 %v1302_v6  ;;  %v595_v13 = vld [vmem:[#allocation5 + $0x1018] sm:$0xff] }
 0x29f   :  { %2926 = vmatpush.msra.mxu3 %v1230_v5  ;;  %v1290_v17 = vld [vmem:[#allocation5 + $0x25d0] sm:$0xff]  ;;  %2989 = vmatpush.msra.mxu0 %v427_v8  ;;  %v295_v15 = vld [vmem:[#allocation5 + $0x6b8] sm:$0xff] }
 0x2a0   :  { %v1206_v21 = vld [vmem:[#allocation5 + $0x2330] sm:$0xff]  ;;  %2968 = vmatpush.msrb.mxu2 %v247_v9  ;;  %2957 = vmatpush.msra.mxu1 %v1290_v17  ;;  %v115_v10 = vld [vmem:[#allocation5 + $0x118] sm:$0xff] }
 0x2a1   :  { %2927 = vmatpush.msra.mxu3 %v1218_v14  ;;  %v1278_v22 = vld [vmem:[#allocation5 + $0x2570] sm:$0xff]  ;;  %2990 = vmatpush.msra.mxu0 %v415_v19  ;;  %v583_v0 = vld [vmem:[#allocation5 + $0xfb8] sm:$0xff] }
 0x2a2   :  { %2969 = vmatpush.msrb.mxu2 %v235_v20  ;;  %v1194_v26 = vld [vmem:[#allocation5 + $0x22d0] sm:$0xff]  ;;  %2958 = vmatpush.msra.mxu1 %v1278_v22  ;;  %v283_v3 = vld [vmem:[#allocation5 + $0x658] sm:$0xff] }
 0x2a3   :  { %2928 = vmatpush.msra.mxu3 %v1206_v21  ;;  %v1266_v16 = vld [vmem:[#allocation5 + $0x2510] sm:$0xff]  ;;  %2991 = vmatpush.msra.mxu0 %v403_v12  ;;  %v103_v4 = vld [vmem:[#allocation5 + $0xb8] sm:$0xff]  ;;  %v3997_v12 = vpop.f32.mrf.mxu0 }
 0x2a4   :  { %2970 = vmatpush.msrb.mxu2 %v223_v2  ;;  %2862 = vmatmul.f32.vlgmr.msrb.gmra.mxu3 %v3971_v56  ;;  %v1182_v29 = vld [vmem:[#allocation5 + $0x2270] sm:$0xff]  ;;  %v571_v18 = vld [vmem:[#allocation5 + $0xf58] sm:$0xff]  ;;  %v3999_v2 = vpop.f32.mrf.mxu3 }
 0x2a5   :  { %v1254_v30 = vld [vmem:[#allocation5 + $0x24b0] sm:$0xff]  ;;  %2929 = vmatpush.msra.mxu3 %v1194_v26  ;;  %2959 = vmatpush.msra.mxu1 %v1266_v16  ;;  %v1231_v5 = vld [vmem:[#allocation5 + $0x23f8] sm:$0xff] }
 0x2a6   :  { %2992 = vmatpush.msra.mxu0 %v391_v27  ;;  %2971 = vmatpush.msrb.mxu2 %v211_v28  ;;  %v1170_v33 = vld [vmem:[#allocation5 + $0x2210] sm:$0xff]  ;;  %v91_v8 = vld [vmem:[#allocation5 + $0x58] sm:$0xff]  ;;  %v4001_v28 = vpop.f32.mrf.mxu1 }
 0x2a7   :  { %2930 = vmatpush.msra.mxu3 %v1182_v29  ;;  %2960 = vmatpush.msra.mxu1 %v1254_v30  ;;  %v1242_v34 = vld [vmem:[#allocation5 + $0x2450] sm:$0xff]  ;;  %v559_v9 = vld [vmem:[#allocation5 + $0xef8] sm:$0xff] }
 0x2a8   :  { %2993 = vmatpush.msra.mxu0 %v379_v31  ;;  %2972 = vmatpush.msrb.mxu2 %v199_v32  ;;  %v1158_v51 = vld [vmem:[#allocation5 + $0x21b0] sm:$0xff]  ;;  %v1219_v14 = vld [vmem:[#allocation5 + $0x2398] sm:$0xff]  ;;  %v4003_v31 = vpop.f32.mrf.mxu2 }
 0x2a9   :  { %2902 = vmatmul.f32.vlgmr.msra.gmra.mxu2 %v3968_v46  ;;  %2931 = vmatpush.msra.mxu3 %v1170_v33  ;;  %v1146_v42 = vld [vmem:[#allocation5 + $0x2150] sm:$0xff]  ;;  %v1039_v19 = vld [vmem:[#allocation5 + $0x1df8] sm:$0xff] }
 0x2aa   :  { %2961 = vmatpush.msra.mxu1 %v1242_v34  ;;  %2994 = vmatpush.msra.mxu0 %v367_v40  ;;  %v1134_v23 = vld [vmem:[#allocation5 + $0x20f0] sm:$0xff]  ;;  %v547_v20 = vld [vmem:[#allocation5 + $0xe98] sm:$0xff] }
 0x2ab   :  { %2882 = vmatmul.f32.vlgmr.msrb.gmra.mxu1 %v3974_v62  ;;  %2973 = vmatpush.msrb.mxu2 %v187_v35  ;;  %v1122_v60 = vld [vmem:[#allocation5 + $0x2090] sm:$0xff]  ;;  %v1207_v21 = vld [vmem:[#allocation5 + $0x2338] sm:$0xff] }
 0x2ac   :  { %3006 = vmatpush.msrb.mxu1 %v655_v36  ;;  %2932 = vmatpush.msra.mxu3 %v1158_v51  ;;  %v1110_v57 = vld [vmem:[#allocation5 + $0x2030] sm:$0xff]  ;;  %v1027_v26 = vld [vmem:[#allocation5 + $0x1d98] sm:$0xff] }
 0x2ad   :  { %2995 = vmatpush.msra.mxu0 %v355_v52  ;;  %2974 = vmatpush.msrb.mxu2 %v175_v37  ;;  %v1098_v61 = vld [vmem:[#allocation5 + $0x1fd0] sm:$0xff]  ;;  %v535_v16 = vld [vmem:[#allocation5 + $0xe38] sm:$0xff] }
 0x2ae   :  { %3007 = vmatpush.msrb.mxu1 %v643_v41  ;;  %2933 = vmatpush.msra.mxu3 %v1146_v42  ;;  %v1086_v1 = vld [vmem:[#allocation5 + $0x1f70] sm:$0xff]  ;;  %v847_v27 = vld [vmem:[#allocation5 + $0x17f8] sm:$0xff]  ;;  %v4006_v42 = vpop.f32.mrf.mxu0 }
 0x2af   :  { %2996 = vmatpush.msra.mxu0 %v343_v43  ;;  %2975 = vmatpush.msrb.mxu2 %v163_v38  ;;  %v1074_v6 = vld [vmem:[#allocation5 + $0x1f10] sm:$0xff]  ;;  %v1195_v29 = vld [vmem:[#allocation5 + $0x22d8] sm:$0xff]  ;;  %v4008_v43 = vpop.f32.mrf.mxu3 }
 0x2b0   :  { %3008 = vmatpush.msrb.mxu1 %v631_v44  ;;  %2934 = vmatpush.msra.mxu3 %v1134_v23  ;;  %v1062_v17 = vld [vmem:[#allocation5 + $0x1eb0] sm:$0xff]  ;;  %v1015_v30 = vld [vmem:[#allocation5 + $0x1d38] sm:$0xff] }
 0x2b1   :  { %2997 = vmatpush.msra.mxu0 %v331_v25  ;;  %2976 = vmatpush.msrb.mxu2 %v151_v47  ;;  %v1050_v22 = vld [vmem:[#allocation5 + $0x1e50] sm:$0xff]  ;;  %v523_v32 = vld [vmem:[#allocation5 + $0xdd8] sm:$0xff]  ;;  %v4010_v25 = vpop.f32.mrf.mxu1 }
 0x2b2   :  { %3009 = vmatpush.msrb.mxu1 %v619_v48  ;;  %2922 = vmatmul.f32.vlgmr.msrb.gmra.mxu0 %v3984_v24  ;;  %v835_v33 = vld [vmem:[#allocation5 + $0x1798] sm:$0xff] }
 0x2b3   :  { %2935 = vmatpush.msra.mxu3 %v1122_v60  ;;  %2998 = vmatpush.msra.mxu0 %v319_v50  ;;  %v1183_v34 = vld [vmem:[#allocation5 + $0x2278] sm:$0xff]  ;;  %v4012_v60 = vpop.f32.mrf.mxu2 }
 0x2b4   :  { %2977 = vmatpush.msrb.mxu2 %v139_v53  ;;  %3010 = vmatpush.msrb.mxu1 %v607_v7  ;;  %v1003_v40 = vld [vmem:[#allocation5 + $0x1cd8] sm:$0xff] }
 0x2b5   :  { %2936 = vmatpush.msra.mxu3 %v1110_v57  ;;  %2999 = vmatpush.msra.mxu0 %v307_v58  ;;  %v511_v35 = vld [vmem:[#allocation5 + $0xd78] sm:$0xff] }
 0x2b6   :  { %2978 = vmatpush.msrb.mxu2 %v127_v59  ;;  %3011 = vmatpush.msrb.mxu1 %v595_v13  ;;  %v823_v36 = vld [vmem:[#allocation5 + $0x1738] sm:$0xff] }
 0x2b7   :  { %2937 = vmatpush.msra.mxu3 %v1098_v61  ;;  %3000 = vmatpush.msra.mxu0 %v295_v15  ;;  %v1171_v51 = vld [vmem:[#allocation5 + $0x2218] sm:$0xff] }
 0x2b8   :  { %2979 = vmatpush.msrb.mxu2 %v115_v10  ;;  %3012 = vmatpush.msrb.mxu1 %v583_v0  ;;  %v991_v52 = vld [vmem:[#allocation5 + $0x1c78] sm:$0xff]  ;;  %v4016_v0 = vpop.f32.mrf.mxu0 }
 0x2b9   :  { %2938 = vmatpush.msra.mxu3 %v1086_v1  ;;  %3001 = vmatpush.msra.mxu0 %v283_v3  ;;  %v499_v37 = vld [vmem:[#allocation5 + $0xd18] sm:$0xff] }
 0x2ba   :  { %2980 = vmatpush.msrb.mxu2 %v103_v4  ;;  %3013 = vmatpush.msrb.mxu1 %v571_v18  ;;  %v811_v41 = vld [vmem:[#allocation5 + $0x16d8] sm:$0xff] }
 0x2bb   :  { %3066 = vmatpush.msrb.mxu0 %v1231_v5  ;;  %2939 = vmatpush.msra.mxu3 %v1074_v6  ;;  %v1159_v38 = vld [vmem:[#allocation5 + $0x21b8] sm:$0xff]  ;;  %v4019_v5 = vpop.f32.mrf.mxu3 }
 0x2bc   :  { %2981 = vmatpush.msrb.mxu2 %v91_v8  ;;  %3014 = vmatpush.msrb.mxu1 %v559_v9  ;;  %v979_v44 = vld [vmem:[#allocation5 + $0x1c18] sm:$0xff] }
 0x2bd   :  { %3067 = vmatpush.msrb.mxu0 %v1219_v14  ;;  %2940 = vmatpush.msra.mxu3 %v1062_v17  ;;  %v799_v23 = vld [vmem:[#allocation5 + $0x1678] sm:$0xff]  ;;  %v4021_v17 = vpop.f32.mrf.mxu1 }
 0x2be   :  { %3046 = vmatpush.msra.mxu2 %v1039_v19  ;;  %3015 = vmatpush.msrb.mxu1 %v547_v20  ;;  %v487_v47 = vld [vmem:[#allocation5 + $0xcb8] sm:$0xff] }
 0x2bf   :  { %3068 = vmatpush.msrb.mxu0 %v1207_v21  ;;  %2941 = vmatpush.msra.mxu3 %v1050_v22  ;;  %v1147_v48 = vld [vmem:[#allocation5 + $0x2158] sm:$0xff]  ;;  %v4023_v21 = vpop.f32.mrf.mxu2 }
 0x2c0   :  { %3047 = vmatpush.msra.mxu2 %v1027_v26  ;;  %2942 = vmatmul.f32.vlgmr.msra.gmra.mxu3 %v3977_v11  ;;  %v967_v50 = vld [vmem:[#allocation5 + $0x1bb8] sm:$0xff] }
 0x2c1   :  { %3016 = vmatpush.msrb.mxu1 %v535_v16  ;;  %3026 = vmatpush.msrb.mxu3 %v847_v27  ;;  %v787_v53 = vld [vmem:[#allocation5 + $0x1618] sm:$0xff] }
 0x2c2   :  { %3069 = vmatpush.msrb.mxu0 %v1195_v29  ;;  %3048 = vmatpush.msra.mxu2 %v1015_v30  ;;  %v475_v7 = vld [vmem:[#allocation5 + $0xc58] sm:$0xff] }
 0x2c3   :  { %3017 = vmatpush.msrb.mxu1 %v523_v32  ;;  %3027 = vmatpush.msrb.mxu3 %v835_v33  ;;  %v1135_v57 = vld [vmem:[#allocation5 + $0x20f8] sm:$0xff]  ;;  %v4025_v32 = vpop.f32.mrf.mxu0 }
 0x2c4   :  { %3070 = vmatpush.msrb.mxu0 %v1183_v34  ;;  %3049 = vmatpush.msra.mxu2 %v1003_v40  ;;  %v955_v58 = vld [vmem:[#allocation5 + $0x1b58] sm:$0xff] }
 0x2c5   :  { %3018 = vmatpush.msrb.mxu1 %v511_v35  ;;  %3028 = vmatpush.msrb.mxu3 %v823_v36  ;;  %v1339_v59 = vld [vmem:[#allocation5 + $0x2758] sm:$0xf]  ;;  %v4027_v36 = vpop.f32.mrf.mxu3 }
 0x2c6   :  { %3071 = vmatpush.msrb.mxu0 %v1171_v51  ;;  %3050 = vmatpush.msra.mxu2 %v991_v52  ;;  %v775_v13 = vld [vmem:[#allocation5 + $0x15b8] sm:$0xff] }
 0x2c7   :  { %3019 = vmatpush.msrb.mxu1 %v499_v37  ;;  %3029 = vmatpush.msrb.mxu3 %v811_v41  ;;  %v1123_v61 = vld [vmem:[#allocation5 + $0x2098] sm:$0xff]  ;;  %v4029_v37 = vpop.f32.mrf.mxu1 }
 0x2c8   :  { %3072 = vmatpush.msrb.mxu0 %v1159_v38  ;;  %3051 = vmatpush.msra.mxu2 %v979_v44  ;;  %v943_v15 = vld [vmem:[#allocation5 + $0x1af8] sm:$0xff]  ;;  %v4031_v44 = vld [vmem:[#allocation7] sm:$0xff] }
 0x2c9   :  { %3623 = vmatmul.msk.f32.vlgmr.msra.gmra.mxu1 %vm1386_vm1, %v3980_v54  ;;  %3030 = vmatpush.msrb.mxu3 %v799_v23  ;;  %v1327_v10 = vld [vmem:[#allocation5 + $0x26f8] sm:$0xff]  ;;  %v1347_v23 = vperm.slane %v4031_v44, 3 }
 0x2ca   :  { %3020 = vmatpush.msrb.mxu1 %v487_v47  ;;  %3073 = vmatpush.msrb.mxu0 %v1147_v48  ;;  %v763_v1 = vld [vmem:[#allocation5 + $0x1558] sm:$0xff]  ;;  %v4034_v47 = vpop.f32.mrf.mxu2  ;;  %v3205_v48 = vld [vmem:[%s4749_s3 + $0x1f8] sm:$0xff] }
 0x2cb   :  { %3052 = vmatpush.msra.mxu2 %v967_v50  ;;  %3031 = vmatpush.msrb.mxu3 %v787_v53  ;;  %v1111_v3 = vld [vmem:[#allocation5 + $0x2038] sm:$0xff] }
 0x2cc   :  { %3021 = vmatpush.msrb.mxu1 %v475_v7  ;;  %3074 = vmatpush.msrb.mxu0 %v1135_v57  ;;  %v931_v4 = vld [vmem:[#allocation5 + $0x1a98] sm:$0xff] }
 0x2cd   :  { %3053 = vmatpush.msra.mxu2 %v955_v58  ;;  %3032 = vmatpush.msrb.mxu3 %v775_v13  ;;  %v1315_v18 = vld [vmem:[#allocation5 + $0x2698] sm:$0xff]  ;;  %v4044_v58 = vpop.f32.mrf.mxu0  ;;  %v3173_v13 = vld [vmem:[%s4749_s3 + $0xf8] sm:$0xff] }
 0x2ce   :  { %3624 = vmatpush.msk.msra.mxu1 %vm1389_vm0, %v1339_v59  ;;  %3075 = vmatpush.msrb.mxu0 %v1123_v61  ;;  %v751_v6 = vld [vmem:[#allocation5 + $0x14f8] sm:$0xff] }
 0x2cf   :  { %3054 = vmatpush.msra.mxu2 %v943_v15  ;;  %v1099_v8 = vld [vmem:[#allocation5 + $0x1fd8] sm:$0xff]  ;;  %3033 = vmatpush.msrb.mxu3 %v763_v1  ;;  %v4056_v15 = vpop.f32.mrf.mxu3  ;;  %v1346_v1 = vperm.slane %v4031_v44, 2 }
 0x2d0   :  { %3094 = vmatpush.msra.mxu1 %v1327_v10  ;;  %3076 = vmatpush.msrb.mxu0 %v1111_v3  ;;  %v919_v9 = vld [vmem:[#allocation5 + $0x1a38] sm:$0xff] }
 0x2d1   :  { %v1303_v14 = vld [vmem:[#allocation5 + $0x2638] sm:$0xff]  ;;  %3055 = vmatpush.msra.mxu2 %v931_v4  ;;  %3034 = vmatpush.msrb.mxu3 %v751_v6  ;;  %v4066_v4 = vpop.f32.mrf.mxu1 }
 0x2d2   :  { %3095 = vmatpush.msra.mxu1 %v1315_v18  ;;  %v739_v19 = vld [vmem:[#allocation5 + $0x1498] sm:$0xff]  ;;  %3077 = vmatpush.msrb.mxu0 %v1099_v8  ;;  %v3202_v18 = vld [vmem:[%s4749_s3 + $0x1e0] sm:$0xff]  ;;  %v4075_v8 = vpop.f32.mrf.mxu2 }
 0x2d3   :  { %v1087_v20 = vld [vmem:[#allocation5 + $0x1f78] sm:$0xff]  ;;  %3056 = vmatpush.msra.mxu2 %v919_v9  ;;  %3035 = vmatpush.msrb.mxu3 %v739_v19 }
 0x2d4   :  { %v907_v22 = vld [vmem:[#allocation5 + $0x19d8] sm:$0xff]  ;;  %3096 = vmatpush.msra.mxu1 %v1303_v14  ;;  %3078 = vmatpush.msrb.mxu0 %v1087_v20  ;;  %v3201_v20 = vld [vmem:[%s4749_s3 + $0x1d8] sm:$0xff] }
 0x2d5   :  { %v1291_v26 = vld [vmem:[#allocation5 + $0x25d8] sm:$0xff]  ;;  %3057 = vmatpush.msra.mxu2 %v907_v22  ;;  %3002 = vmatmul.f32.vlgmr.msra.gmra.mxu0 %v3971_v56  ;;  %v3189_v56 = vld [vmem:[%s4749_s3 + $0x178] sm:$0xff]  ;;  %v3170_v22 = vld [vmem:[%s4749_s3 + $0xe0] sm:$0xff] }
 0x2d6   :  { %v727_v16 = vld [vmem:[#allocation5 + $0x1438] sm:$0xff]  ;;  %3097 = vmatpush.msra.mxu1 %v1291_v26  ;;  %2982 = vmatmul.f32.vlgmr.msrb.gmra.mxu2 %v3965_v49  ;;  %v1864_v49 = vadd.f32 %v4012_v60, %v1347_v23  ;;  %v4094_v26 = vpop.f32.mrf.mxu0 }
 0x2d7   :  { %v1075_v27 = vld [vmem:[#allocation5 + $0x1f18] sm:$0xff]  ;;  %3036 = vmatpush.msrb.mxu3 %v727_v16  ;;  %3022 = vmatmul.f32.vlgmr.msrb.gmra.mxu1 %v3974_v62  ;;  %v3157_v62 = vld [vmem:[%s4749_s3 + $0x78] sm:$0xff] }
 0x2d8   :  { %v895_v29 = vld [vmem:[#allocation5 + $0x1978] sm:$0xff]  ;;  %3079 = vmatpush.msrb.mxu0 %v1075_v27  ;;  %v1884_v6 = vadd.f32 %v4010_v25, %v1864_v49  ;;  %v1724_v25 = vadd.f32 %v3993_v55, %v1346_v1 }
 0x2d9   :  { %v1279_v30 = vld [vmem:[#allocation5 + $0x2578] sm:$0xff]  ;;  %3058 = vmatpush.msra.mxu2 %v895_v29  ;;  %v3169_v29 = vld [vmem:[%s4749_s3 + $0xd8] sm:$0xff]  ;;  %v4140_v23 = vpop.f32.mrf.mxu1 }
 0x2da   :  { %v715_v33 = vld [vmem:[#allocation5 + $0x13d8] sm:$0xff]  ;;  %3098 = vmatpush.msra.mxu1 %v1279_v30  ;;  %v1904_v16 = vadd.f32 %v4008_v43, %v1884_v6  ;;  %v4110_v30 = vpop.f32.mrf.mxu3  ;;  %v1744_v43 = vadd.f32 %v3995_v63, %v1724_v25  ;;  %v3153_v63 = vld [vmem:[%s4749_s3 + $0x58] sm:$0xff] }
 0x2db   :  { %v1063_v34 = vld [vmem:[#allocation5 + $0x1eb8] sm:$0xff]  ;;  %3037 = vmatpush.msrb.mxu3 %v715_v33  ;;  %v3185_v33 = vld [vmem:[%s4749_s3 + $0x158] sm:$0xff] }
 0x2dc   :  { %v883_v40 = vld [vmem:[#allocation5 + $0x1918] sm:$0xff]  ;;  %3080 = vmatpush.msrb.mxu0 %v1063_v34  ;;  %v3193_v25 = vld [vmem:[%s4749_s3 + $0x198] sm:$0xff] }
 0x2dd   :  { %v1267_v35 = vld [vmem:[#allocation5 + $0x2518] sm:$0xff]  ;;  %3059 = vmatpush.msra.mxu2 %v883_v40 }
 0x2de   :  { %v703_v51 = vld [vmem:[#allocation5 + $0x1378] sm:$0xff]  ;;  %3099 = vmatpush.msra.mxu1 %v1267_v35 }
 0x2df   :  { %v1051_v52 = vld [vmem:[#allocation5 + $0x1e58] sm:$0xff]  ;;  %3038 = vmatpush.msrb.mxu3 %v703_v51  ;;  %v1924_v51 = vadd.f32 %v4016_v0, %v1904_v16 }
 0x2e0   :  { %v871_v41 = vld [vmem:[#allocation5 + $0x18b8] sm:$0xff]  ;;  %3081 = vmatpush.msrb.mxu0 %v1051_v52  ;;  %v4132_v52 = vpop.f32.mrf.mxu2 }
 0x2e1   :  { %v1255_v38 = vld [vmem:[#allocation5 + $0x24b8] sm:$0xff]  ;;  %3060 = vmatpush.msra.mxu2 %v871_v41  ;;  %v3198_v41 = vld [vmem:[%s4749_s3 + $0x1c0] sm:$0xff]  ;;  %3082 = vmatmul.f32.vlgmr.msrb.gmra.mxu0 %v3977_v11  ;;  %v3181_v11 = vld [vmem:[%s4749_s3 + $0x138] sm:$0xff] }
 0x2e2   :  { %v691_v50 = vld [vmem:[#allocation5 + $0x1318] sm:$0xff]  ;;  %3100 = vmatpush.msra.mxu1 %v1255_v38  ;;  %3398 = vmatpush.msra.mxu0 %v3205_v48  ;;  %v1764_v48 = vadd.f32 %v3997_v12, %v1744_v43  ;;  %v3182_v12 = vld [vmem:[%s4749_s3 + $0x140] sm:$0xff] }
 0x2e3   :  { %v859_v53 = vld [vmem:[#allocation5 + $0x1858] sm:$0xff]  ;;  %3039 = vmatpush.msrb.mxu3 %v691_v50 }
 0x2e4   :  { %v1243_v7 = vld [vmem:[#allocation5 + $0x2458] sm:$0xff]  ;;  %3061 = vmatpush.msra.mxu2 %v859_v53  ;;  %v3197_v53 = vld [vmem:[%s4749_s3 + $0x1b8] sm:$0xff] }
 0x2e5   :  { %v3204_v57 = vld [vmem:[%s4749_s3 + $0x1f0] sm:$0xff]  ;;  %3101 = vmatpush.msra.mxu1 %v1243_v7  ;;  %v3203_v61 = vld [vmem:[%s4749_s3 + $0x1e8] sm:$0xff]  ;;  %3062 = vmatmul.f32.vlgmr.msra.gmra.mxu2 %v3984_v24  ;;  %v3154_v24 = vld [vmem:[%s4749_s3 + $0x60] sm:$0xff] }
 0x2e6   :  { %v679_v59 = vld [vmem:[#allocation5 + $0x12b8] sm:$0xff]  ;;  %3399 = vmatpush.msra.mxu0 %v3204_v57  ;;  %3378 = vmatpush.msrb.mxu2 %v3189_v56  ;;  %v3166_v7 = vld [vmem:[%s4749_s3 + $0xc0] sm:$0xff]  ;;  %v1944_v57 = vadd.f32 %v4023_v21, %v1924_v51  ;;  %v3165_v56 = vld [vmem:[%s4749_s3 + $0xb8] sm:$0xff]  ;;  %v1784_v21 = vadd.f32 %v4003_v31, %v1764_v48  ;;  %v3119_v48 = vmul.f32 0.01, %v3903_v45 }
 0x2e7   :  { %v667_v10 = vld [vmem:[#allocation5 + $0x1258] sm:$0xff]  ;;  %3040 = vmatpush.msrb.mxu3 %v679_v59  ;;  %3358 = vmatpush.msrb.mxu1 %v3173_v13  ;;  %v4163_v13 = vpop.f32.mrf.mxu0 }
 0x2e8   :  { %v3172_v60 = vld [vmem:[%s4749_s3 + $0xf0] sm:$0xff]  ;;  %3400 = vmatpush.msra.mxu0 %v3203_v61  ;;  %v3171_v9 = vld [vmem:[%s4749_s3 + $0xe8] sm:$0xff]  ;;  %v3150_v61 = vld [vmem:[%s4749_s3 + $0x40] sm:$0xff]  ;;  %3625 = vmatmul.msk.f32.vlgmr.msra.gmra.mxu1 %vm1386_vm1, %v3980_v54  ;;  %v1964_v1 = vadd.f32 %v4021_v17, %v1944_v57  ;;  %v1351_v57 = vperm.slane %v4031_v44, 7 }
 0x2e9   :  { %v3188_v3 = vld [vmem:[%s4749_s3 + $0x170] sm:$0xff]  ;;  %3041 = vmatpush.msrb.mxu3 %v667_v10  ;;  %3359 = vmatpush.msrb.mxu1 %v3172_v60  ;;  %v3187_v14 = vld [vmem:[%s4749_s3 + $0x168] sm:$0xff]  ;;  %v4178_v10 = vpop.f32.mrf.mxu3  ;;  %v3149_v54 = vld [vmem:[%s4749_s3 + $0x38] sm:$0xff] }
 0x2ea   :  { %3379 = vmatpush.msrb.mxu2 %v3188_v3  ;;  %3042 = vmatmul.f32.vlgmr.msrb.gmra.mxu3 %v3968_v46  ;;  %v3156_v19 = vld [vmem:[%s4749_s3 + $0x70] sm:$0xff]  ;;  %v3186_v46 = vld [vmem:[%s4749_s3 + $0x160] sm:$0xff]  ;;  %v3155_v55 = vld [vmem:[%s4749_s3 + $0x68] sm:$0xff]  ;;  %v4189_v3 = vpop.f32.mrf.mxu2 }
 0x2eb   :  { %3338 = vmatpush.msra.mxu3 %v3157_v62  ;;  %3401 = vmatpush.msra.mxu0 %v3202_v18  ;;  %v3200_v27 = vld [vmem:[%s4749_s3 + $0x1d0] sm:$0xff]  ;;  %v3199_v34 = vld [vmem:[%s4749_s3 + $0x1c8] sm:$0xff]  ;;  %v4197_v18 = vpop.f32.mrf.mxu1  ;;  %v3194_v17 = vld [vmem:[%s4749_s3 + $0x1a0] sm:$0xff] }
 0x2ec   :  { %3360 = vmatpush.msrb.mxu1 %v3171_v9  ;;  %3380 = vmatpush.msrb.mxu2 %v3187_v14  ;;  %v3168_v40 = vld [vmem:[%s4749_s3 + $0xd0] sm:$0xff]  ;;  %v3167_v38 = vld [vmem:[%s4749_s3 + $0xc8] sm:$0xff]  ;;  %v1804_v9 = vadd.f32 %v4001_v28, %v1784_v21  ;;  %v3162_v28 = vld [vmem:[%s4749_s3 + $0xa0] sm:$0xff] }
 0x2ed   :  { %3339 = vmatpush.msra.mxu3 %v3156_v19  ;;  %3402 = vmatpush.msra.mxu0 %v3201_v20  ;;  %v3184_v35 = vld [vmem:[%s4749_s3 + $0x150] sm:$0xff]  ;;  %v3183_v0 = vld [vmem:[%s4749_s3 + $0x148] sm:$0xff] }
 0x2ee   :  { %3361 = vmatpush.msrb.mxu1 %v3170_v22  ;;  %3381 = vmatpush.msrb.mxu2 %v3186_v46  ;;  %v3152_v50 = vld [vmem:[%s4749_s3 + $0x50] sm:$0xff]  ;;  %v3151_v59 = vld [vmem:[%s4749_s3 + $0x48] sm:$0xff]  ;;  %v1824_v20 = vadd.f32 %v3999_v2, %v1804_v9  ;;  %v1984_v22 = vadd.f32 %v4019_v5, %v1964_v1  ;;  %v3178_v46 = vld [vmem:[%s4749_s3 + $0x120] sm:$0xff]  ;;  %v3131_v1 = vsel %vm3107_vm3, %v3903_v45, %v3119_v48 }
 0x2ef   :  { %3340 = vmatpush.msra.mxu3 %v3155_v55  ;;  %3403 = vmatpush.msra.mxu0 %v3200_v27  ;;  %v3196_v49 = vld [vmem:[%s4749_s3 + $0x1b0] sm:$0xff]  ;;  %v3195_v31 = vld [vmem:[%s4749_s3 + $0x1a8] sm:$0xff]  ;;  %v4226_v16 = vpop.f32.mrf.mxu0  ;;  %v3161_v5 = vld [vmem:[%s4749_s3 + $0x98] sm:$0xff] }
 0x2f0   :  { %3362 = vmatpush.msrb.mxu1 %v3169_v29  ;;  %3382 = vmatpush.msrb.mxu2 %v3185_v33  ;;  %v3164_v60 = vld [vmem:[%s4749_s3 + $0xb0] sm:$0xff]  ;;  %v3163_v6 = vld [vmem:[%s4749_s3 + $0xa8] sm:$0xff]  ;;  %v3177_v27 = vld [vmem:[%s4749_s3 + $0x118] sm:$0xff]  ;;  %vm3109_vm2 = vcmp.gt.f32.partialorder %v1984_v22, 0.0 }
 0x2f1   :  { %3341 = vmatpush.msra.mxu3 %v3154_v24  ;;  %3404 = vmatpush.msra.mxu0 %v3199_v34  ;;  %v3180_v62 = vld [vmem:[%s4749_s3 + $0x130] sm:$0xff]  ;;  %v3179_v14 = vld [vmem:[%s4749_s3 + $0x128] sm:$0xff]  ;;  %v3146_v29 = vld [vmem:[%s4749_s3 + $0x20] sm:$0xff]  ;;  %v4240_v33 = vpop.f32.mrf.mxu3  ;;  %v1844_v34 = vadd.f32 %v4006_v42, %v1824_v20 }
 0x2f2   :  { %3363 = vmatpush.msrb.mxu1 %v3168_v40  ;;  %3383 = vmatpush.msrb.mxu2 %v3184_v35  ;;  %v3148_v19 = vld [vmem:[%s4749_s3 + $0x30] sm:$0xff]  ;;  %v3147_v55 = vld [vmem:[%s4749_s3 + $0x28] sm:$0xff]  ;;  %v3121_v40 = vmul.f32 0.01, %v1984_v22  ;;  %v3190_v42 = vld [vmem:[%s4749_s3 + $0x180] sm:$0xff] }
 0x2f3   :  { %3342 = vmatpush.msra.mxu3 %v3153_v63  ;;  %3405 = vmatpush.msra.mxu0 %v3198_v41  ;;  %v3192_v2 = vld [vmem:[%s4749_s3 + $0x190] sm:$0xff]  ;;  %v3191_v24 = vld [vmem:[%s4749_s3 + $0x188] sm:$0xff]  ;;  %v3145_v63 = vld [vmem:[%s4749_s3 + $0x18] sm:$0xff]  ;;  %v4255_v51 = vpop.f32.mrf.mxu1  ;;  %vm3108_vm4 = vcmp.gt.f32.partialorder %v1844_v34, 0.0 }
 0x2f4   :  { %3364 = vmatpush.msrb.mxu1 %v3167_v38  ;;  %3384 = vmatpush.msrb.mxu2 %v3183_v0  ;;  %v3160_v43 = vld [vmem:[%s4749_s3 + $0x90] sm:$0xff]  ;;  %v3159_v41 = vld [vmem:[%s4749_s3 + $0x88] sm:$0xff]  ;;  %v4263_v38 = vpop.f32.mrf.mxu2 }
 0x2f5   :  { %3343 = vmatpush.msra.mxu3 %v3152_v50  ;;  %3406 = vmatpush.msra.mxu0 %v3197_v53  ;;  %v3176_v35 = vld [vmem:[%s4749_s3 + $0x110] sm:$0xff]  ;;  %v3175_v0 = vld [vmem:[%s4749_s3 + $0x108] sm:$0xff]  ;;  %v3269_v50 = vld [vmem:[%s4749_s3 + $0x3f8] sm:$0xff] }
 0x2f6   :  { %3365 = vmatpush.msrb.mxu1 %v3166_v7  ;;  %3385 = vmatpush.msrb.mxu2 %v3182_v12  ;;  %v3144_v53 = vld [vmem:[%s4749_s3 + $0x10] sm:$0xff]  ;;  %v3120_v7 = vmul.f32 0.01, %v1844_v34  ;;  %v1349_v12 = vperm.slane %v4031_v44, 5  ;;  %v3267_v45 = vld [vmem:[%s4749_s3 + $0x3e8] sm:$0xff] }
 0x2f7   :  { %3344 = vmatpush.msra.mxu3 %v3151_v59  ;;  %3407 = vmatpush.msra.mxu0 %v3196_v49  ;;  %v3133_v59 = vsel %vm3109_vm2, %v1984_v22, %v3121_v40  ;;  %v3158_v49 = vld [vmem:[%s4749_s3 + $0x80] sm:$0xff]  ;;  %v2423_v21 = vpop.f32.mrf.mxu0 }
 0x2f8   :  { %3366 = vmatpush.msrb.mxu1 %v3165_v56  ;;  %3386 = vmatpush.msrb.mxu2 %v3181_v11  ;;  %v3174_v56 = vld [vmem:[%s4749_s3 + $0x100] sm:$0xff]  ;;  %v3268_v11 = vld [vmem:[%s4749_s3 + $0x3f0] sm:$0xff]  ;;  %v2424_v9 = vadd.f32 %v2423_v21, %v1351_v57  ;;  %v3231_v21 = vld [vmem:[%s4749_s3 + $0x2c8] sm:$0xff] }
 0x2f9   :  { %3345 = vmatpush.msra.mxu3 %v3150_v61  ;;  %3408 = vmatpush.msra.mxu0 %v3195_v31  ;;  %v3143_v61 = vld [vmem:[%s4749_s3 + $0x8] sm:$0xff]  ;;  %v1350_v31 = vperm.slane %v4031_v44, 6  ;;  %v3266_v22 = vld [vmem:[%s4749_s3 + $0x3e0] sm:$0xff] }
 0x2fa   :  { %3367 = vmatpush.msrb.mxu1 %v3164_v60  ;;  %3387 = vmatpush.msrb.mxu2 %v3180_v62  ;;  %v4292_v60 = vpop.f32.mrf.mxu3  ;;  %v3237_v62 = vld [vmem:[%s4749_s3 + $0x2f8] sm:$0xff]  ;;  %v3262_v57 = vld [vmem:[%s4749_s3 + $0x3c0] sm:$0xff] }
 0x2fb   :  { %3346 = vmatpush.msra.mxu3 %v3149_v54  ;;  %3409 = vmatpush.msra.mxu0 %v3194_v17  ;;  %v3253_v54 = vld [vmem:[%s4749_s3 + $0x378] sm:$0xff]  ;;  %v3118_v17 = vmul.f32 0.01, %v3877_v39 }
 0x2fc   :  { %3368 = vmatpush.msrb.mxu1 %v3163_v6  ;;  %3388 = vmatpush.msrb.mxu2 %v3179_v14  ;;  %v2144_v6 = vadd.f32 %v4066_v4, %v1349_v12  ;;  %v3132_v14 = vsel %vm3108_vm4, %v1844_v34, %v3120_v7  ;;  %v3236_v4 = vld [vmem:[%s4749_s3 + $0x2f0] sm:$0xff]  ;;  %v2463_v20 = vpop.f32.mrf.mxu2 }
 0x2fd   :  { %3347 = vmatpush.msra.mxu3 %v3148_v19  ;;  %3410 = vmatpush.msra.mxu0 %v3193_v25  ;;  %v3142_v19 = vld [vmem:[%s4749_s3] sm:$0xff]  ;;  %v2443_v25 = vpop.f32.mrf.mxu1  ;;  %v3264_v34 = vld [vmem:[%s4749_s3 + $0x3d0] sm:$0xff] }
 0x2fe   :  { %3369 = vmatpush.msrb.mxu1 %v3162_v28  ;;  %3389 = vmatpush.msrb.mxu2 %v3178_v46  ;;  %v3252_v28 = vld [vmem:[%s4749_s3 + $0x370] sm:$0xff]  ;;  %v2284_v46 = vadd.f32 %v4189_v3, %v1350_v31  ;;  %v3130_v3 = vsel %vm3106_vm5, %v3877_v39, %v3118_v17  ;;  %v3250_v39 = vld [vmem:[%s4749_s3 + $0x360] sm:$0xff]  ;;  %v3261_v31 = vld [vmem:[%s4749_s3 + $0x3b8] sm:$0xff] }
 0x2ff   :  { %3348 = vmatpush.msra.mxu3 %v3147_v55  ;;  %3411 = vmatpush.msra.mxu0 %v3192_v2  ;;  %v3221_v55 = vld [vmem:[%s4749_s3 + $0x278] sm:$0xff]  ;;  %v3235_v2 = vld [vmem:[%s4749_s3 + $0x2e8] sm:$0xff]  ;;  %v3248_v12 = vld [vmem:[%s4749_s3 + $0x350] sm:$0xff] }
 0x300   :  { %3370 = vmatpush.msrb.mxu1 %v3161_v5  ;;  %3390 = vmatpush.msrb.mxu2 %v3177_v27  ;;  %v1348_v5 = vperm.slane %v4031_v44, 4  ;;  %v2164_v27 = vadd.f32 %v4094_v26, %v2144_v6  ;;  %v3220_v44 = vld [vmem:[%s4749_s3 + $0x270] sm:$0xff]  ;;  %v3234_v26 = vld [vmem:[%s4749_s3 + $0x2e0] sm:$0xff]  ;;  %v2304_v40 = vadd.f32 %v4240_v33, %v2284_v46  ;;  %v3249_v33 = vld [vmem:[%s4749_s3 + $0x358] sm:$0xff] }
 0x301   :  { %3349 = vmatpush.msra.mxu3 %v3146_v29  ;;  %3412 = vmatpush.msra.mxu0 %v3191_v24  ;;  %v2444_v29 = vadd.f32 %v2443_v25, %v2424_v9  ;;  %v3251_v24 = vld [vmem:[%s4749_s3 + $0x368] sm:$0xff]  ;;  %v3246_v17 = vld [vmem:[%s4749_s3 + $0x340] sm:$0xff]  ;;  %v3260_v6 = vld [vmem:[%s4749_s3 + $0x3b0] sm:$0xff] }
 0x302   :  { %3371 = vmatpush.msrb.mxu1 %v3160_v43  ;;  %3391 = vmatpush.msrb.mxu2 %v3176_v35  ;;  %v3265_v43 = vld [vmem:[%s4749_s3 + $0x3d8] sm:$0xff]  ;;  %v2483_v35 = vpop.f32.mrf.mxu3  ;;  %v3259_v25 = vld [vmem:[%s4749_s3 + $0x3a8] sm:$0xff]  ;;  %v3244_v46 = vld [vmem:[%s4749_s3 + $0x330] sm:$0xff] }
 0x303   :  { %3350 = vmatpush.msra.mxu3 %v3145_v63  ;;  %3413 = vmatpush.msra.mxu0 %v3190_v42  ;;  %v3219_v63 = vld [vmem:[%s4749_s3 + $0x268] sm:$0xff]  ;;  %v3233_v42 = vld [vmem:[%s4749_s3 + $0x2d8] sm:$0xff]  ;;  %v2464_v48 = vadd.f32 %v2463_v20, %v2444_v29 }
 0x304   :  { %3372 = vmatpush.msrb.mxu1 %v3159_v41  ;;  %3392 = vmatpush.msrb.mxu2 %v3175_v0  ;;  %v2004_v41 = vadd.f32 %v4025_v32, %v1348_v5  ;;  %v2184_v0 = vadd.f32 %v4110_v30, %v2164_v27  ;;  %v3232_v32 = vld [vmem:[%s4749_s3 + $0x2d0] sm:$0xff]  ;;  %v4373_v7 = vpop.f32.mrf.mxu2  ;;  %v3227_v5 = vld [vmem:[%s4749_s3 + $0x2a8] sm:$0xff] }
 0x305   :  { %3414 = vmatmul.f32.vlgmr.msra.gmra.mxu0 %v3133_v59  ;;  %3351 = vmatpush.msra.mxu3 %v3144_v53  ;;  %v3218_v53 = vld [vmem:[%s4749_s3 + $0x260] sm:$0xff]  ;;  %v2484_v30 = vadd.f32 %v2483_v35, %v2464_v48  ;;  %v2324_v59 = vadd.f32 %v4197_v18, %v2304_v40  ;;  %v3247_v18 = vld [vmem:[%s4749_s3 + $0x348] sm:$0xff]  ;;  %v3225_v35 = vld [vmem:[%s4749_s3 + $0x298] sm:$0xff] }
 0x306   :  { %3478 = vmatpush.msrb.mxu0 %v3269_v50  ;;  %3373 = vmatpush.msrb.mxu1 %v3158_v49  ;;  %v3263_v50 = vld [vmem:[%s4749_s3 + $0x3c8] sm:$0xff]  ;;  %v2503_v49 = vpop.f32.mrf.mxu0 }
 0x307   :  { %3393 = vmatpush.msrb.mxu2 %v3174_v56  ;;  %3352 = vmatpush.msra.mxu3 %v3143_v61  ;;  %v3217_v56 = vld [vmem:[%s4749_s3 + $0x258] sm:$0xff]  ;;  %v2204_v61 = vadd.f32 %v4132_v52, %v2184_v0  ;;  %v2344_v9 = vadd.f32 %v4226_v16, %v2324_v59  ;;  %v3243_v29 = vld [vmem:[%s4749_s3 + $0x328] sm:$0xff] }
 0x308   :  { %3479 = vmatpush.msrb.mxu0 %v3268_v11  ;;  %3374 = vmatmul.f32.vlgmr.msrb.gmra.mxu1 %v3131_v1  ;;  %v2024_v11 = vadd.f32 %v4034_v47, %v2004_v41  ;;  %v3216_v1 = vld [vmem:[%s4749_s3 + $0x250] sm:$0xff]  ;;  %v3230_v47 = vld [vmem:[%s4749_s3 + $0x2c0] sm:$0xff]  ;;  %v3245_v16 = vld [vmem:[%s4749_s3 + $0x338] sm:$0xff] }
 0x309   :  { %3394 = vmatmul.f32.vlgmr.msrb.gmra.mxu2 %v3132_v14  ;;  %3438 = vmatpush.msra.mxu1 %v3237_v62  ;;  %v2504_v62 = vadd.f32 %v2503_v49, %v2484_v30  ;;  %v3241_v41 = vld [vmem:[%s4749_s3 + $0x318] sm:$0xff]  ;;  %v3255_v0 = vld [vmem:[%s4749_s3 + $0x388] sm:$0xff] }
 0x30a   :  { %3458 = vmatpush.msra.mxu2 %v3253_v54  ;;  %3480 = vmatpush.msrb.mxu0 %v3267_v45  ;;  %v2044_v52 = vadd.f32 %v4027_v36, %v2024_v11  ;;  %v2523_v54 = vpop.f32.mrf.mxu1  ;;  %v4410_v14 = vpop.f32.mrf.mxu3  ;;  %v3215_v36 = vld [vmem:[%s4749_s3 + $0x248] sm:$0xff]  ;;  %v3229_v45 = vld [vmem:[%s4749_s3 + $0x2b8] sm:$0xff]  ;;  %v3222_v11 = vld [vmem:[%s4749_s3 + $0x280] sm:$0xff] }
 0x30b   :  { %3353 = vmatpush.msra.mxu3 %v3142_v19  ;;  %3439 = vmatpush.msra.mxu1 %v3236_v4  ;;  %v2224_v19 = vadd.f32 %v4140_v23, %v2204_v61  ;;  %v3214_v4 = vld [vmem:[%s4749_s3 + $0x240] sm:$0xff]  ;;  %v3228_v23 = vld [vmem:[%s4749_s3 + $0x2b0] sm:$0xff]  ;;  %v2524_v20 = vadd.f32 %v2523_v54, %v2504_v62  ;;  %v3223_v30 = vld [vmem:[%s4749_s3 + $0x288] sm:$0xff] }
 0x30c   :  { %3459 = vmatpush.msra.mxu2 %v3252_v28  ;;  %3354 = vmatmul.f32.vlgmr.msra.gmra.mxu3 %v3130_v3  ;;  %v2064_v28 = vadd.f32 %v4029_v37, %v2044_v52  ;;  %v3213_v37 = vld [vmem:[%s4749_s3 + $0x238] sm:$0xff]  ;;  %v3239_v59 = vld [vmem:[%s4749_s3 + $0x308] sm:$0xff] }
 0x30d   :  { %3481 = vmatpush.msrb.mxu0 %v3266_v22  ;;  %3418 = vmatpush.msrb.mxu3 %v3221_v55  ;;  %v4432_v22 = vpop.f32.mrf.mxu2  ;;  %v3258_v55 = vld [vmem:[%s4749_s3 + $0x3a0] sm:$0xff]  ;;  %v2244_v27 = vadd.f32 %v4163_v13, %v2224_v19  ;;  %v3212_v13 = vld [vmem:[%s4749_s3 + $0x230] sm:$0xff]  ;;  %v3301_v54 = vld [vmem:[%s4749_s3 + $0x4f8] sm:$0xff] }
 0x30e   :  { %3440 = vmatpush.msra.mxu1 %v3235_v2  ;;  %3460 = vmatpush.msra.mxu2 %v3251_v24  ;;  %v2364_v2 = vadd.f32 %v4263_v38, %v2344_v9  ;;  %v3257_v38 = vld [vmem:[%s4749_s3 + $0x398] sm:$0xff]  ;;  %v4455_v24 = vpop.f32.mrf.mxu0 }
 0x30f   :  { %3482 = vmatpush.msrb.mxu0 %v3265_v43  ;;  %3419 = vmatpush.msrb.mxu3 %v3220_v44  ;;  %v3226_v43 = vld [vmem:[%s4749_s3 + $0x2a0] sm:$0xff]  ;;  %v2084_v44 = vadd.f32 %v4044_v58, %v2064_v28  ;;  %v3211_v58 = vld [vmem:[%s4749_s3 + $0x228] sm:$0xff] }
 0x310   :  { %3441 = vmatpush.msra.mxu1 %v3234_v26  ;;  %3461 = vmatpush.msra.mxu2 %v3250_v39  ;;  %v2384_v3 = vadd.f32 %v4292_v60, %v2364_v2  ;;  %v2544_v26 = vadd.f32 %v4373_v7, %v2524_v20  ;;  %v3242_v60 = vld [vmem:[%s4749_s3 + $0x320] sm:$0xff]  ;;  %v3299_v28 = vld [vmem:[%s4749_s3 + $0x4e8] sm:$0xff] }
 0x311   :  { %3483 = vmatpush.msrb.mxu0 %v3264_v34  ;;  %3420 = vmatpush.msrb.mxu3 %v3219_v63  ;;  %v3256_v34 = vld [vmem:[%s4749_s3 + $0x390] sm:$0xff]  ;;  %v2104_v63 = vadd.f32 %v4075_v8, %v2084_v44  ;;  %v3210_v8 = vld [vmem:[%s4749_s3 + $0x220] sm:$0xff]  ;;  %v3315_v2 = vld [vmem:[%s4749_s3 + $0x568] sm:$0xff] }
 0x312   :  { %3442 = vmatpush.msra.mxu1 %v3233_v42  ;;  %3462 = vmatpush.msra.mxu2 %v3249_v33  ;;  %v4465_v39 = vpop.f32.mrf.mxu1  ;;  %v4473_v40 = vpop.f32.mrf.mxu3  ;;  %v2264_v42 = vadd.f32 %v4178_v10, %v2244_v27  ;;  %v2404_v48 = vadd.f32 %v4255_v51, %v2384_v3  ;;  %v3224_v10 = vld [vmem:[%s4749_s3 + $0x290] sm:$0xff]  ;;  %v3125_v33 = vmul.f32 0.01, %v2544_v26  ;;  %v3254_v51 = vld [vmem:[%s4749_s3 + $0x380] sm:$0xff]  ;;  %vm3113_vm6 = vcmp.gt.f32.partialorder %v2544_v26, 0.0  ;;  %v3283_v27 = vld [vmem:[%s4749_s3 + $0x468] sm:$0xff] }
 0x313   :  { %3484 = vmatpush.msrb.mxu0 %v3263_v50  ;;  %3421 = vmatpush.msrb.mxu3 %v3218_v53  ;;  %v3240_v53 = vld [vmem:[%s4749_s3 + $0x310] sm:$0xff]  ;;  %v2124_v7 = vadd.f32 %v4056_v15, %v2104_v63 }
 0x314   :  { %3443 = vmatpush.msra.mxu1 %v3232_v32  ;;  %3463 = vmatpush.msra.mxu2 %v3248_v12  ;;  %v3209_v32 = vld [vmem:[%s4749_s3 + $0x218] sm:$0xff]  ;;  %v3123_v12 = vmul.f32 0.01, %v2264_v42  ;;  %vm3111_vm7 = vcmp.gt.f32.partialorder %v2264_v42, 0.0  ;;  %v3124_v49 = vmul.f32 0.01, %v2404_v48 }
 0x315   :  { %3485 = vmatpush.msrb.mxu0 %v3262_v57  ;;  %3422 = vmatpush.msrb.mxu3 %v3217_v56  ;;  %v4496_v50 = vpop.f32.mrf.mxu2  ;;  %v4511_v57 = vld [vmem:[#allocation7 + $0x8] sm:$0xf]  ;;  %v3208_v15 = vld [vmem:[%s4749_s3 + $0x210] sm:$0xff]  ;;  %vm3112_vm8 = vcmp.gt.f32.partialorder %v2404_v48, 0.0  ;;  %v3122_v52 = vmul.f32 0.01, %v2124_v7 }
 0x316   :  { %3444 = vmatpush.msra.mxu1 %v3231_v21  ;;  %3464 = vmatpush.msra.mxu2 %v3247_v18  ;;  %v4516_v56 = vpop.f32.mrf.mxu0  ;;  %v1353_v21 = vperm.slane %v4511_v57, 1  ;;  %v3137_v18 = vsel %vm3113_vm6, %v2544_v26, %v3125_v33  ;;  %v3135_v62 = vsel %vm3111_vm7, %v2264_v42, %v3123_v12  ;;  %vm3110_vm9 = vcmp.gt.f32.partialorder %v2124_v7, 0.0  ;;  %v3296_v26 = vld [vmem:[%s4749_s3 + $0x4d0] sm:$0xff]  ;;  %v3331_v42 = vld [vmem:[%s4749_s3 + $0x5e8] sm:$0xff]  ;;  %v3329_v12 = vld [vmem:[%s4749_s3 + $0x5d8] sm:$0xff] }
 0x317   :  { %3486 = vmatpush.msrb.mxu0 %v3261_v31  ;;  %3423 = vmatpush.msrb.mxu3 %v3216_v1  ;;  %v3238_v31 = vld [vmem:[%s4749_s3 + $0x300] sm:$0xff]  ;;  %v3136_v9 = vsel %vm3112_vm8, %v2404_v48, %v3124_v49  ;;  %v1354_v63 = vperm.slane %v4511_v57, 2  ;;  %v3280_v48 = vld [vmem:[%s4749_s3 + $0x450] sm:$0xff] }
 0x318   :  { %3445 = vmatpush.msra.mxu1 %v3230_v47  ;;  %3465 = vmatpush.msra.mxu2 %v3246_v17  ;;  %v3207_v47 = vld [vmem:[%s4749_s3 + $0x208] sm:$0xff]  ;;  %v3317_v17 = vld [vmem:[%s4749_s3 + $0x578] sm:$0xff] }
 0x319   :  { %3487 = vmatpush.msrb.mxu0 %v3260_v6  ;;  %3424 = vmatpush.msrb.mxu3 %v3215_v36  ;;  %v3206_v36 = vld [vmem:[%s4749_s3 + $0x200] sm:$0xff] }
 0x31a   :  { %3446 = vmatpush.msra.mxu1 %v3229_v45  ;;  %3466 = vmatpush.msra.mxu2 %v3245_v16  ;;  %v2703_v61 = vpop.f32.mrf.mxu1  ;;  %v2743_v1 = vpop.f32.mrf.mxu3  ;;  %v1352_v45 = vperm.slane %v4511_v57, 0  ;;  %v3300_v16 = vld [vmem:[%s4749_s3 + $0x4f0] sm:$0xff] }
 0x31b   :  { %3488 = vmatpush.msrb.mxu0 %v3259_v25  ;;  %3425 = vmatpush.msrb.mxu3 %v3214_v4  ;;  %v2704_v6 = vadd.f32 %v2703_v61, %v1353_v21  ;;  %v3285_v25 = vld [vmem:[%s4749_s3 + $0x478] sm:$0xff]  ;;  %v3316_v4 = vld [vmem:[%s4749_s3 + $0x570] sm:$0xff] }
 0x31c   :  { %3447 = vmatpush.msra.mxu1 %v3228_v23  ;;  %3467 = vmatpush.msra.mxu2 %v3244_v46  ;;  %v3134_v23 = vsel %vm3110_vm9, %v2124_v7, %v3122_v52  ;;  %v3293_v7 = vld [vmem:[%s4749_s3 + $0x4b8] sm:$0xff] }
 0x31d   :  { %3489 = vmatpush.msrb.mxu0 %v3258_v55  ;;  %3426 = vmatpush.msrb.mxu3 %v3213_v37  ;;  %v2723_v19 = vpop.f32.mrf.mxu2  ;;  %v3284_v55 = vld [vmem:[%s4749_s3 + $0x470] sm:$0xff]  ;;  %v2564_v37 = vadd.f32 %v4410_v14, %v1352_v45  ;;  %v3297_v14 = vld [vmem:[%s4749_s3 + $0x4d8] sm:$0xff]  ;;  %v3275_v45 = vld [vmem:[%s4749_s3 + $0x428] sm:$0xff] }
 0x31e   :  { %3448 = vmatpush.msra.mxu1 %v3227_v5  ;;  %3468 = vmatpush.msra.mxu2 %v3243_v29  ;;  %v2724_v20 = vadd.f32 %v2723_v19, %v2704_v6  ;;  %v2763_v46 = vpop.f32.mrf.mxu0  ;;  %v3298_v5 = vld [vmem:[%s4749_s3 + $0x4e0] sm:$0xff] }
 0x31f   :  { %3490 = vmatpush.msrb.mxu0 %v3257_v38  ;;  %3427 = vmatpush.msrb.mxu3 %v3212_v13  ;;  %v3314_v29 = vld [vmem:[%s4749_s3 + $0x560] sm:$0xff]  ;;  %v2584_v44 = vadd.f32 %v4455_v24, %v2564_v37  ;;  %v3312_v24 = vld [vmem:[%s4749_s3 + $0x550] sm:$0xff] }
 0x320   :  { %3449 = vmatpush.msra.mxu1 %v3226_v43  ;;  %3469 = vmatpush.msra.mxu2 %v3242_v60  ;;  %v2744_v38 = vadd.f32 %v2743_v1, %v2724_v20  ;;  %v3282_v13 = vld [vmem:[%s4749_s3 + $0x460] sm:$0xff]  ;;  %v3313_v43 = vld [vmem:[%s4749_s3 + $0x558] sm:$0xff] }
 0x321   :  { %3491 = vmatpush.msrb.mxu0 %v3256_v34  ;;  %3428 = vmatpush.msrb.mxu3 %v3211_v58  ;;  %v3333_v60 = vld [vmem:[%s4749_s3 + $0x5f8] sm:$0xff]  ;;  %v3332_v34 = vld [vmem:[%s4749_s3 + $0x5f0] sm:$0xff]  ;;  %v2604_v33 = vadd.f32 %v4432_v22, %v2584_v44  ;;  %v3306_v19 = vld [vmem:[%s4749_s3 + $0x520] sm:$0xff] }
 0x322   :  { %3450 = vmatpush.msra.mxu1 %v3225_v35  ;;  %3470 = vmatpush.msra.mxu2 %v3241_v41  ;;  %v4576_v3 = vpop.f32.mrf.mxu3  ;;  %v3281_v58 = vld [vmem:[%s4749_s3 + $0x458] sm:$0xff]  ;;  %v3295_v35 = vld [vmem:[%s4749_s3 + $0x4c8] sm:$0xff]  ;;  %v2764_v41 = vadd.f32 %v2763_v46, %v2744_v38  ;;  %v3274_v20 = vld [vmem:[%s4749_s3 + $0x420] sm:$0xff] }
 0x323   :  { %3492 = vmatpush.msrb.mxu0 %v3255_v0  ;;  %3429 = vmatpush.msrb.mxu3 %v3210_v8  ;;  %v2783_v0 = vpop.f32.mrf.mxu1  ;;  %v2624_v61 = vadd.f32 %v4465_v39, %v2604_v33  ;;  %v3277_v1 = vld [vmem:[%s4749_s3 + $0x438] sm:$0xff]  ;;  %v3272_v38 = vld [vmem:[%s4749_s3 + $0x410] sm:$0xff]  ;;  %v3322_v33 = vld [vmem:[%s4749_s3 + $0x5a0] sm:$0xff] }
 0x324   :  { %3451 = vmatpush.msra.mxu1 %v3224_v10  ;;  %3471 = vmatpush.msra.mxu2 %v3240_v53  ;;  %v3311_v10 = vld [vmem:[%s4749_s3 + $0x548] sm:$0xff]  ;;  %v3294_v53 = vld [vmem:[%s4749_s3 + $0x4c0] sm:$0xff]  ;;  %v3305_v46 = vld [vmem:[%s4749_s3 + $0x518] sm:$0xff] }
 0x325   :  { %3493 = vmatpush.msrb.mxu0 %v3254_v51  ;;  %3430 = vmatpush.msrb.mxu3 %v3209_v32  ;;  %v3330_v51 = vld [vmem:[%s4749_s3 + $0x5e0] sm:$0xff]  ;;  %v3279_v32 = vld [vmem:[%s4749_s3 + $0x448] sm:$0xff]  ;;  %v2803_v49 = vpop.f32.mrf.mxu2  ;;  %v2644_v39 = vadd.f32 %v4473_v40, %v2624_v61  ;;  %v3325_v44 = vld [vmem:[%s4749_s3 + $0x5b8] sm:$0xff] }
 0x326   :  { %3452 = vmatpush.msra.mxu1 %v3223_v30  ;;  %3472 = vmatpush.msra.mxu2 %v3239_v59  ;;  %v2843_v8 = vpop.f32.mrf.mxu0  ;;  %v3310_v30 = vld [vmem:[%s4749_s3 + $0x540] sm:$0xff]  ;;  %v2784_v59 = vadd.f32 %v2783_v0, %v2764_v41  ;;  %v3307_v40 = vld [vmem:[%s4749_s3 + $0x528] sm:$0xff] }
 0x327   :  { %3494 = vmatmul.f32.vlgmr.msrb.gmra.mxu0 %v3137_v18  ;;  %3431 = vmatpush.msrb.mxu3 %v3208_v15  ;;  %v2844_v22 = vadd.f32 %v2843_v8, %v1354_v63  ;;  %v3278_v15 = vld [vmem:[%s4749_s3 + $0x440] sm:$0xff]  ;;  %v3292_v18 = vld [vmem:[%s4749_s3 + $0x4b0] sm:$0xff]  ;;  %v3323_v8 = vld [vmem:[%s4749_s3 + $0x5a8] sm:$0xff] }
 0x328   :  { %3453 = vmatpush.msra.mxu1 %v3222_v11  ;;  %3473 = vmatpush.msra.mxu2 %v3238_v31  ;;  %v3309_v11 = vld [vmem:[%s4749_s3 + $0x538] sm:$0xff]  ;;  %v3328_v31 = vld [vmem:[%s4749_s3 + $0x5d0] sm:$0xff] }
 0x329   :  { %3454 = vmatmul.f32.vlgmr.msra.gmra.mxu1 %v3135_v62  ;;  %3432 = vmatpush.msrb.mxu3 %v3207_v47  ;;  %v3308_v47 = vld [vmem:[%s4749_s3 + $0x530] sm:$0xff]  ;;  %v3291_v62 = vld [vmem:[%s4749_s3 + $0x4a8] sm:$0xff] }
 0x32a   :  { %3474 = vmatmul.f32.vlgmr.msra.gmra.mxu2 %v3136_v9  ;;  %3518 = vmatpush.msrb.mxu1 %v3301_v54  ;;  %v2863_v21 = vpop.f32.mrf.mxu3  ;;  %v3327_v54 = vld [vmem:[%s4749_s3 + $0x5c8] sm:$0xff]  ;;  %v3276_v9 = vld [vmem:[%s4749_s3 + $0x430] sm:$0xff] }
 0x32b   :  { %3538 = vmatpush.msrb.mxu2 %v3317_v17  ;;  %3433 = vmatpush.msrb.mxu3 %v3206_v36  ;;  %v2864_v52 = vadd.f32 %v2863_v21, %v2844_v22  ;;  %v2804_v17 = vadd.f32 %v2803_v49, %v2784_v59  ;;  %v2883_v6 = vpop.f32.mrf.mxu1  ;;  %v3290_v36 = vld [vmem:[%s4749_s3 + $0x4a0] sm:$0xff]  ;;  %v3324_v63 = vld [vmem:[%s4749_s3 + $0x5b0] sm:$0xff] }
 0x32c   :  { %3519 = vmatpush.msrb.mxu1 %v3300_v16  ;;  %3434 = vmatmul.f32.vlgmr.msrb.gmra.mxu3 %v3134_v23  ;;  %v2664_v16 = vadd.f32 %v4516_v56, %v2644_v39  ;;  %v3288_v56 = vld [vmem:[%s4749_s3 + $0x490] sm:$0xff]  ;;  %v3318_v22 = vld [vmem:[%s4749_s3 + $0x580] sm:$0xff] }
 0x32d   :  { %3498 = vmatpush.msra.mxu3 %v3285_v25  ;;  %3539 = vmatpush.msrb.mxu2 %v3316_v4  ;;  %v2884_v25 = vadd.f32 %v2883_v6, %v2864_v52  ;;  %v3289_v4 = vld [vmem:[%s4749_s3 + $0x498] sm:$0xff]  ;;  %v2824_v23 = vadd.f32 %v4576_v3, %v2804_v17  ;;  %v3303_v3 = vld [vmem:[%s4749_s3 + $0x508] sm:$0xff]  ;;  %v3633_v6 = vld [vmem:[#allocation8] ss:$0 sm:$0xff] }
 0x32e   :  { %3520 = vmatpush.msrb.mxu1 %v3299_v28  ;;  %3558 = vmatpush.msra.mxu0 %v3333_v60  ;;  %v2903_v28 = vpop.f32.mrf.mxu2  ;;  %v2684_v37 = vadd.f32 %v4496_v50, %v2664_v16  ;;  %v3326_v50 = vld [vmem:[%s4749_s3 + $0x5c0] sm:$0xff] }
 0x32f   :  { %3499 = vmatpush.msra.mxu3 %v3284_v55  ;;  %3540 = vmatpush.msrb.mxu2 %v3315_v2  ;;  %v3273_v55 = vld [vmem:[%s4749_s3 + $0x418] sm:$0xff]  ;;  %v3304_v2 = vld [vmem:[%s4749_s3 + $0x510] sm:$0xff]  ;;  %vm3115_vm10 = vcmp.gt.f32.partialorder %v2824_v23, 0.0 }
 0x330   :  { %3521 = vmatpush.msrb.mxu1 %v3298_v5  ;;  %3559 = vmatpush.msra.mxu0 %v3332_v34  ;;  %v2904_v5 = vadd.f32 %v2903_v28, %v2884_v25  ;;  %v3302_v34 = vld [vmem:[%s4749_s3 + $0x500] sm:$0xff]  ;;  %vm3114_vm11 = vcmp.gt.f32.partialorder %v2684_v37, 0.0 }
 0x331   :  { %3500 = vmatpush.msra.mxu3 %v3283_v27  ;;  %3541 = vmatpush.msrb.mxu2 %v3314_v29  ;;  %v3287_v27 = vld [vmem:[%s4749_s3 + $0x488] sm:$0xff]  ;;  %v3127_v29 = vmul.f32 0.01, %v2824_v23 }
 0x332   :  { %3522 = vmatpush.msrb.mxu1 %v3297_v14  ;;  %3560 = vmatpush.msra.mxu0 %v3331_v42  ;;  %v2923_v14 = vpop.f32.mrf.mxu0 }
 0x333   :  { %3501 = vmatpush.msra.mxu3 %v3282_v13  ;;  %3542 = vmatpush.msrb.mxu2 %v3313_v43  ;;  %v3286_v13 = vld [vmem:[%s4749_s3 + $0x480] sm:$0xff]  ;;  %v3271_v43 = vld [vmem:[%s4749_s3 + $0x408] sm:$0xff]  ;;  %v2924_v60 = vadd.f32 %v2923_v14, %v2904_v5 }
 0x334   :  { %3523 = vmatpush.msrb.mxu1 %v3296_v26  ;;  %3561 = vmatpush.msra.mxu0 %v3330_v51  ;;  %v3126_v26 = vmul.f32 0.01, %v2684_v37  ;;  %v3321_v51 = vld [vmem:[%s4749_s3 + $0x598] sm:$0xff] }
 0x335   :  { %3502 = vmatpush.msra.mxu3 %v3281_v58  ;;  %3543 = vmatpush.msrb.mxu2 %v3312_v24  ;;  %v3139_v58 = vsel %vm3115_vm10, %v2824_v23, %v3127_v29  ;;  %v3270_v24 = vld [vmem:[%s4749_s3 + $0x400] sm:$0xff] }
 0x336   :  { %3524 = vmatpush.msrb.mxu1 %v3295_v35  ;;  %3562 = vmatpush.msra.mxu0 %v3329_v12  ;;  %v3138_v41 = vsel %vm3114_vm11, %v2684_v37, %v3126_v26 }
 0x337   :  { %3503 = vmatpush.msra.mxu3 %v3280_v48  ;;  %3544 = vmatpush.msrb.mxu2 %v3311_v10 }
 0x338   :  { %3525 = vmatpush.msrb.mxu1 %v3294_v53  ;;  %3563 = vmatpush.msra.mxu0 %v3328_v31 }
 0x339   :  { %3504 = vmatpush.msra.mxu3 %v3279_v32  ;;  %3545 = vmatpush.msrb.mxu2 %v3310_v30  ;;  %v3320_v32 = vld [vmem:[%s4749_s3 + $0x590] sm:$0xff]  ;;  %v3319_v30 = vld [vmem:[%s4749_s3 + $0x588] sm:$0xff]  ;;  %s3790_s3 = smov [#allocation10]  }
 0x33a   :  { %3526 = vmatpush.msrb.mxu1 %v3293_v7  ;;  %3564 = vmatpush.msra.mxu0 %v3327_v54  ;;  %v1355_v7 = vperm.slane %v4511_v57, 3  ;;  %s3588_s18 = sshll.u32 %s3790_s3, 4  ;;  %s3589_s18 = int_to_ptr.vmem [resolvable:$true] %s3588_s18 }
 0x33b   :  { %3505 = vmatpush.msra.mxu3 %v3278_v15  ;;  %3546 = vmatpush.msrb.mxu2 %v3309_v11 }
 0x33c   :  { %3527 = vmatpush.msrb.mxu1 %v3292_v18  ;;  %3565 = vmatpush.msra.mxu0 %v3326_v50 }
 0x33d   :  { %3506 = vmatpush.msra.mxu3 %v3277_v1  ;;  %3547 = vmatpush.msrb.mxu2 %v3308_v47 }
 0x33e   :  { %3528 = vmatpush.msrb.mxu1 %v3291_v62  ;;  %3566 = vmatpush.msra.mxu0 %v3325_v44 }
 0x33f   :  { %3507 = vmatpush.msra.mxu3 %v3276_v9  ;;  %3548 = vmatpush.msrb.mxu2 %v3307_v40 }
 0x340   :  { %3529 = vmatpush.msrb.mxu1 %v3290_v36  ;;  %3567 = vmatpush.msra.mxu0 %v3324_v63 }
 0x341   :  { %3508 = vmatpush.msra.mxu3 %v3275_v45  ;;  %3549 = vmatpush.msrb.mxu2 %v3306_v19 }
 0x342   :  { %3530 = vmatpush.msrb.mxu1 %v3289_v4  ;;  %3568 = vmatpush.msra.mxu0 %v3323_v8 }
 0x343   :  { %3509 = vmatpush.msra.mxu3 %v3274_v20  ;;  %3550 = vmatpush.msrb.mxu2 %v3305_v46  ;;  %v2943_v35 = vpop.f32.mrf.mxu3 }
 0x344   :  { %3531 = vmatpush.msrb.mxu1 %v3288_v56  ;;  %v2944_v42 = vadd.f32 %v2943_v35, %v2924_v60  ;;  %3569 = vmatpush.msra.mxu0 %v3322_v33 }
 0x345   :  { %3510 = vmatpush.msra.mxu3 %v3273_v55  ;;  %3551 = vmatpush.msrb.mxu2 %v3304_v2 }
 0x346   :  { %3532 = vmatpush.msrb.mxu1 %v3287_v27  ;;  %v2963_v0 = vpop.f32.mrf.mxu1  ;;  %3570 = vmatpush.msra.mxu0 %v3321_v51 }
 0x347   :  { %3511 = vmatpush.msra.mxu3 %v3272_v38  ;;  %3552 = vmatpush.msrb.mxu2 %v3303_v3  ;;  %v2964_v48 = vadd.f32 %v2963_v0, %v2944_v42 }
 0x348   :  { %3533 = vmatpush.msrb.mxu1 %v3286_v13  ;;  %3571 = vmatpush.msra.mxu0 %v3320_v32 }
 0x349   :  { %3512 = vmatpush.msra.mxu3 %v3271_v43  ;;  %3534 = vmatmul.f32.vlgmr.msrb.gmra.mxu1 %v3139_v58  ;;  %vm3116_vm12 = vcmp.gt.f32.partialorder %v2964_v48, 0.0  ;;  %v3128_v10 = vmul.f32 0.01, %v2964_v48 }
 0x34a   :  { %3553 = vmatpush.msrb.mxu2 %v3302_v34  ;;  %3572 = vmatpush.msra.mxu0 %v3319_v30 }
 0x34b   :  { %3513 = vmatpush.msra.mxu3 %v3270_v24  ;;  %v3140_v53 = vsel %vm3116_vm12, %v2964_v48, %v3128_v10 }
 0x34c   :  { %3514 = vmatmul.f32.vlgmr.msra.gmra.mxu3 %v3138_v41  ;;  %3554 = vmatmul.f32.vlgmr.msrb.gmra.mxu2 %v3140_v53 }
 0x34d   :  { %3573 = vmatpush.msra.mxu0 %v3318_v22 }
 0x352   :  { %v3003_v59 = vpop.f32.mrf.mxu0 }
 0x354   :  { %v3023_v21 = vpop.f32.mrf.mxu1 }
 0x359   :  { %v2983_v12 = vpop.f32.mrf.mxu2 }
 0x35a   :  { %v2984_v49 = vadd.f32 %v2983_v12, %v1355_v7 }
 0x35c   :  { %v3004_v15 = vadd.f32 %v3003_v59, %v2984_v49 }
 0x35e   :  { %v3024_v11 = vadd.f32 %v3023_v21, %v3004_v15  ;;  %v3083_v47 = vpop.f32.mrf.mxu0 }
 0x365   :  { %v3103_v52 = vpop.f32.mrf.mxu1 }
 0x368   :  { %v3063_v31 = vpop.f32.mrf.mxu2 }
 0x36d   :  { %v3043_v61 = vpop.f32.mrf.mxu3 }
 0x36e   :  { %v3044_v18 = vadd.f32 %v3043_v61, %v3024_v11 }
 0x370   :  { %v3064_v1 = vadd.f32 %v3063_v31, %v3044_v18 }
 0x372   :  { %v3084_v39 = vadd.f32 %v3083_v47, %v3064_v1 }
 0x374   :  { %v3104_v62 = vadd.f32 %v3103_v52, %v3084_v39 }
 0x376   :  { %vm3117_vm13 = vcmp.gt.f32.partialorder %v3104_v62, 0.0  ;;  %v3129_v54 = vmul.f32 0.01, %v3104_v62 }
 0x378   :  { %v3141_v17 = vsel %vm3117_vm13, %v3104_v62, %v3129_v54 }
 0x379   :  { %3574 = vmatmul.f32.vlgmr.msra.gmra.mxu0 %v3141_v17 }
 0x382   :  { %v3415_v16 = vpop.f32.mrf.mxu0 }
 0x385   :  { %v3375_v40 = vpop.f32.mrf.mxu1 }
 0x38c   :  { %v3395_v45 = vpop.f32.mrf.mxu2 }
 0x38f   :  { %v3355_v57 = vpop.f32.mrf.mxu3 }
 0x390   :  { %v3356_v9 = vadd.f32 %v3633_v6, %v3355_v57 }
 0x392   :  { %v3376_v36 = vadd.f32 %v3375_v40, %v3356_v9 }
 0x394   :  { %v3396_v19 = vadd.f32 %v3395_v45, %v3376_v36 }
 0x396   :  { %v3416_v4 = vadd.f32 %v3415_v16, %v3396_v19 }
 0x3a4   :  { %v3495_v55 = vpop.f32.mrf.mxu0 }
 0x3a6   :  { %v3455_v28 = vpop.f32.mrf.mxu1 }
 0x3ad   :  { %v3475_v46 = vpop.f32.mrf.mxu2 }
 0x3af   :  { %v3435_v25 = vpop.f32.mrf.mxu3 }
 0x3b0   :  { %v3436_v23 = vadd.f32 %v3435_v25, %v3416_v4 }
 0x3b2   :  { %v3456_v20 = vadd.f32 %v3455_v28, %v3436_v23 }
 0x3b4   :  { %v3476_v56 = vadd.f32 %v3475_v46, %v3456_v20 }
 0x3b6   :  { %v3496_v37 = vadd.f32 %v3495_v55, %v3476_v56 }
 0x3c6   :  { %v3535_v27 = vpop.f32.mrf.mxu1 }
 0x3cf   :  { %v3515_v2 = vpop.f32.mrf.mxu3  ;;  %v3555_v29 = vpop.f32.mrf.mxu2 }
 0x3d0   :  { %v3516_v5 = vadd.f32 %v3515_v2, %v3496_v37 }
 0x3d2   :  { %v3536_v14 = vadd.f32 %v3535_v27, %v3516_v5 }
 0x3d4   :  { %v3556_v38 = vadd.f32 %v3555_v29, %v3536_v14 }
 0x3f6   :  { %v3575_v3 = vpop.f32.mrf.mxu0 }
 0x3f7   :  { %v3576_v50 = vadd.f32 %v3575_v3, %v3556_v38 }
 0x3f9   :  { %vm3578_vm14 = vcmp.gt.f32.partialorder %v3576_v50, 0.0  ;;  %v3579_v13 = vmul.f32 0.01, %v3576_v50 }
 0x3fb   :  { %v3580_v43 = vsel %vm3578_vm14, %v3576_v50, %v3579_v13 }
 0x3fc   :  { %3582 = vst.msk [vmem:[#allocation10] sm:$0x3] %vm3581_vm15, %v3580_v43 }
 0x3fd   :  { %3593 = dma.vmem_to_hbm [thread:$0]  %s3589_s18, 32, %s3591_s21, [#allocation4]  }
 0x3fe   :  { %3782 = dma.done.wait [#allocation4], 32  }
 0x3ff   :  { %3783 = vsyncadd [#allocation4], 4294967264 }
 0x400   :  { %3598 = vsyncpa [#allocation3], 1 }
 0x401   :  { %3599 = vsyncpa [#allocation6], 1 }
 0x402   :  { %3600 = vsyncpa [#allocation9], 1 }
 0x403   :  { %3601 = vsyncpa [#allocation4], 1 }

</bundles_post_ra>
